<compile_context>
chip_gen: v7x
topology: tpu7x:2x2x1
jax: 0.10.0
libtpu: 0.0.40
codegen_flags: <defaults>
</compile_context>

<pallas_src>
import functools

import numpy as np
import jax
import jax.numpy as jnp
from jax.experimental import pallas as pl
from jax.experimental.pallas import tpu as pltpu


# Set to jnp.bfloat16 on v6e / v7x for MXU throughput when the model is scaled up.
# Keep elementwise math (softmax / LayerNorm) in f32 (required on v5e anyway).
MATMUL_DTYPE = jnp.float32


# ----------------------------------------------------------------------------
# In-kernel helpers (trace inline inside the fused layer kernel)
# ----------------------------------------------------------------------------

def _dot(a, b):
    return jnp.dot(a.astype(MATMUL_DTYPE), b.astype(MATMUL_DTYPE),
                   preferred_element_type=jnp.float32)


def _bdot(eq, a, b):
    # batched matmul (jnp.dot is not batched) — contracts last dims, no k.T needed.
    return jnp.einsum(eq, a.astype(MATMUL_DTYPE), b.astype(MATMUL_DTYPE),
                      preferred_element_type=jnp.float32)


def _add_layernorm(y, res, g, b):
    # residual add then LayerNorm over last dim (eps = 1e-5, PyTorch default)
    z = y + res
    mu = jnp.mean(z, axis=-1, keepdims=True)
    var = jnp.mean((z - mu) ** 2, axis=-1, keepdims=True)
    return (z - mu) * jax.lax.rsqrt(var + 1e-5) * g + b


def _mha_block(x_q, x_kv, wq, bq, wkv, bkv, wo, bo, mask, num_heads, scale):
    """Multi-head attention on lane-dense [N, S, H*d] activations.

    x_q: [N, Sq, D], x_kv: [N, Sk, D]; mask: None, [Sq, Sk] or [N, Sq, Sk]
    (nonzero == masked, matching torch masked_fill_).  Returns [N*Sq, D].
    """
    N, Sq, D = x_q.shape
    Sk = x_kv.shape[1]
    H = num_heads
    n_qk = wq.shape[1]                # H * d_k
    dk = n_qk // H
    dv = (wkv.shape[1] - n_qk) // H

    # Projections: one MXU pass each (K|V fused into a single wider matmul).
    q = _dot(x_q.reshape(N * Sq, D), wq) + bq          # [N*Sq, H*dk]
    kv = _dot(x_kv.reshape(N * Sk, D), wkv) + bkv      # [N*Sk, H*(dk+dv)]

    q = q.reshape(N, Sq, H * dk)
    k = kv[:, :n_qk].reshape(N, Sk, H * dk)
    v = kv[:, n_qk:].reshape(N, Sk, H * dv)

    masked = None
    if mask is not None:                               # hoisted out of the head loop
        m = mask if mask.ndim == 3 else mask[None]     # [N or 1, Sq, Sk]
        masked = m > 0.0

    ctx_heads = []
    for h in range(H):                                 # static unroll — no launch cost
        qh = q[:, :, h * dk:(h + 1) * dk]
        kh = k[:, :, h * dk:(h + 1) * dk]
        vh = v[:, :, h * dv:(h + 1) * dv]
        s = _bdot("nqd,nkd->nqk", qh, kh) * scale      # [N, Sq, Sk], no k transpose
        if masked is not None:
            s = jnp.where(masked, jnp.float32(-10000.0), s)
        s = s - jnp.max(s, axis=-1, keepdims=True)
        e = jnp.exp(s)
        p = e * pl.reciprocal(jnp.sum(e, axis=-1, keepdims=True), approx=True)
        ctx_heads.append(_bdot("nqk,nkd->nqd", p, vh))  # [N, Sq, dv]
    ctx = jnp.concatenate(ctx_heads, axis=-1)           # [N, Sq, H*dv] — lane dense
    return _dot(ctx.reshape(N * Sq, H * dv), wo) + bo   # [N*Sq, D]


# ----------------------------------------------------------------------------
# Fused decoder-layer Pallas kernel (one pallas_call per layer)
# ----------------------------------------------------------------------------

def _decoder_layer_kernel(*refs, num_heads, scale, has_dec_mask, has_cross_mask):
    it = iter(refs)
    x_ref = next(it)
    enc_ref = next(it)
    dec_mask = next(it)[...] if has_dec_mask else None
    cross_mask = next(it)[...] if has_cross_mask else None
    sa_wq, sa_bq, sa_wkv, sa_bkv, sa_wo, sa_bo = [next(it)[...] for _ in range(6)]
    ln1_g = next(it)[...]
    ln1_b = next(it)[...]
    ca_wq, ca_bq, ca_wkv, ca_bkv, ca_wo, ca_bo = [next(it)[...] for _ in range(6)]
    ln2_g = next(it)[...]
    ln2_b = next(it)[...]
    w1, b1, w2, b2 = [next(it)[...] for _ in range(4)]
    ln3_g = next(it)[...]
    ln3_b = next(it)[...]
    o_ref = next(it)                                    # output ref is last

    x = x_ref[...]                                      # [N, S, D]
    enc = enc_ref[...]                                  # [N, Se, D]
    N, S, D = x.shape
    x_flat = x.reshape(N * S, D)

    # --- self-attention + add & norm1 ---
    ctx = _mha_block(x, x, sa_wq, sa_bq, sa_wkv, sa_bkv, sa_wo, sa_bo,
                     dec_mask, num_heads, scale)
    h1 = _add_layernorm(ctx, x_flat, ln1_g, ln1_b)      # [N*S, D]

    # --- encoder-decoder cross-attention + add & norm2 ---
    ctx = _mha_block(h1.reshape(N, S, D), enc, ca_wq, ca_bq, ca_wkv, ca_bkv,
                     ca_wo, ca_bo, cross_mask, num_heads, scale)
    h2 = _add_layernorm(ctx, h1, ln2_g, ln2_b)

    # --- position-wise FFN (1x1 Conv1d == per-position linear) + add & norm3 ---
    f = jnp.maximum(_dot(h2, w1) + b1, 0.0)
    f = _dot(f, w2) + b2
    h3 = _add_layernorm(f, h2, ln3_g, ln3_b)

    o_ref[...] = h3.reshape(N, S, D)


def decoder_layer(params, x, enc_out, dec_mask, dec_enc_mask, num_heads):
    N, S, D = x.shape
    scale = 1.0 / float(np.sqrt(D // num_heads))        # 1/sqrt(d_k)
    sa, ca = params["dec_attn"], params["enc_dec_attn"]

    args = [x, enc_out]
    if dec_mask is not None:
        args.append(dec_mask)
    if dec_enc_mask is not None:
        args.append(dec_enc_mask)
    args += [sa["wq"], sa["bq"], sa["wkv"], sa["bkv"], sa["wo"], sa["bo"],
             params["ln1_g"], params["ln1_b"],
             ca["wq"], ca["bq"], ca["wkv"], ca["bkv"], ca["wo"], ca["bo"],
             params["ln2_g"], params["ln2_b"],
             params["w1"], params["b1"], params["w2"], params["b2"],
             params["ln3_g"], params["ln3_b"]]

    kernel = functools.partial(
        _decoder_layer_kernel, num_heads=num_heads, scale=scale,
        has_dec_mask=dec_mask is not None, has_cross_mask=dec_enc_mask is not None)

    vmem = pl.BlockSpec(memory_space=pltpu.MemorySpace.VMEM)
    # At these shapes everything (weights + activations) trivially fits VMEM, so a
    # single un-gridded call is optimal.  TODO(synk): for large M = N*S / d_ff, add a
    # row-tiled grid ('parallel') and a dff-reduction axis ('arbitrary') with an f32
    # VMEM accumulator to stay within v7x's 64 MiB VMEM.
    return pl.pallas_call(
        kernel,
        out_shape=jax.ShapeDtypeStruct((N, S, D), jnp.float32),
        in_specs=[vmem] * len(args),
        out_specs=vmem,
    )(*args)


# ----------------------------------------------------------------------------
# Model glue (plain JAX): embedding lookup + positional add + layer loop
# ----------------------------------------------------------------------------

def decoder_forward(params, labels, enc_out, dec_mask, dec_enc_mask, *, num_heads):
    S = labels.shape[1]
    tgt_emb = jnp.take(params["tgt_emb"], labels, axis=0)   # embedding gather (XLA glue)
    x = tgt_emb + params["pos_emb"][:S][None, :, :]
    # dropout_emb with p=0.0 -> identity
    for lp in params["layers"]:
        x = decoder_layer(lp, x, enc_out, dec_mask, dec_enc_mask, num_heads)
    return x


# ----------------------------------------------------------------------------
# Deterministic parameter construction (mirrors __init__ shapes & init stds)
# ----------------------------------------------------------------------------

def pos_sinusoid_embedding(seq_len, d_model):
    emb = np.zeros((seq_len, d_model), dtype=np.float32)
    pos = np.arange(seq_len, dtype=np.float64)
    for i in range(d_model):
        f = np.sin if i % 2 == 0 else np.cos
        emb[:, i] = f(pos / np.power(10000.0, 2 * (i // 2) / d_model))
    return jnp.asarray(emb, dtype=jnp.float32)


def init_mha_params(key, d_model, d_k, d_v, num_heads):
    kq, kk, kv, ko = jax.random.split(key, 4)
    std_k = np.sqrt(2.0 / (d_model + d_k))
    std_v = np.sqrt(2.0 / (d_model + d_v))
    # weights stored as [Din, Dout] (transposed vs. torch's [out, in])
    wk = std_k * jax.random.normal(kk, (d_model, d_k * num_heads), jnp.float32)
    wv = std_v * jax.random.normal(kv, (d_model, d_v * num_heads), jnp.float32)
    return {
        "wq": std_k * jax.random.normal(kq, (d_model, d_k * num_heads), jnp.float32),
        "bq": jnp.zeros((1, d_k * num_heads), jnp.float32),
        # W_K | W_V concatenated -> single wider matmul, split inside the kernel
        "wkv": jnp.concatenate([wk, wv], axis=1),
        "bkv": jnp.zeros((1, (d_k + d_v) * num_heads), jnp.float32),
        "wo": std_v * jax.random.normal(ko, (d_v * num_heads, d_model), jnp.float32),
        "bo": jnp.zeros((1, d_model), jnp.float32),
    }


def init_layer_params(key, dim, num_heads, dff):
    hdim = dim // num_heads
    k1, k2, k3, k4 = jax.random.split(key, 4)
    return {
        "dec_attn": init_mha_params(k1, dim, hdim, hdim, num_heads),
        "enc_dec_attn": init_mha_params(k2, dim, hdim, hdim, num_heads),
        "ln1_g": jnp.ones((1, dim), jnp.float32), "ln1_b": jnp.zeros((1, dim), jnp.float32),
        "ln2_g": jnp.ones((1, dim), jnp.float32), "ln2_b": jnp.zeros((1, dim), jnp.float32),
        "ln3_g": jnp.ones((1, dim), jnp.float32), "ln3_b": jnp.zeros((1, dim), jnp.float32),
        # Conv1d(d_model, d_ff, 1) == linear [dim, dff]; Conv1d(d_ff, d_model, 1) == [dff, dim]
        "w1": 0.02 * jax.random.normal(k3, (dim, dff), jnp.float32),
        "b1": jnp.zeros((1, dff), jnp.float32),
        "w2": 0.02 * jax.random.normal(k4, (dff, dim), jnp.float32),
        "b2": jnp.zeros((1, dim), jnp.float32),
    }


def init_decoder_params(key, num_layers, dec_dim, num_heads, dff, tgt_len, tgt_vocab_size):
    keys = jax.random.split(key, num_layers + 1)
    return {
        "tgt_emb": jax.random.normal(keys[0], (tgt_vocab_size, dec_dim), jnp.float32),
        "pos_emb": pos_sinusoid_embedding(tgt_len, dec_dim),
        "layers": [init_layer_params(keys[i + 1], dec_dim, num_heads, dff)
                   for i in range(num_layers)],
    }


# ----------------------------------------------------------------------------
# Main
# ----------------------------------------------------------------------------

if __name__ == "__main__":
    # small config
    N = 2            # batch
    tgt_len = 8      # decoder sequence length
    enc_len = 8      # encoder sequence length
    dec_dim = 32     # model dim
    num_heads = 4    # -> head dim 8
    dff = 64
    tgt_vocab_size = 50
    num_layers = 2

    root = jax.random.PRNGKey(0)
    k_param, k_lbl, k_enc = jax.random.split(root, 3)

    params = init_decoder_params(k_param, num_layers, dec_dim, num_heads, dff,
                                 tgt_len, tgt_vocab_size)

    labels = jax.random.randint(k_lbl, (N, tgt_len), 0, tgt_vocab_size, dtype=jnp.int32)
    enc_out = jax.random.normal(k_enc, (N, enc_len, dec_dim), jnp.float32)

    # causal self-attention mask: single [Sq, Sk] array broadcast in-kernel
    # (1.0 = masked, matching torch masked_fill_ with a bool mask)
    dec_mask = jnp.triu(jnp.ones((tgt_len, tgt_len), jnp.float32), k=1)
    # cross-attention is statically unmasked in this demo -> skip mask entirely
    dec_enc_mask = None

    fwd = jax.jit(functools.partial(decoder_forward, num_heads=num_heads))
    out = fwd(params, labels, enc_out, dec_mask, dec_enc_mask)
    out = jax.block_until_ready(out)

    assert out.shape == (N, tgt_len, dec_dim)
    assert bool(jnp.all(jnp.isfinite(out)))
    print("KERNEL_OK")
</pallas_src>

<mosaic_0001>
module attributes {stable_mosaic.version = 11 : i64} {
  func.func @_decoder_layer_kernel(%arg0: memref<2x8x32xf32, #tpu.memory_space<vmem>>, %arg1: memref<2x8x32xf32, #tpu.memory_space<vmem>>, %arg2: memref<8x8xf32, #tpu.memory_space<vmem>>, %arg3: memref<32x32xf32, #tpu.memory_space<vmem>>, %arg4: memref<1x32xf32, #tpu.memory_space<vmem>>, %arg5: memref<32x64xf32, #tpu.memory_space<vmem>>, %arg6: memref<1x64xf32, #tpu.memory_space<vmem>>, %arg7: memref<32x32xf32, #tpu.memory_space<vmem>>, %arg8: memref<1x32xf32, #tpu.memory_space<vmem>>, %arg9: memref<1x32xf32, #tpu.memory_space<vmem>>, %arg10: memref<1x32xf32, #tpu.memory_space<vmem>>, %arg11: memref<32x32xf32, #tpu.memory_space<vmem>>, %arg12: memref<1x32xf32, #tpu.memory_space<vmem>>, %arg13: memref<32x64xf32, #tpu.memory_space<vmem>>, %arg14: memref<1x64xf32, #tpu.memory_space<vmem>>, %arg15: memref<32x32xf32, #tpu.memory_space<vmem>>, %arg16: memref<1x32xf32, #tpu.memory_space<vmem>>, %arg17: memref<1x32xf32, #tpu.memory_space<vmem>>, %arg18: memref<1x32xf32, #tpu.memory_space<vmem>>, %arg19: memref<32x64xf32, #tpu.memory_space<vmem>>, %arg20: memref<1x64xf32, #tpu.memory_space<vmem>>, %arg21: memref<64x32xf32, #tpu.memory_space<vmem>>, %arg22: memref<1x32xf32, #tpu.memory_space<vmem>>, %arg23: memref<1x32xf32, #tpu.memory_space<vmem>>, %arg24: memref<1x32xf32, #tpu.memory_space<vmem>>, %arg25: memref<2x8x32xf32, #tpu.memory_space<vmem>>) attributes {dimension_semantics = [], scalar_prefetch = 0 : i64, scratch_operands = 0 : i64, tpu.core_type = #tpu.core_type<tc>} {
    %c0 = arith.constant 0 : index
    %c0_0 = arith.constant 0 : index
    %0 = vector.load %arg2[%c0, %c0_0] : memref<8x8xf32, #tpu.memory_space<vmem>>, vector<8x8xf32>
    %c0_1 = arith.constant 0 : index
    %c0_2 = arith.constant 0 : index
    %1 = vector.load %arg3[%c0_1, %c0_2] : memref<32x32xf32, #tpu.memory_space<vmem>>, vector<32x32xf32>
    %c0_3 = arith.constant 0 : index
    %c0_4 = arith.constant 0 : index
    %2 = vector.load %arg4[%c0_3, %c0_4] : memref<1x32xf32, #tpu.memory_space<vmem>>, vector<1x32xf32>
    %c0_5 = arith.constant 0 : index
    %c0_6 = arith.constant 0 : index
    %3 = vector.load %arg5[%c0_5, %c0_6] : memref<32x64xf32, #tpu.memory_space<vmem>>, vector<32x64xf32>
    %c0_7 = arith.constant 0 : index
    %c0_8 = arith.constant 0 : index
    %4 = vector.load %arg6[%c0_7, %c0_8] : memref<1x64xf32, #tpu.memory_space<vmem>>, vector<1x64xf32>
    %c0_9 = arith.constant 0 : index
    %c0_10 = arith.constant 0 : index
    %5 = vector.load %arg7[%c0_9, %c0_10] : memref<32x32xf32, #tpu.memory_space<vmem>>, vector<32x32xf32>
    %c0_11 = arith.constant 0 : index
    %c0_12 = arith.constant 0 : index
    %6 = vector.load %arg8[%c0_11, %c0_12] : memref<1x32xf32, #tpu.memory_space<vmem>>, vector<1x32xf32>
    %c0_13 = arith.constant 0 : index
    %c0_14 = arith.constant 0 : index
    %7 = vector.load %arg9[%c0_13, %c0_14] : memref<1x32xf32, #tpu.memory_space<vmem>>, vector<1x32xf32>
    %c0_15 = arith.constant 0 : index
    %c0_16 = arith.constant 0 : index
    %8 = vector.load %arg10[%c0_15, %c0_16] : memref<1x32xf32, #tpu.memory_space<vmem>>, vector<1x32xf32>
    %c0_17 = arith.constant 0 : index
    %c0_18 = arith.constant 0 : index
    %9 = vector.load %arg11[%c0_17, %c0_18] : memref<32x32xf32, #tpu.memory_space<vmem>>, vector<32x32xf32>
    %c0_19 = arith.constant 0 : index
    %c0_20 = arith.constant 0 : index
    %10 = vector.load %arg12[%c0_19, %c0_20] : memref<1x32xf32, #tpu.memory_space<vmem>>, vector<1x32xf32>
    %c0_21 = arith.constant 0 : index
    %c0_22 = arith.constant 0 : index
    %11 = vector.load %arg13[%c0_21, %c0_22] : memref<32x64xf32, #tpu.memory_space<vmem>>, vector<32x64xf32>
    %c0_23 = arith.constant 0 : index
    %c0_24 = arith.constant 0 : index
    %12 = vector.load %arg14[%c0_23, %c0_24] : memref<1x64xf32, #tpu.memory_space<vmem>>, vector<1x64xf32>
    %c0_25 = arith.constant 0 : index
    %c0_26 = arith.constant 0 : index
    %13 = vector.load %arg15[%c0_25, %c0_26] : memref<32x32xf32, #tpu.memory_space<vmem>>, vector<32x32xf32>
    %c0_27 = arith.constant 0 : index
    %c0_28 = arith.constant 0 : index
    %14 = vector.load %arg16[%c0_27, %c0_28] : memref<1x32xf32, #tpu.memory_space<vmem>>, vector<1x32xf32>
    %c0_29 = arith.constant 0 : index
    %c0_30 = arith.constant 0 : index
    %15 = vector.load %arg17[%c0_29, %c0_30] : memref<1x32xf32, #tpu.memory_space<vmem>>, vector<1x32xf32>
    %c0_31 = arith.constant 0 : index
    %c0_32 = arith.constant 0 : index
    %16 = vector.load %arg18[%c0_31, %c0_32] : memref<1x32xf32, #tpu.memory_space<vmem>>, vector<1x32xf32>
    %c0_33 = arith.constant 0 : index
    %c0_34 = arith.constant 0 : index
    %17 = vector.load %arg19[%c0_33, %c0_34] : memref<32x64xf32, #tpu.memory_space<vmem>>, vector<32x64xf32>
    %c0_35 = arith.constant 0 : index
    %c0_36 = arith.constant 0 : index
    %18 = vector.load %arg20[%c0_35, %c0_36] : memref<1x64xf32, #tpu.memory_space<vmem>>, vector<1x64xf32>
    %c0_37 = arith.constant 0 : index
    %c0_38 = arith.constant 0 : index
    %19 = vector.load %arg21[%c0_37, %c0_38] : memref<64x32xf32, #tpu.memory_space<vmem>>, vector<64x32xf32>
    %c0_39 = arith.constant 0 : index
    %c0_40 = arith.constant 0 : index
    %20 = vector.load %arg22[%c0_39, %c0_40] : memref<1x32xf32, #tpu.memory_space<vmem>>, vector<1x32xf32>
    %c0_41 = arith.constant 0 : index
    %c0_42 = arith.constant 0 : index
    %21 = vector.load %arg23[%c0_41, %c0_42] : memref<1x32xf32, #tpu.memory_space<vmem>>, vector<1x32xf32>
    %c0_43 = arith.constant 0 : index
    %c0_44 = arith.constant 0 : index
    %22 = vector.load %arg24[%c0_43, %c0_44] : memref<1x32xf32, #tpu.memory_space<vmem>>, vector<1x32xf32>
    %c0_45 = arith.constant 0 : index
    %c0_46 = arith.constant 0 : index
    %c0_47 = arith.constant 0 : index
    %23 = vector.load %arg0[%c0_45, %c0_46, %c0_47] : memref<2x8x32xf32, #tpu.memory_space<vmem>>, vector<2x8x32xf32>
    %c0_48 = arith.constant 0 : index
    %c0_49 = arith.constant 0 : index
    %c0_50 = arith.constant 0 : index
    %24 = vector.load %arg1[%c0_48, %c0_49, %c0_50] : memref<2x8x32xf32, #tpu.memory_space<vmem>>, vector<2x8x32xf32>
    %25 = vector.shape_cast %23 : vector<2x8x32xf32> to vector<16x32xf32>
    %26 = vector.shape_cast %23 : vector<2x8x32xf32> to vector<16x32xf32>
    %cst = arith.constant dense<0.000000e+00> : vector<16x32xf32>
    %27 = tpu.matmul %26, %1, %cst {dimension_numbers = #tpu.dot_dimension_numbers<[1], [0], [0], [1], [0, 0, 1, 1], [], []>} : vector<16x32xf32>, vector<32x32xf32>, vector<16x32xf32> -> vector<16x32xf32>
    %28 = vector.broadcast %2 : vector<1x32xf32> to vector<16x32xf32>
    %29 = arith.addf %27, %28 : vector<16x32xf32>
    %30 = vector.shape_cast %23 : vector<2x8x32xf32> to vector<16x32xf32>
    %cst_51 = arith.constant dense<0.000000e+00> : vector<16x64xf32>
    %31 = tpu.matmul %30, %3, %cst_51 {dimension_numbers = #tpu.dot_dimension_numbers<[1], [0], [0], [1], [0, 0, 1, 1], [], []>} : vector<16x32xf32>, vector<32x64xf32>, vector<16x64xf32> -> vector<16x64xf32>
    %32 = vector.broadcast %4 : vector<1x64xf32> to vector<16x64xf32>
    %33 = arith.addf %31, %32 : vector<16x64xf32>
    %34 = vector.shape_cast %29 : vector<16x32xf32> to vector<2x8x32xf32>
    %35 = vector.extract_strided_slice %33 {offsets = [0, 0], sizes = [16, 32], strides = [1, 1]} : vector<16x64xf32> to vector<16x32xf32>
    %36 = vector.shape_cast %35 : vector<16x32xf32> to vector<2x8x32xf32>
    %37 = vector.extract_strided_slice %33 {offsets = [0, 32], sizes = [16, 32], strides = [1, 1]} : vector<16x64xf32> to vector<16x32xf32>
    %38 = vector.shape_cast %37 : vector<16x32xf32> to vector<2x8x32xf32>
    %39 = vector.shape_cast %0 : vector<8x8xf32> to vector<1x8x8xf32>
    %cst_52 = arith.constant 0.000000e+00 : f32
    %40 = vector.broadcast %cst_52 : f32 to vector<1x8x8xf32>
    %41 = arith.cmpf ogt, %39, %40 : vector<1x8x8xf32>
    %42 = vector.extract_strided_slice %34 {offsets = [0, 0, 0], sizes = [2, 8, 8], strides = [1, 1, 1]} : vector<2x8x32xf32> to vector<2x8x8xf32>
    %43 = vector.extract_strided_slice %36 {offsets = [0, 0, 0], sizes = [2, 8, 8], strides = [1, 1, 1]} : vector<2x8x32xf32> to vector<2x8x8xf32>
    %44 = vector.extract_strided_slice %38 {offsets = [0, 0, 0], sizes = [2, 8, 8], strides = [1, 1, 1]} : vector<2x8x32xf32> to vector<2x8x8xf32>
    "tpu.trace_start"() <{level = 10 : i32, message = "nqd,nkd->nqk"}> : () -> ()
    %cst_53 = arith.constant dense<0.000000e+00> : vector<2x8x8xf32>
    %45 = tpu.matmul %42, %43, %cst_53 {dimension_numbers = #tpu.dot_dimension_numbers<[2], [2], [1], [1], [0, 0, 0, 1, 1, 1], [0], [0]>} : vector<2x8x8xf32>, vector<2x8x8xf32>, vector<2x8x8xf32> -> vector<2x8x8xf32>
    "tpu.trace_stop"() : () -> ()
    %cst_54 = arith.constant 0.353553385 : f32
    %46 = vector.broadcast %cst_54 : f32 to vector<2x8x8xf32>
    %47 = arith.mulf %45, %46 : vector<2x8x8xf32>
    %cst_55 = arith.constant -1.000000e+04 : f32
    %48 = vector.shape_cast %41 : vector<1x8x8xi1> to vector<1x8x8xi1>
    %49 = vector.broadcast %48 : vector<1x8x8xi1> to vector<2x8x8xi1>
    %50 = vector.broadcast %cst_55 : f32 to vector<2x8x8xf32>
    %51 = arith.select %49, %50, %47 : vector<2x8x8xi1>, vector<2x8x8xf32>
    %cst_56 = arith.constant dense<0xFF800000> : vector<2x8xf32>
    %52 = vector.multi_reduction <maximumf>, %51, %cst_56 [2] : vector<2x8x8xf32> to vector<2x8xf32>
    %53 = vector.shape_cast %52 : vector<2x8xf32> to vector<2x8x1xf32>
    %54 = vector.broadcast %53 : vector<2x8x1xf32> to vector<2x8x8xf32>
    %55 = arith.subf %51, %54 : vector<2x8x8xf32>
    %56 = math.exp %55 : vector<2x8x8xf32>
    %cst_57 = arith.constant dense<0.000000e+00> : vector<2x8xf32>
    %57 = vector.multi_reduction <add>, %56, %cst_57 [2] : vector<2x8x8xf32> to vector<2x8xf32>
    %58 = vector.shape_cast %57 : vector<2x8xf32> to vector<2x8x1xf32>
    %59 = tpu.reciprocal %58 {approx = true} : vector<2x8x1xf32> -> vector<2x8x1xf32>
    %60 = vector.broadcast %59 : vector<2x8x1xf32> to vector<2x8x8xf32>
    %61 = arith.mulf %56, %60 : vector<2x8x8xf32>
    "tpu.trace_start"() <{level = 10 : i32, message = "nqk,nkd->nqd"}> : () -> ()
    %cst_58 = arith.constant dense<0.000000e+00> : vector<2x8x8xf32>
    %62 = tpu.matmul %61, %44, %cst_58 {dimension_numbers = #tpu.dot_dimension_numbers<[2], [1], [1], [2], [0, 0, 0, 1, 1, 2], [0], [0]>} : vector<2x8x8xf32>, vector<2x8x8xf32>, vector<2x8x8xf32> -> vector<2x8x8xf32>
    "tpu.trace_stop"() : () -> ()
    %63 = vector.extract_strided_slice %34 {offsets = [0, 0, 8], sizes = [2, 8, 8], strides = [1, 1, 1]} : vector<2x8x32xf32> to vector<2x8x8xf32>
    %64 = vector.extract_strided_slice %36 {offsets = [0, 0, 8], sizes = [2, 8, 8], strides = [1, 1, 1]} : vector<2x8x32xf32> to vector<2x8x8xf32>
    %65 = vector.extract_strided_slice %38 {offsets = [0, 0, 8], sizes = [2, 8, 8], strides = [1, 1, 1]} : vector<2x8x32xf32> to vector<2x8x8xf32>
    "tpu.trace_start"() <{level = 10 : i32, message = "nqd,nkd->nqk"}> : () -> ()
    %cst_59 = arith.constant dense<0.000000e+00> : vector<2x8x8xf32>
    %66 = tpu.matmul %63, %64, %cst_59 {dimension_numbers = #tpu.dot_dimension_numbers<[2], [2], [1], [1], [0, 0, 0, 1, 1, 1], [0], [0]>} : vector<2x8x8xf32>, vector<2x8x8xf32>, vector<2x8x8xf32> -> vector<2x8x8xf32>
    "tpu.trace_stop"() : () -> ()
    %cst_60 = arith.constant 0.353553385 : f32
    %67 = vector.broadcast %cst_60 : f32 to vector<2x8x8xf32>
    %68 = arith.mulf %66, %67 : vector<2x8x8xf32>
    %cst_61 = arith.constant -1.000000e+04 : f32
    %69 = vector.shape_cast %41 : vector<1x8x8xi1> to vector<1x8x8xi1>
    %70 = vector.broadcast %69 : vector<1x8x8xi1> to vector<2x8x8xi1>
    %71 = vector.broadcast %cst_61 : f32 to vector<2x8x8xf32>
    %72 = arith.select %70, %71, %68 : vector<2x8x8xi1>, vector<2x8x8xf32>
    %cst_62 = arith.constant dense<0xFF800000> : vector<2x8xf32>
    %73 = vector.multi_reduction <maximumf>, %72, %cst_62 [2] : vector<2x8x8xf32> to vector<2x8xf32>
    %74 = vector.shape_cast %73 : vector<2x8xf32> to vector<2x8x1xf32>
    %75 = vector.broadcast %74 : vector<2x8x1xf32> to vector<2x8x8xf32>
    %76 = arith.subf %72, %75 : vector<2x8x8xf32>
    %77 = math.exp %76 : vector<2x8x8xf32>
    %cst_63 = arith.constant dense<0.000000e+00> : vector<2x8xf32>
    %78 = vector.multi_reduction <add>, %77, %cst_63 [2] : vector<2x8x8xf32> to vector<2x8xf32>
    %79 = vector.shape_cast %78 : vector<2x8xf32> to vector<2x8x1xf32>
    %80 = tpu.reciprocal %79 {approx = true} : vector<2x8x1xf32> -> vector<2x8x1xf32>
    %81 = vector.broadcast %80 : vector<2x8x1xf32> to vector<2x8x8xf32>
    %82 = arith.mulf %77, %81 : vector<2x8x8xf32>
    "tpu.trace_start"() <{level = 10 : i32, message = "nqk,nkd->nqd"}> : () -> ()
    %cst_64 = arith.constant dense<0.000000e+00> : vector<2x8x8xf32>
    %83 = tpu.matmul %82, %65, %cst_64 {dimension_numbers = #tpu.dot_dimension_numbers<[2], [1], [1], [2], [0, 0, 0, 1, 1, 2], [0], [0]>} : vector<2x8x8xf32>, vector<2x8x8xf32>, vector<2x8x8xf32> -> vector<2x8x8xf32>
    "tpu.trace_stop"() : () -> ()
    %84 = vector.extract_strided_slice %34 {offsets = [0, 0, 16], sizes = [2, 8, 8], strides = [1, 1, 1]} : vector<2x8x32xf32> to vector<2x8x8xf32>
    %85 = vector.extract_strided_slice %36 {offsets = [0, 0, 16], sizes = [2, 8, 8], strides = [1, 1, 1]} : vector<2x8x32xf32> to vector<2x8x8xf32>
    %86 = vector.extract_strided_slice %38 {offsets = [0, 0, 16], sizes = [2, 8, 8], strides = [1, 1, 1]} : vector<2x8x32xf32> to vector<2x8x8xf32>
    "tpu.trace_start"() <{level = 10 : i32, message = "nqd,nkd->nqk"}> : () -> ()
    %cst_65 = arith.constant dense<0.000000e+00> : vector<2x8x8xf32>
    %87 = tpu.matmul %84, %85, %cst_65 {dimension_numbers = #tpu.dot_dimension_numbers<[2], [2], [1], [1], [0, 0, 0, 1, 1, 1], [0], [0]>} : vector<2x8x8xf32>, vector<2x8x8xf32>, vector<2x8x8xf32> -> vector<2x8x8xf32>
    "tpu.trace_stop"() : () -> ()
    %cst_66 = arith.constant 0.353553385 : f32
    %88 = vector.broadcast %cst_66 : f32 to vector<2x8x8xf32>
    %89 = arith.mulf %87, %88 : vector<2x8x8xf32>
    %cst_67 = arith.constant -1.000000e+04 : f32
    %90 = vector.shape_cast %41 : vector<1x8x8xi1> to vector<1x8x8xi1>
    %91 = vector.broadcast %90 : vector<1x8x8xi1> to vector<2x8x8xi1>
    %92 = vector.broadcast %cst_67 : f32 to vector<2x8x8xf32>
    %93 = arith.select %91, %92, %89 : vector<2x8x8xi1>, vector<2x8x8xf32>
    %cst_68 = arith.constant dense<0xFF800000> : vector<2x8xf32>
    %94 = vector.multi_reduction <maximumf>, %93, %cst_68 [2] : vector<2x8x8xf32> to vector<2x8xf32>
    %95 = vector.shape_cast %94 : vector<2x8xf32> to vector<2x8x1xf32>
    %96 = vector.broadcast %95 : vector<2x8x1xf32> to vector<2x8x8xf32>
    %97 = arith.subf %93, %96 : vector<2x8x8xf32>
    %98 = math.exp %97 : vector<2x8x8xf32>
    %cst_69 = arith.constant dense<0.000000e+00> : vector<2x8xf32>
    %99 = vector.multi_reduction <add>, %98, %cst_69 [2] : vector<2x8x8xf32> to vector<2x8xf32>
    %100 = vector.shape_cast %99 : vector<2x8xf32> to vector<2x8x1xf32>
    %101 = tpu.reciprocal %100 {approx = true} : vector<2x8x1xf32> -> vector<2x8x1xf32>
    %102 = vector.broadcast %101 : vector<2x8x1xf32> to vector<2x8x8xf32>
    %103 = arith.mulf %98, %102 : vector<2x8x8xf32>
    "tpu.trace_start"() <{level = 10 : i32, message = "nqk,nkd->nqd"}> : () -> ()
    %cst_70 = arith.constant dense<0.000000e+00> : vector<2x8x8xf32>
    %104 = tpu.matmul %103, %86, %cst_70 {dimension_numbers = #tpu.dot_dimension_numbers<[2], [1], [1], [2], [0, 0, 0, 1, 1, 2], [0], [0]>} : vector<2x8x8xf32>, vector<2x8x8xf32>, vector<2x8x8xf32> -> vector<2x8x8xf32>
    "tpu.trace_stop"() : () -> ()
    %105 = vector.extract_strided_slice %34 {offsets = [0, 0, 24], sizes = [2, 8, 8], strides = [1, 1, 1]} : vector<2x8x32xf32> to vector<2x8x8xf32>
    %106 = vector.extract_strided_slice %36 {offsets = [0, 0, 24], sizes = [2, 8, 8], strides = [1, 1, 1]} : vector<2x8x32xf32> to vector<2x8x8xf32>
    %107 = vector.extract_strided_slice %38 {offsets = [0, 0, 24], sizes = [2, 8, 8], strides = [1, 1, 1]} : vector<2x8x32xf32> to vector<2x8x8xf32>
    "tpu.trace_start"() <{level = 10 : i32, message = "nqd,nkd->nqk"}> : () -> ()
    %cst_71 = arith.constant dense<0.000000e+00> : vector<2x8x8xf32>
    %108 = tpu.matmul %105, %106, %cst_71 {dimension_numbers = #tpu.dot_dimension_numbers<[2], [2], [1], [1], [0, 0, 0, 1, 1, 1], [0], [0]>} : vector<2x8x8xf32>, vector<2x8x8xf32>, vector<2x8x8xf32> -> vector<2x8x8xf32>
    "tpu.trace_stop"() : () -> ()
    %cst_72 = arith.constant 0.353553385 : f32
    %109 = vector.broadcast %cst_72 : f32 to vector<2x8x8xf32>
    %110 = arith.mulf %108, %109 : vector<2x8x8xf32>
    %cst_73 = arith.constant -1.000000e+04 : f32
    %111 = vector.shape_cast %41 : vector<1x8x8xi1> to vector<1x8x8xi1>
    %112 = vector.broadcast %111 : vector<1x8x8xi1> to vector<2x8x8xi1>
    %113 = vector.broadcast %cst_73 : f32 to vector<2x8x8xf32>
    %114 = arith.select %112, %113, %110 : vector<2x8x8xi1>, vector<2x8x8xf32>
    %cst_74 = arith.constant dense<0xFF800000> : vector<2x8xf32>
    %115 = vector.multi_reduction <maximumf>, %114, %cst_74 [2] : vector<2x8x8xf32> to vector<2x8xf32>
    %116 = vector.shape_cast %115 : vector<2x8xf32> to vector<2x8x1xf32>
    %117 = vector.broadcast %116 : vector<2x8x1xf32> to vector<2x8x8xf32>
    %118 = arith.subf %114, %117 : vector<2x8x8xf32>
    %119 = math.exp %118 : vector<2x8x8xf32>
    %cst_75 = arith.constant dense<0.000000e+00> : vector<2x8xf32>
    %120 = vector.multi_reduction <add>, %119, %cst_75 [2] : vector<2x8x8xf32> to vector<2x8xf32>
    %121 = vector.shape_cast %120 : vector<2x8xf32> to vector<2x8x1xf32>
    %122 = tpu.reciprocal %121 {approx = true} : vector<2x8x1xf32> -> vector<2x8x1xf32>
    %123 = vector.broadcast %122 : vector<2x8x1xf32> to vector<2x8x8xf32>
    %124 = arith.mulf %119, %123 : vector<2x8x8xf32>
    "tpu.trace_start"() <{level = 10 : i32, message = "nqk,nkd->nqd"}> : () -> ()
    %cst_76 = arith.constant dense<0.000000e+00> : vector<2x8x8xf32>
    %125 = tpu.matmul %124, %107, %cst_76 {dimension_numbers = #tpu.dot_dimension_numbers<[2], [1], [1], [2], [0, 0, 0, 1, 1, 2], [0], [0]>} : vector<2x8x8xf32>, vector<2x8x8xf32>, vector<2x8x8xf32> -> vector<2x8x8xf32>
    "tpu.trace_stop"() : () -> ()
    %126 = tpu.concatenate %62, %83, %104, %125 in 2 : vector<2x8x8xf32>, vector<2x8x8xf32>, vector<2x8x8xf32>, vector<2x8x8xf32> -> vector<2x8x32xf32>
    %127 = vector.shape_cast %126 : vector<2x8x32xf32> to vector<16x32xf32>
    %cst_77 = arith.constant dense<0.000000e+00> : vector<16x32xf32>
    %128 = tpu.matmul %127, %5, %cst_77 {dimension_numbers = #tpu.dot_dimension_numbers<[1], [0], [0], [1], [0, 0, 1, 1], [], []>} : vector<16x32xf32>, vector<32x32xf32>, vector<16x32xf32> -> vector<16x32xf32>
    %129 = vector.broadcast %6 : vector<1x32xf32> to vector<16x32xf32>
    %130 = arith.addf %128, %129 : vector<16x32xf32>
    %131 = arith.addf %130, %25 : vector<16x32xf32>
    %cst_78 = arith.constant dense<0.000000e+00> : vector<16xf32>
    %132 = vector.multi_reduction <add>, %131, %cst_78 [1] : vector<16x32xf32> to vector<16xf32>
    %133 = vector.shape_cast %132 : vector<16xf32> to vector<16x1xf32>
    %cst_79 = arith.constant 3.200000e+01 : f32
    %134 = vector.broadcast %cst_79 : f32 to vector<16x1xf32>
    %135 = arith.divf %133, %134 : vector<16x1xf32>
    %136 = vector.broadcast %135 : vector<16x1xf32> to vector<16x32xf32>
    %137 = arith.subf %131, %136 : vector<16x32xf32>
    %138 = arith.mulf %137, %137 : vector<16x32xf32>
    %cst_80 = arith.constant dense<0.000000e+00> : vector<16xf32>
    %139 = vector.multi_reduction <add>, %138, %cst_80 [1] : vector<16x32xf32> to vector<16xf32>
    %140 = vector.shape_cast %139 : vector<16xf32> to vector<16x1xf32>
    %cst_81 = arith.constant 3.200000e+01 : f32
    %141 = vector.broadcast %cst_81 : f32 to vector<16x1xf32>
    %142 = arith.divf %140, %141 : vector<16x1xf32>
    %143 = vector.broadcast %135 : vector<16x1xf32> to vector<16x32xf32>
    %144 = arith.subf %131, %143 : vector<16x32xf32>
    %cst_82 = arith.constant 9.99999974E-6 : f32
    %145 = vector.broadcast %cst_82 : f32 to vector<16x1xf32>
    %146 = arith.addf %142, %145 : vector<16x1xf32>
    %147 = math.rsqrt %146 : vector<16x1xf32>
    %148 = vector.broadcast %147 : vector<16x1xf32> to vector<16x32xf32>
    %149 = arith.mulf %144, %148 : vector<16x32xf32>
    %150 = vector.broadcast %7 : vector<1x32xf32> to vector<16x32xf32>
    %151 = arith.mulf %149, %150 : vector<16x32xf32>
    %152 = vector.broadcast %8 : vector<1x32xf32> to vector<16x32xf32>
    %153 = arith.addf %151, %152 : vector<16x32xf32>
    %154 = vector.shape_cast %153 : vector<16x32xf32> to vector<2x8x32xf32>
    %155 = vector.shape_cast %154 : vector<2x8x32xf32> to vector<16x32xf32>
    %cst_83 = arith.constant dense<0.000000e+00> : vector<16x32xf32>
    %156 = tpu.matmul %155, %9, %cst_83 {dimension_numbers = #tpu.dot_dimension_numbers<[1], [0], [0], [1], [0, 0, 1, 1], [], []>} : vector<16x32xf32>, vector<32x32xf32>, vector<16x32xf32> -> vector<16x32xf32>
    %157 = vector.broadcast %10 : vector<1x32xf32> to vector<16x32xf32>
    %158 = arith.addf %156, %157 : vector<16x32xf32>
    %159 = vector.shape_cast %24 : vector<2x8x32xf32> to vector<16x32xf32>
    %cst_84 = arith.constant dense<0.000000e+00> : vector<16x64xf32>
    %160 = tpu.matmul %159, %11, %cst_84 {dimension_numbers = #tpu.dot_dimension_numbers<[1], [0], [0], [1], [0, 0, 1, 1], [], []>} : vector<16x32xf32>, vector<32x64xf32>, vector<16x64xf32> -> vector<16x64xf32>
    %161 = vector.broadcast %12 : vector<1x64xf32> to vector<16x64xf32>
    %162 = arith.addf %160, %161 : vector<16x64xf32>
    %163 = vector.shape_cast %158 : vector<16x32xf32> to vector<2x8x32xf32>
    %164 = vector.extract_strided_slice %162 {offsets = [0, 0], sizes = [16, 32], strides = [1, 1]} : vector<16x64xf32> to vector<16x32xf32>
    %165 = vector.shape_cast %164 : vector<16x32xf32> to vector<2x8x32xf32>
    %166 = vector.extract_strided_slice %162 {offsets = [0, 32], sizes = [16, 32], strides = [1, 1]} : vector<16x64xf32> to vector<16x32xf32>
    %167 = vector.shape_cast %166 : vector<16x32xf32> to vector<2x8x32xf32>
    %168 = vector.extract_strided_slice %163 {offsets = [0, 0, 0], sizes = [2, 8, 8], strides = [1, 1, 1]} : vector<2x8x32xf32> to vector<2x8x8xf32>
    %169 = vector.extract_strided_slice %165 {offsets = [0, 0, 0], sizes = [2, 8, 8], strides = [1, 1, 1]} : vector<2x8x32xf32> to vector<2x8x8xf32>
    %170 = vector.extract_strided_slice %167 {offsets = [0, 0, 0], sizes = [2, 8, 8], strides = [1, 1, 1]} : vector<2x8x32xf32> to vector<2x8x8xf32>
    "tpu.trace_start"() <{level = 10 : i32, message = "nqd,nkd->nqk"}> : () -> ()
    %cst_85 = arith.constant dense<0.000000e+00> : vector<2x8x8xf32>
    %171 = tpu.matmul %168, %169, %cst_85 {dimension_numbers = #tpu.dot_dimension_numbers<[2], [2], [1], [1], [0, 0, 0, 1, 1, 1], [0], [0]>} : vector<2x8x8xf32>, vector<2x8x8xf32>, vector<2x8x8xf32> -> vector<2x8x8xf32>
    "tpu.trace_stop"() : () -> ()
    %cst_86 = arith.constant 0.353553385 : f32
    %172 = vector.broadcast %cst_86 : f32 to vector<2x8x8xf32>
    %173 = arith.mulf %171, %172 : vector<2x8x8xf32>
    %cst_87 = arith.constant dense<0xFF800000> : vector<2x8xf32>
    %174 = vector.multi_reduction <maximumf>, %173, %cst_87 [2] : vector<2x8x8xf32> to vector<2x8xf32>
    %175 = vector.shape_cast %174 : vector<2x8xf32> to vector<2x8x1xf32>
    %176 = vector.broadcast %175 : vector<2x8x1xf32> to vector<2x8x8xf32>
    %177 = arith.subf %173, %176 : vector<2x8x8xf32>
    %178 = math.exp %177 : vector<2x8x8xf32>
    %cst_88 = arith.constant dense<0.000000e+00> : vector<2x8xf32>
    %179 = vector.multi_reduction <add>, %178, %cst_88 [2] : vector<2x8x8xf32> to vector<2x8xf32>
    %180 = vector.shape_cast %179 : vector<2x8xf32> to vector<2x8x1xf32>
    %181 = tpu.reciprocal %180 {approx = true} : vector<2x8x1xf32> -> vector<2x8x1xf32>
    %182 = vector.broadcast %181 : vector<2x8x1xf32> to vector<2x8x8xf32>
    %183 = arith.mulf %178, %182 : vector<2x8x8xf32>
    "tpu.trace_start"() <{level = 10 : i32, message = "nqk,nkd->nqd"}> : () -> ()
    %cst_89 = arith.constant dense<0.000000e+00> : vector<2x8x8xf32>
    %184 = tpu.matmul %183, %170, %cst_89 {dimension_numbers = #tpu.dot_dimension_numbers<[2], [1], [1], [2], [0, 0, 0, 1, 1, 2], [0], [0]>} : vector<2x8x8xf32>, vector<2x8x8xf32>, vector<2x8x8xf32> -> vector<2x8x8xf32>
    "tpu.trace_stop"() : () -> ()
    %185 = vector.extract_strided_slice %163 {offsets = [0, 0, 8], sizes = [2, 8, 8], strides = [1, 1, 1]} : vector<2x8x32xf32> to vector<2x8x8xf32>
    %186 = vector.extract_strided_slice %165 {offsets = [0, 0, 8], sizes = [2, 8, 8], strides = [1, 1, 1]} : vector<2x8x32xf32> to vector<2x8x8xf32>
    %187 = vector.extract_strided_slice %167 {offsets = [0, 0, 8], sizes = [2, 8, 8], strides = [1, 1, 1]} : vector<2x8x32xf32> to vector<2x8x8xf32>
    "tpu.trace_start"() <{level = 10 : i32, message = "nqd,nkd->nqk"}> : () -> ()
    %cst_90 = arith.constant dense<0.000000e+00> : vector<2x8x8xf32>
    %188 = tpu.matmul %185, %186, %cst_90 {dimension_numbers = #tpu.dot_dimension_numbers<[2], [2], [1], [1], [0, 0, 0, 1, 1, 1], [0], [0]>} : vector<2x8x8xf32>, vector<2x8x8xf32>, vector<2x8x8xf32> -> vector<2x8x8xf32>
    "tpu.trace_stop"() : () -> ()
    %cst_91 = arith.constant 0.353553385 : f32
    %189 = vector.broadcast %cst_91 : f32 to vector<2x8x8xf32>
    %190 = arith.mulf %188, %189 : vector<2x8x8xf32>
    %cst_92 = arith.constant dense<0xFF800000> : vector<2x8xf32>
    %191 = vector.multi_reduction <maximumf>, %190, %cst_92 [2] : vector<2x8x8xf32> to vector<2x8xf32>
    %192 = vector.shape_cast %191 : vector<2x8xf32> to vector<2x8x1xf32>
    %193 = vector.broadcast %192 : vector<2x8x1xf32> to vector<2x8x8xf32>
    %194 = arith.subf %190, %193 : vector<2x8x8xf32>
    %195 = math.exp %194 : vector<2x8x8xf32>
    %cst_93 = arith.constant dense<0.000000e+00> : vector<2x8xf32>
    %196 = vector.multi_reduction <add>, %195, %cst_93 [2] : vector<2x8x8xf32> to vector<2x8xf32>
    %197 = vector.shape_cast %196 : vector<2x8xf32> to vector<2x8x1xf32>
    %198 = tpu.reciprocal %197 {approx = true} : vector<2x8x1xf32> -> vector<2x8x1xf32>
    %199 = vector.broadcast %198 : vector<2x8x1xf32> to vector<2x8x8xf32>
    %200 = arith.mulf %195, %199 : vector<2x8x8xf32>
    "tpu.trace_start"() <{level = 10 : i32, message = "nqk,nkd->nqd"}> : () -> ()
    %cst_94 = arith.constant dense<0.000000e+00> : vector<2x8x8xf32>
    %201 = tpu.matmul %200, %187, %cst_94 {dimension_numbers = #tpu.dot_dimension_numbers<[2], [1], [1], [2], [0, 0, 0, 1, 1, 2], [0], [0]>} : vector<2x8x8xf32>, vector<2x8x8xf32>, vector<2x8x8xf32> -> vector<2x8x8xf32>
    "tpu.trace_stop"() : () -> ()
    %202 = vector.extract_strided_slice %163 {offsets = [0, 0, 16], sizes = [2, 8, 8], strides = [1, 1, 1]} : vector<2x8x32xf32> to vector<2x8x8xf32>
    %203 = vector.extract_strided_slice %165 {offsets = [0, 0, 16], sizes = [2, 8, 8], strides = [1, 1, 1]} : vector<2x8x32xf32> to vector<2x8x8xf32>
    %204 = vector.extract_strided_slice %167 {offsets = [0, 0, 16], sizes = [2, 8, 8], strides = [1, 1, 1]} : vector<2x8x32xf32> to vector<2x8x8xf32>
    "tpu.trace_start"() <{level = 10 : i32, message = "nqd,nkd->nqk"}> : () -> ()
    %cst_95 = arith.constant dense<0.000000e+00> : vector<2x8x8xf32>
    %205 = tpu.matmul %202, %203, %cst_95 {dimension_numbers = #tpu.dot_dimension_numbers<[2], [2], [1], [1], [0, 0, 0, 1, 1, 1], [0], [0]>} : vector<2x8x8xf32>, vector<2x8x8xf32>, vector<2x8x8xf32> -> vector<2x8x8xf32>
    "tpu.trace_stop"() : () -> ()
    %cst_96 = arith.constant 0.353553385 : f32
    %206 = vector.broadcast %cst_96 : f32 to vector<2x8x8xf32>
    %207 = arith.mulf %205, %206 : vector<2x8x8xf32>
    %cst_97 = arith.constant dense<0xFF800000> : vector<2x8xf32>
    %208 = vector.multi_reduction <maximumf>, %207, %cst_97 [2] : vector<2x8x8xf32> to vector<2x8xf32>
    %209 = vector.shape_cast %208 : vector<2x8xf32> to vector<2x8x1xf32>
    %210 = vector.broadcast %209 : vector<2x8x1xf32> to vector<2x8x8xf32>
    %211 = arith.subf %207, %210 : vector<2x8x8xf32>
    %212 = math.exp %211 : vector<2x8x8xf32>
    %cst_98 = arith.constant dense<0.000000e+00> : vector<2x8xf32>
    %213 = vector.multi_reduction <add>, %212, %cst_98 [2] : vector<2x8x8xf32> to vector<2x8xf32>
    %214 = vector.shape_cast %213 : vector<2x8xf32> to vector<2x8x1xf32>
    %215 = tpu.reciprocal %214 {approx = true} : vector<2x8x1xf32> -> vector<2x8x1xf32>
    %216 = vector.broadcast %215 : vector<2x8x1xf32> to vector<2x8x8xf32>
    %217 = arith.mulf %212, %216 : vector<2x8x8xf32>
    "tpu.trace_start"() <{level = 10 : i32, message = "nqk,nkd->nqd"}> : () -> ()
    %cst_99 = arith.constant dense<0.000000e+00> : vector<2x8x8xf32>
    %218 = tpu.matmul %217, %204, %cst_99 {dimension_numbers = #tpu.dot_dimension_numbers<[2], [1], [1], [2], [0, 0, 0, 1, 1, 2], [0], [0]>} : vector<2x8x8xf32>, vector<2x8x8xf32>, vector<2x8x8xf32> -> vector<2x8x8xf32>
    "tpu.trace_stop"() : () -> ()
    %219 = vector.extract_strided_slice %163 {offsets = [0, 0, 24], sizes = [2, 8, 8], strides = [1, 1, 1]} : vector<2x8x32xf32> to vector<2x8x8xf32>
    %220 = vector.extract_strided_slice %165 {offsets = [0, 0, 24], sizes = [2, 8, 8], strides = [1, 1, 1]} : vector<2x8x32xf32> to vector<2x8x8xf32>
    %221 = vector.extract_strided_slice %167 {offsets = [0, 0, 24], sizes = [2, 8, 8], strides = [1, 1, 1]} : vector<2x8x32xf32> to vector<2x8x8xf32>
    "tpu.trace_start"() <{level = 10 : i32, message = "nqd,nkd->nqk"}> : () -> ()
    %cst_100 = arith.constant dense<0.000000e+00> : vector<2x8x8xf32>
    %222 = tpu.matmul %219, %220, %cst_100 {dimension_numbers = #tpu.dot_dimension_numbers<[2], [2], [1], [1], [0, 0, 0, 1, 1, 1], [0], [0]>} : vector<2x8x8xf32>, vector<2x8x8xf32>, vector<2x8x8xf32> -> vector<2x8x8xf32>
    "tpu.trace_stop"() : () -> ()
    %cst_101 = arith.constant 0.353553385 : f32
    %223 = vector.broadcast %cst_101 : f32 to vector<2x8x8xf32>
    %224 = arith.mulf %222, %223 : vector<2x8x8xf32>
    %cst_102 = arith.constant dense<0xFF800000> : vector<2x8xf32>
    %225 = vector.multi_reduction <maximumf>, %224, %cst_102 [2] : vector<2x8x8xf32> to vector<2x8xf32>
    %226 = vector.shape_cast %225 : vector<2x8xf32> to vector<2x8x1xf32>
    %227 = vector.broadcast %226 : vector<2x8x1xf32> to vector<2x8x8xf32>
    %228 = arith.subf %224, %227 : vector<2x8x8xf32>
    %229 = math.exp %228 : vector<2x8x8xf32>
    %cst_103 = arith.constant dense<0.000000e+00> : vector<2x8xf32>
    %230 = vector.multi_reduction <add>, %229, %cst_103 [2] : vector<2x8x8xf32> to vector<2x8xf32>
    %231 = vector.shape_cast %230 : vector<2x8xf32> to vector<2x8x1xf32>
    %232 = tpu.reciprocal %231 {approx = true} : vector<2x8x1xf32> -> vector<2x8x1xf32>
    %233 = vector.broadcast %232 : vector<2x8x1xf32> to vector<2x8x8xf32>
    %234 = arith.mulf %229, %233 : vector<2x8x8xf32>
    "tpu.trace_start"() <{level = 10 : i32, message = "nqk,nkd->nqd"}> : () -> ()
    %cst_104 = arith.constant dense<0.000000e+00> : vector<2x8x8xf32>
    %235 = tpu.matmul %234, %221, %cst_104 {dimension_numbers = #tpu.dot_dimension_numbers<[2], [1], [1], [2], [0, 0, 0, 1, 1, 2], [0], [0]>} : vector<2x8x8xf32>, vector<2x8x8xf32>, vector<2x8x8xf32> -> vector<2x8x8xf32>
    "tpu.trace_stop"() : () -> ()
    %236 = tpu.concatenate %184, %201, %218, %235 in 2 : vector<2x8x8xf32>, vector<2x8x8xf32>, vector<2x8x8xf32>, vector<2x8x8xf32> -> vector<2x8x32xf32>
    %237 = vector.shape_cast %236 : vector<2x8x32xf32> to vector<16x32xf32>
    %cst_105 = arith.constant dense<0.000000e+00> : vector<16x32xf32>
    %238 = tpu.matmul %237, %13, %cst_105 {dimension_numbers = #tpu.dot_dimension_numbers<[1], [0], [0], [1], [0, 0, 1, 1], [], []>} : vector<16x32xf32>, vector<32x32xf32>, vector<16x32xf32> -> vector<16x32xf32>
    %239 = vector.broadcast %14 : vector<1x32xf32> to vector<16x32xf32>
    %240 = arith.addf %238, %239 : vector<16x32xf32>
    %241 = arith.addf %240, %153 : vector<16x32xf32>
    %cst_106 = arith.constant dense<0.000000e+00> : vector<16xf32>
    %242 = vector.multi_reduction <add>, %241, %cst_106 [1] : vector<16x32xf32> to vector<16xf32>
    %243 = vector.shape_cast %242 : vector<16xf32> to vector<16x1xf32>
    %cst_107 = arith.constant 3.200000e+01 : f32
    %244 = vector.broadcast %cst_107 : f32 to vector<16x1xf32>
    %245 = arith.divf %243, %244 : vector<16x1xf32>
    %246 = vector.broadcast %245 : vector<16x1xf32> to vector<16x32xf32>
    %247 = arith.subf %241, %246 : vector<16x32xf32>
    %248 = arith.mulf %247, %247 : vector<16x32xf32>
    %cst_108 = arith.constant dense<0.000000e+00> : vector<16xf32>
    %249 = vector.multi_reduction <add>, %248, %cst_108 [1] : vector<16x32xf32> to vector<16xf32>
    %250 = vector.shape_cast %249 : vector<16xf32> to vector<16x1xf32>
    %cst_109 = arith.constant 3.200000e+01 : f32
    %251 = vector.broadcast %cst_109 : f32 to vector<16x1xf32>
    %252 = arith.divf %250, %251 : vector<16x1xf32>
    %253 = vector.broadcast %245 : vector<16x1xf32> to vector<16x32xf32>
    %254 = arith.subf %241, %253 : vector<16x32xf32>
    %cst_110 = arith.constant 9.99999974E-6 : f32
    %255 = vector.broadcast %cst_110 : f32 to vector<16x1xf32>
    %256 = arith.addf %252, %255 : vector<16x1xf32>
    %257 = math.rsqrt %256 : vector<16x1xf32>
    %258 = vector.broadcast %257 : vector<16x1xf32> to vector<16x32xf32>
    %259 = arith.mulf %254, %258 : vector<16x32xf32>
    %260 = vector.broadcast %15 : vector<1x32xf32> to vector<16x32xf32>
    %261 = arith.mulf %259, %260 : vector<16x32xf32>
    %262 = vector.broadcast %16 : vector<1x32xf32> to vector<16x32xf32>
    %263 = arith.addf %261, %262 : vector<16x32xf32>
    %cst_111 = arith.constant dense<0.000000e+00> : vector<16x64xf32>
    %264 = tpu.matmul %263, %17, %cst_111 {dimension_numbers = #tpu.dot_dimension_numbers<[1], [0], [0], [1], [0, 0, 1, 1], [], []>} : vector<16x32xf32>, vector<32x64xf32>, vector<16x64xf32> -> vector<16x64xf32>
    %265 = vector.broadcast %18 : vector<1x64xf32> to vector<16x64xf32>
    %266 = arith.addf %264, %265 : vector<16x64xf32>
    %cst_112 = arith.constant 0.000000e+00 : f32
    %267 = vector.broadcast %cst_112 : f32 to vector<16x64xf32>
    %268 = arith.maximumf %266, %267 : vector<16x64xf32>
    %cst_113 = arith.constant dense<0.000000e+00> : vector<16x32xf32>
    %269 = tpu.matmul %268, %19, %cst_113 {dimension_numbers = #tpu.dot_dimension_numbers<[1], [0], [0], [1], [0, 0, 1, 1], [], []>} : vector<16x64xf32>, vector<64x32xf32>, vector<16x32xf32> -> vector<16x32xf32>
    %270 = vector.broadcast %20 : vector<1x32xf32> to vector<16x32xf32>
    %271 = arith.addf %269, %270 : vector<16x32xf32>
    %272 = arith.addf %271, %263 : vector<16x32xf32>
    %cst_114 = arith.constant dense<0.000000e+00> : vector<16xf32>
    %273 = vector.multi_reduction <add>, %272, %cst_114 [1] : vector<16x32xf32> to vector<16xf32>
    %274 = vector.shape_cast %273 : vector<16xf32> to vector<16x1xf32>
    %cst_115 = arith.constant 3.200000e+01 : f32
    %275 = vector.broadcast %cst_115 : f32 to vector<16x1xf32>
    %276 = arith.divf %274, %275 : vector<16x1xf32>
    %277 = vector.broadcast %276 : vector<16x1xf32> to vector<16x32xf32>
    %278 = arith.subf %272, %277 : vector<16x32xf32>
    %279 = arith.mulf %278, %278 : vector<16x32xf32>
    %cst_116 = arith.constant dense<0.000000e+00> : vector<16xf32>
    %280 = vector.multi_reduction <add>, %279, %cst_116 [1] : vector<16x32xf32> to vector<16xf32>
    %281 = vector.shape_cast %280 : vector<16xf32> to vector<16x1xf32>
    %cst_117 = arith.constant 3.200000e+01 : f32
    %282 = vector.broadcast %cst_117 : f32 to vector<16x1xf32>
    %283 = arith.divf %281, %282 : vector<16x1xf32>
    %284 = vector.broadcast %276 : vector<16x1xf32> to vector<16x32xf32>
    %285 = arith.subf %272, %284 : vector<16x32xf32>
    %cst_118 = arith.constant 9.99999974E-6 : f32
    %286 = vector.broadcast %cst_118 : f32 to vector<16x1xf32>
    %287 = arith.addf %283, %286 : vector<16x1xf32>
    %288 = math.rsqrt %287 : vector<16x1xf32>
    %289 = vector.broadcast %288 : vector<16x1xf32> to vector<16x32xf32>
    %290 = arith.mulf %285, %289 : vector<16x32xf32>
    %291 = vector.broadcast %21 : vector<1x32xf32> to vector<16x32xf32>
    %292 = arith.mulf %290, %291 : vector<16x32xf32>
    %293 = vector.broadcast %22 : vector<1x32xf32> to vector<16x32xf32>
    %294 = arith.addf %292, %293 : vector<16x32xf32>
    %295 = vector.shape_cast %294 : vector<16x32xf32> to vector<2x8x32xf32>
    %c0_119 = arith.constant 0 : index
    %c0_120 = arith.constant 0 : index
    %c0_121 = arith.constant 0 : index
    %296 = vector.load %arg25[%c0_119, %c0_120, %c0_121] : memref<2x8x32xf32, #tpu.memory_space<vmem>>, vector<2x8x32xf32>
    tpu.vector_store %arg25[%c0_119, %c0_120, %c0_121], %295 {strides = array<i32>} : memref<2x8x32xf32, #tpu.memory_space<vmem>>, vector<2x8x32xf32>,
    return
  }
}

module attributes {stable_mosaic.version = 11 : i64} {
  func.func @_decoder_layer_kernel(%arg0: memref<2x8x32xf32, #tpu.memory_space<vmem>>, %arg1: memref<2x8x32xf32, #tpu.memory_space<vmem>>, %arg2: memref<8x8xf32, #tpu.memory_space<vmem>>, %arg3: memref<32x32xf32, #tpu.memory_space<vmem>>, %arg4: memref<1x32xf32, #tpu.memory_space<vmem>>, %arg5: memref<32x64xf32, #tpu.memory_space<vmem>>, %arg6: memref<1x64xf32, #tpu.memory_space<vmem>>, %arg7: memref<32x32xf32, #tpu.memory_space<vmem>>, %arg8: memref<1x32xf32, #tpu.memory_space<vmem>>, %arg9: memref<1x32xf32, #tpu.memory_space<vmem>>, %arg10: memref<1x32xf32, #tpu.memory_space<vmem>>, %arg11: memref<32x32xf32, #tpu.memory_space<vmem>>, %arg12: memref<1x32xf32, #tpu.memory_space<vmem>>, %arg13: memref<32x64xf32, #tpu.memory_space<vmem>>, %arg14: memref<1x64xf32, #tpu.memory_space<vmem>>, %arg15: memref<32x32xf32, #tpu.memory_space<vmem>>, %arg16: memref<1x32xf32, #tpu.memory_space<vmem>>, %arg17: memref<1x32xf32, #tpu.memory_space<vmem>>, %arg18: memref<1x32xf32, #tpu.memory_space<vmem>>, %arg19: memref<32x64xf32, #tpu.memory_space<vmem>>, %arg20: memref<1x64xf32, #tpu.memory_space<vmem>>, %arg21: memref<64x32xf32, #tpu.memory_space<vmem>>, %arg22: memref<1x32xf32, #tpu.memory_space<vmem>>, %arg23: memref<1x32xf32, #tpu.memory_space<vmem>>, %arg24: memref<1x32xf32, #tpu.memory_space<vmem>>, %arg25: memref<2x8x32xf32, #tpu.memory_space<vmem>>) attributes {dimension_semantics = [], scalar_prefetch = 0 : i64, scratch_operands = 0 : i64, tpu.core_type = #tpu.core_type<tc>} {
    %c0 = arith.constant 0 : index
    %c0_0 = arith.constant 0 : index
    %0 = vector.load %arg2[%c0, %c0_0] : memref<8x8xf32, #tpu.memory_space<vmem>>, vector<8x8xf32>
    %c0_1 = arith.constant 0 : index
    %c0_2 = arith.constant 0 : index
    %1 = vector.load %arg3[%c0_1, %c0_2] : memref<32x32xf32, #tpu.memory_space<vmem>>, vector<32x32xf32>
    %c0_3 = arith.constant 0 : index
    %c0_4 = arith.constant 0 : index
    %2 = vector.load %arg4[%c0_3, %c0_4] : memref<1x32xf32, #tpu.memory_space<vmem>>, vector<1x32xf32>
    %c0_5 = arith.constant 0 : index
    %c0_6 = arith.constant 0 : index
    %3 = vector.load %arg5[%c0_5, %c0_6] : memref<32x64xf32, #tpu.memory_space<vmem>>, vector<32x64xf32>
    %c0_7 = arith.constant 0 : index
    %c0_8 = arith.constant 0 : index
    %4 = vector.load %arg6[%c0_7, %c0_8] : memref<1x64xf32, #tpu.memory_space<vmem>>, vector<1x64xf32>
    %c0_9 = arith.constant 0 : index
    %c0_10 = arith.constant 0 : index
    %5 = vector.load %arg7[%c0_9, %c0_10] : memref<32x32xf32, #tpu.memory_space<vmem>>, vector<32x32xf32>
    %c0_11 = arith.constant 0 : index
    %c0_12 = arith.constant 0 : index
    %6 = vector.load %arg8[%c0_11, %c0_12] : memref<1x32xf32, #tpu.memory_space<vmem>>, vector<1x32xf32>
    %c0_13 = arith.constant 0 : index
    %c0_14 = arith.constant 0 : index
    %7 = vector.load %arg9[%c0_13, %c0_14] : memref<1x32xf32, #tpu.memory_space<vmem>>, vector<1x32xf32>
    %c0_15 = arith.constant 0 : index
    %c0_16 = arith.constant 0 : index
    %8 = vector.load %arg10[%c0_15, %c0_16] : memref<1x32xf32, #tpu.memory_space<vmem>>, vector<1x32xf32>
    %c0_17 = arith.constant 0 : index
    %c0_18 = arith.constant 0 : index
    %9 = vector.load %arg11[%c0_17, %c0_18] : memref<32x32xf32, #tpu.memory_space<vmem>>, vector<32x32xf32>
    %c0_19 = arith.constant 0 : index
    %c0_20 = arith.constant 0 : index
    %10 = vector.load %arg12[%c0_19, %c0_20] : memref<1x32xf32, #tpu.memory_space<vmem>>, vector<1x32xf32>
    %c0_21 = arith.constant 0 : index
    %c0_22 = arith.constant 0 : index
    %11 = vector.load %arg13[%c0_21, %c0_22] : memref<32x64xf32, #tpu.memory_space<vmem>>, vector<32x64xf32>
    %c0_23 = arith.constant 0 : index
    %c0_24 = arith.constant 0 : index
    %12 = vector.load %arg14[%c0_23, %c0_24] : memref<1x64xf32, #tpu.memory_space<vmem>>, vector<1x64xf32>
    %c0_25 = arith.constant 0 : index
    %c0_26 = arith.constant 0 : index
    %13 = vector.load %arg15[%c0_25, %c0_26] : memref<32x32xf32, #tpu.memory_space<vmem>>, vector<32x32xf32>
    %c0_27 = arith.constant 0 : index
    %c0_28 = arith.constant 0 : index
    %14 = vector.load %arg16[%c0_27, %c0_28] : memref<1x32xf32, #tpu.memory_space<vmem>>, vector<1x32xf32>
    %c0_29 = arith.constant 0 : index
    %c0_30 = arith.constant 0 : index
    %15 = vector.load %arg17[%c0_29, %c0_30] : memref<1x32xf32, #tpu.memory_space<vmem>>, vector<1x32xf32>
    %c0_31 = arith.constant 0 : index
    %c0_32 = arith.constant 0 : index
    %16 = vector.load %arg18[%c0_31, %c0_32] : memref<1x32xf32, #tpu.memory_space<vmem>>, vector<1x32xf32>
    %c0_33 = arith.constant 0 : index
    %c0_34 = arith.constant 0 : index
    %17 = vector.load %arg19[%c0_33, %c0_34] : memref<32x64xf32, #tpu.memory_space<vmem>>, vector<32x64xf32>
    %c0_35 = arith.constant 0 : index
    %c0_36 = arith.constant 0 : index
    %18 = vector.load %arg20[%c0_35, %c0_36] : memref<1x64xf32, #tpu.memory_space<vmem>>, vector<1x64xf32>
    %c0_37 = arith.constant 0 : index
    %c0_38 = arith.constant 0 : index
    %19 = vector.load %arg21[%c0_37, %c0_38] : memref<64x32xf32, #tpu.memory_space<vmem>>, vector<64x32xf32>
    %c0_39 = arith.constant 0 : index
    %c0_40 = arith.constant 0 : index
    %20 = vector.load %arg22[%c0_39, %c0_40] : memref<1x32xf32, #tpu.memory_space<vmem>>, vector<1x32xf32>
    %c0_41 = arith.constant 0 : index
    %c0_42 = arith.constant 0 : index
    %21 = vector.load %arg23[%c0_41, %c0_42] : memref<1x32xf32, #tpu.memory_space<vmem>>, vector<1x32xf32>
    %c0_43 = arith.constant 0 : index
    %c0_44 = arith.constant 0 : index
    %22 = vector.load %arg24[%c0_43, %c0_44] : memref<1x32xf32, #tpu.memory_space<vmem>>, vector<1x32xf32>
    %c0_45 = arith.constant 0 : index
    %c0_46 = arith.constant 0 : index
    %c0_47 = arith.constant 0 : index
    %23 = vector.load %arg0[%c0_45, %c0_46, %c0_47] : memref<2x8x32xf32, #tpu.memory_space<vmem>>, vector<2x8x32xf32>
    %c0_48 = arith.constant 0 : index
    %c0_49 = arith.constant 0 : index
    %c0_50 = arith.constant 0 : index
    %24 = vector.load %arg1[%c0_48, %c0_49, %c0_50] : memref<2x8x32xf32, #tpu.memory_space<vmem>>, vector<2x8x32xf32>
    %25 = vector.shape_cast %23 : vector<2x8x32xf32> to vector<16x32xf32>
    %26 = vector.shape_cast %23 : vector<2x8x32xf32> to vector<16x32xf32>
    %cst = arith.constant dense<0.000000e+00> : vector<16x32xf32>
    %27 = tpu.matmul %26, %1, %cst {dimension_numbers = #tpu.dot_dimension_numbers<[1], [0], [0], [1], [0, 0, 1, 1], [], []>} : vector<16x32xf32>, vector<32x32xf32>, vector<16x32xf32> -> vector<16x32xf32>
    %28 = vector.broadcast %2 : vector<1x32xf32> to vector<16x32xf32>
    %29 = arith.addf %27, %28 : vector<16x32xf32>
    %30 = vector.shape_cast %23 : vector<2x8x32xf32> to vector<16x32xf32>
    %cst_51 = arith.constant dense<0.000000e+00> : vector<16x64xf32>
    %31 = tpu.matmul %30, %3, %cst_51 {dimension_numbers = #tpu.dot_dimension_numbers<[1], [0], [0], [1], [0, 0, 1, 1], [], []>} : vector<16x32xf32>, vector<32x64xf32>, vector<16x64xf32> -> vector<16x64xf32>
    %32 = vector.broadcast %4 : vector<1x64xf32> to vector<16x64xf32>
    %33 = arith.addf %31, %32 : vector<16x64xf32>
    %34 = vector.shape_cast %29 : vector<16x32xf32> to vector<2x8x32xf32>
    %35 = vector.extract_strided_slice %33 {offsets = [0, 0], sizes = [16, 32], strides = [1, 1]} : vector<16x64xf32> to vector<16x32xf32>
    %36 = vector.shape_cast %35 : vector<16x32xf32> to vector<2x8x32xf32>
    %37 = vector.extract_strided_slice %33 {offsets = [0, 32], sizes = [16, 32], strides = [1, 1]} : vector<16x64xf32> to vector<16x32xf32>
    %38 = vector.shape_cast %37 : vector<16x32xf32> to vector<2x8x32xf32>
    %39 = vector.shape_cast %0 : vector<8x8xf32> to vector<1x8x8xf32>
    %cst_52 = arith.constant 0.000000e+00 : f32
    %40 = vector.broadcast %cst_52 : f32 to vector<1x8x8xf32>
    %41 = arith.cmpf ogt, %39, %40 : vector<1x8x8xf32>
    %42 = vector.extract_strided_slice %34 {offsets = [0, 0, 0], sizes = [2, 8, 8], strides = [1, 1, 1]} : vector<2x8x32xf32> to vector<2x8x8xf32>
    %43 = vector.extract_strided_slice %36 {offsets = [0, 0, 0], sizes = [2, 8, 8], strides = [1, 1, 1]} : vector<2x8x32xf32> to vector<2x8x8xf32>
    %44 = vector.extract_strided_slice %38 {offsets = [0, 0, 0], sizes = [2, 8, 8], strides = [1, 1, 1]} : vector<2x8x32xf32> to vector<2x8x8xf32>
    "tpu.trace_start"() <{level = 10 : i32, message = "nqd,nkd->nqk"}> : () -> ()
    %cst_53 = arith.constant dense<0.000000e+00> : vector<2x8x8xf32>
    %45 = tpu.matmul %42, %43, %cst_53 {dimension_numbers = #tpu.dot_dimension_numbers<[2], [2], [1], [1], [0, 0, 0, 1, 1, 1], [0], [0]>} : vector<2x8x8xf32>, vector<2x8x8xf32>, vector<2x8x8xf32> -> vector<2x8x8xf32>
    "tpu.trace_stop"() : () -> ()
    %cst_54 = arith.constant 0.353553385 : f32
    %46 = vector.broadcast %cst_54 : f32 to vector<2x8x8xf32>
    %47 = arith.mulf %45, %46 : vector<2x8x8xf32>
    %cst_55 = arith.constant -1.000000e+04 : f32
    %48 = vector.shape_cast %41 : vector<1x8x8xi1> to vector<1x8x8xi1>
    %49 = vector.broadcast %48 : vector<1x8x8xi1> to vector<2x8x8xi1>
    %50 = vector.broadcast %cst_55 : f32 to vector<2x8x8xf32>
    %51 = arith.select %49, %50, %47 : vector<2x8x8xi1>, vector<2x8x8xf32>
    %cst_56 = arith.constant dense<0xFF800000> : vector<2x8xf32>
    %52 = vector.multi_reduction <maximumf>, %51, %cst_56 [2] : vector<2x8x8xf32> to vector<2x8xf32>
    %53 = vector.shape_cast %52 : vector<2x8xf32> to vector<2x8x1xf32>
    %54 = vector.broadcast %53 : vector<2x8x1xf32> to vector<2x8x8xf32>
    %55 = arith.subf %51, %54 : vector<2x8x8xf32>
    %56 = math.exp %55 : vector<2x8x8xf32>
    %cst_57 = arith.constant dense<0.000000e+00> : vector<2x8xf32>
    %57 = vector.multi_reduction <add>, %56, %cst_57 [2] : vector<2x8x8xf32> to vector<2x8xf32>
    %58 = vector.shape_cast %57 : vector<2x8xf32> to vector<2x8x1xf32>
    %59 = tpu.reciprocal %58 {approx = true} : vector<2x8x1xf32> -> vector<2x8x1xf32>
    %60 = vector.broadcast %59 : vector<2x8x1xf32> to vector<2x8x8xf32>
    %61 = arith.mulf %56, %60 : vector<2x8x8xf32>
    "tpu.trace_start"() <{level = 10 : i32, message = "nqk,nkd->nqd"}> : () -> ()
    %cst_58 = arith.constant dense<0.000000e+00> : vector<2x8x8xf32>
    %62 = tpu.matmul %61, %44, %cst_58 {dimension_numbers = #tpu.dot_dimension_numbers<[2], [1], [1], [2], [0, 0, 0, 1, 1, 2], [0], [0]>} : vector<2x8x8xf32>, vector<2x8x8xf32>, vector<2x8x8xf32> -> vector<2x8x8xf32>
    "tpu.trace_stop"() : () -> ()
    %63 = vector.extract_strided_slice %34 {offsets = [0, 0, 8], sizes = [2, 8, 8], strides = [1, 1, 1]} : vector<2x8x32xf32> to vector<2x8x8xf32>
    %64 = vector.extract_strided_slice %36 {offsets = [0, 0, 8], sizes = [2, 8, 8], strides = [1, 1, 1]} : vector<2x8x32xf32> to vector<2x8x8xf32>
    %65 = vector.extract_strided_slice %38 {offsets = [0, 0, 8], sizes = [2, 8, 8], strides = [1, 1, 1]} : vector<2x8x32xf32> to vector<2x8x8xf32>
    "tpu.trace_start"() <{level = 10 : i32, message = "nqd,nkd->nqk"}> : () -> ()
    %cst_59 = arith.constant dense<0.000000e+00> : vector<2x8x8xf32>
    %66 = tpu.matmul %63, %64, %cst_59 {dimension_numbers = #tpu.dot_dimension_numbers<[2], [2], [1], [1], [0, 0, 0, 1, 1, 1], [0], [0]>} : vector<2x8x8xf32>, vector<2x8x8xf32>, vector<2x8x8xf32> -> vector<2x8x8xf32>
    "tpu.trace_stop"() : () -> ()
    %cst_60 = arith.constant 0.353553385 : f32
    %67 = vector.broadcast %cst_60 : f32 to vector<2x8x8xf32>
    %68 = arith.mulf %66, %67 : vector<2x8x8xf32>
    %cst_61 = arith.constant -1.000000e+04 : f32
    %69 = vector.shape_cast %41 : vector<1x8x8xi1> to vector<1x8x8xi1>
    %70 = vector.broadcast %69 : vector<1x8x8xi1> to vector<2x8x8xi1>
    %71 = vector.broadcast %cst_61 : f32 to vector<2x8x8xf32>
    %72 = arith.select %70, %71, %68 : vector<2x8x8xi1>, vector<2x8x8xf32>
    %cst_62 = arith.constant dense<0xFF800000> : vector<2x8xf32>
    %73 = vector.multi_reduction <maximumf>, %72, %cst_62 [2] : vector<2x8x8xf32> to vector<2x8xf32>
    %74 = vector.shape_cast %73 : vector<2x8xf32> to vector<2x8x1xf32>
    %75 = vector.broadcast %74 : vector<2x8x1xf32> to vector<2x8x8xf32>
    %76 = arith.subf %72, %75 : vector<2x8x8xf32>
    %77 = math.exp %76 : vector<2x8x8xf32>
    %cst_63 = arith.constant dense<0.000000e+00> : vector<2x8xf32>
    %78 = vector.multi_reduction <add>, %77, %cst_63 [2] : vector<2x8x8xf32> to vector<2x8xf32>
    %79 = vector.shape_cast %78 : vector<2x8xf32> to vector<2x8x1xf32>
    %80 = tpu.reciprocal %79 {approx = true} : vector<2x8x1xf32> -> vector<2x8x1xf32>
    %81 = vector.broadcast %80 : vector<2x8x1xf32> to vector<2x8x8xf32>
    %82 = arith.mulf %77, %81 : vector<2x8x8xf32>
    "tpu.trace_start"() <{level = 10 : i32, message = "nqk,nkd->nqd"}> : () -> ()
    %cst_64 = arith.constant dense<0.000000e+00> : vector<2x8x8xf32>
    %83 = tpu.matmul %82, %65, %cst_64 {dimension_numbers = #tpu.dot_dimension_numbers<[2], [1], [1], [2], [0, 0, 0, 1, 1, 2], [0], [0]>} : vector<2x8x8xf32>, vector<2x8x8xf32>, vector<2x8x8xf32> -> vector<2x8x8xf32>
    "tpu.trace_stop"() : () -> ()
    %84 = vector.extract_strided_slice %34 {offsets = [0, 0, 16], sizes = [2, 8, 8], strides = [1, 1, 1]} : vector<2x8x32xf32> to vector<2x8x8xf32>
    %85 = vector.extract_strided_slice %36 {offsets = [0, 0, 16], sizes = [2, 8, 8], strides = [1, 1, 1]} : vector<2x8x32xf32> to vector<2x8x8xf32>
    %86 = vector.extract_strided_slice %38 {offsets = [0, 0, 16], sizes = [2, 8, 8], strides = [1, 1, 1]} : vector<2x8x32xf32> to vector<2x8x8xf32>
    "tpu.trace_start"() <{level = 10 : i32, message = "nqd,nkd->nqk"}> : () -> ()
    %cst_65 = arith.constant dense<0.000000e+00> : vector<2x8x8xf32>
    %87 = tpu.matmul %84, %85, %cst_65 {dimension_numbers = #tpu.dot_dimension_numbers<[2], [2], [1], [1], [0, 0, 0, 1, 1, 1], [0], [0]>} : vector<2x8x8xf32>, vector<2x8x8xf32>, vector<2x8x8xf32> -> vector<2x8x8xf32>
    "tpu.trace_stop"() : () -> ()
    %cst_66 = arith.constant 0.353553385 : f32
    %88 = vector.broadcast %cst_66 : f32 to vector<2x8x8xf32>
    %89 = arith.mulf %87, %88 : vector<2x8x8xf32>
    %cst_67 = arith.constant -1.000000e+04 : f32
    %90 = vector.shape_cast %41 : vector<1x8x8xi1> to vector<1x8x8xi1>
    %91 = vector.broadcast %90 : vector<1x8x8xi1> to vector<2x8x8xi1>
    %92 = vector.broadcast %cst_67 : f32 to vector<2x8x8xf32>
    %93 = arith.select %91, %92, %89 : vector<2x8x8xi1>, vector<2x8x8xf32>
    %cst_68 = arith.constant dense<0xFF800000> : vector<2x8xf32>
    %94 = vector.multi_reduction <maximumf>, %93, %cst_68 [2] : vector<2x8x8xf32> to vector<2x8xf32>
    %95 = vector.shape_cast %94 : vector<2x8xf32> to vector<2x8x1xf32>
    %96 = vector.broadcast %95 : vector<2x8x1xf32> to vector<2x8x8xf32>
    %97 = arith.subf %93, %96 : vector<2x8x8xf32>
    %98 = math.exp %97 : vector<2x8x8xf32>
    %cst_69 = arith.constant dense<0.000000e+00> : vector<2x8xf32>
    %99 = vector.multi_reduction <add>, %98, %cst_69 [2] : vector<2x8x8xf32> to vector<2x8xf32>
    %100 = vector.shape_cast %99 : vector<2x8xf32> to vector<2x8x1xf32>
    %101 = tpu.reciprocal %100 {approx = true} : vector<2x8x1xf32> -> vector<2x8x1xf32>
    %102 = vector.broadcast %101 : vector<2x8x1xf32> to vector<2x8x8xf32>
    %103 = arith.mulf %98, %102 : vector<2x8x8xf32>
    "tpu.trace_start"() <{level = 10 : i32, message = "nqk,nkd->nqd"}> : () -> ()
    %cst_70 = arith.constant dense<0.000000e+00> : vector<2x8x8xf32>
    %104 = tpu.matmul %103, %86, %cst_70 {dimension_numbers = #tpu.dot_dimension_numbers<[2], [1], [1], [2], [0, 0, 0, 1, 1, 2], [0], [0]>} : vector<2x8x8xf32>, vector<2x8x8xf32>, vector<2x8x8xf32> -> vector<2x8x8xf32>
    "tpu.trace_stop"() : () -> ()
    %105 = vector.extract_strided_slice %34 {offsets = [0, 0, 24], sizes = [2, 8, 8], strides = [1, 1, 1]} : vector<2x8x32xf32> to vector<2x8x8xf32>
    %106 = vector.extract_strided_slice %36 {offsets = [0, 0, 24], sizes = [2, 8, 8], strides = [1, 1, 1]} : vector<2x8x32xf32> to vector<2x8x8xf32>
    %107 = vector.extract_strided_slice %38 {offsets = [0, 0, 24], sizes = [2, 8, 8], strides = [1, 1, 1]} : vector<2x8x32xf32> to vector<2x8x8xf32>
    "tpu.trace_start"() <{level = 10 : i32, message = "nqd,nkd->nqk"}> : () -> ()
    %cst_71 = arith.constant dense<0.000000e+00> : vector<2x8x8xf32>
    %108 = tpu.matmul %105, %106, %cst_71 {dimension_numbers = #tpu.dot_dimension_numbers<[2], [2], [1], [1], [0, 0, 0, 1, 1, 1], [0], [0]>} : vector<2x8x8xf32>, vector<2x8x8xf32>, vector<2x8x8xf32> -> vector<2x8x8xf32>
    "tpu.trace_stop"() : () -> ()
    %cst_72 = arith.constant 0.353553385 : f32
    %109 = vector.broadcast %cst_72 : f32 to vector<2x8x8xf32>
    %110 = arith.mulf %108, %109 : vector<2x8x8xf32>
    %cst_73 = arith.constant -1.000000e+04 : f32
    %111 = vector.shape_cast %41 : vector<1x8x8xi1> to vector<1x8x8xi1>
    %112 = vector.broadcast %111 : vector<1x8x8xi1> to vector<2x8x8xi1>
    %113 = vector.broadcast %cst_73 : f32 to vector<2x8x8xf32>
    %114 = arith.select %112, %113, %110 : vector<2x8x8xi1>, vector<2x8x8xf32>
    %cst_74 = arith.constant dense<0xFF800000> : vector<2x8xf32>
    %115 = vector.multi_reduction <maximumf>, %114, %cst_74 [2] : vector<2x8x8xf32> to vector<2x8xf32>
    %116 = vector.shape_cast %115 : vector<2x8xf32> to vector<2x8x1xf32>
    %117 = vector.broadcast %116 : vector<2x8x1xf32> to vector<2x8x8xf32>
    %118 = arith.subf %114, %117 : vector<2x8x8xf32>
    %119 = math.exp %118 : vector<2x8x8xf32>
    %cst_75 = arith.constant dense<0.000000e+00> : vector<2x8xf32>
    %120 = vector.multi_reduction <add>, %119, %cst_75 [2] : vector<2x8x8xf32> to vector<2x8xf32>
    %121 = vector.shape_cast %120 : vector<2x8xf32> to vector<2x8x1xf32>
    %122 = tpu.reciprocal %121 {approx = true} : vector<2x8x1xf32> -> vector<2x8x1xf32>
    %123 = vector.broadcast %122 : vector<2x8x1xf32> to vector<2x8x8xf32>
    %124 = arith.mulf %119, %123 : vector<2x8x8xf32>
    "tpu.trace_start"() <{level = 10 : i32, message = "nqk,nkd->nqd"}> : () -> ()
    %cst_76 = arith.constant dense<0.000000e+00> : vector<2x8x8xf32>
    %125 = tpu.matmul %124, %107, %cst_76 {dimension_numbers = #tpu.dot_dimension_numbers<[2], [1], [1], [2], [0, 0, 0, 1, 1, 2], [0], [0]>} : vector<2x8x8xf32>, vector<2x8x8xf32>, vector<2x8x8xf32> -> vector<2x8x8xf32>
    "tpu.trace_stop"() : () -> ()
    %126 = tpu.concatenate %62, %83, %104, %125 in 2 : vector<2x8x8xf32>, vector<2x8x8xf32>, vector<2x8x8xf32>, vector<2x8x8xf32> -> vector<2x8x32xf32>
    %127 = vector.shape_cast %126 : vector<2x8x32xf32> to vector<16x32xf32>
    %cst_77 = arith.constant dense<0.000000e+00> : vector<16x32xf32>
    %128 = tpu.matmul %127, %5, %cst_77 {dimension_numbers = #tpu.dot_dimension_numbers<[1], [0], [0], [1], [0, 0, 1, 1], [], []>} : vector<16x32xf32>, vector<32x32xf32>, vector<16x32xf32> -> vector<16x32xf32>
    %129 = vector.broadcast %6 : vector<1x32xf32> to vector<16x32xf32>
    %130 = arith.addf %128, %129 : vector<16x32xf32>
    %131 = arith.addf %130, %25 : vector<16x32xf32>
    %cst_78 = arith.constant dense<0.000000e+00> : vector<16xf32>
    %132 = vector.multi_reduction <add>, %131, %cst_78 [1] : vector<16x32xf32> to vector<16xf32>
    %133 = vector.shape_cast %132 : vector<16xf32> to vector<16x1xf32>
    %cst_79 = arith.constant 3.200000e+01 : f32
    %134 = vector.broadcast %cst_79 : f32 to vector<16x1xf32>
    %135 = arith.divf %133, %134 : vector<16x1xf32>
    %136 = vector.broadcast %135 : vector<16x1xf32> to vector<16x32xf32>
    %137 = arith.subf %131, %136 : vector<16x32xf32>
    %138 = arith.mulf %137, %137 : vector<16x32xf32>
    %cst_80 = arith.constant dense<0.000000e+00> : vector<16xf32>
    %139 = vector.multi_reduction <add>, %138, %cst_80 [1] : vector<16x32xf32> to vector<16xf32>
    %140 = vector.shape_cast %139 : vector<16xf32> to vector<16x1xf32>
    %cst_81 = arith.constant 3.200000e+01 : f32
    %141 = vector.broadcast %cst_81 : f32 to vector<16x1xf32>
    %142 = arith.divf %140, %141 : vector<16x1xf32>
    %143 = vector.broadcast %135 : vector<16x1xf32> to vector<16x32xf32>
    %144 = arith.subf %131, %143 : vector<16x32xf32>
    %cst_82 = arith.constant 9.99999974E-6 : f32
    %145 = vector.broadcast %cst_82 : f32 to vector<16x1xf32>
    %146 = arith.addf %142, %145 : vector<16x1xf32>
    %147 = math.rsqrt %146 : vector<16x1xf32>
    %148 = vector.broadcast %147 : vector<16x1xf32> to vector<16x32xf32>
    %149 = arith.mulf %144, %148 : vector<16x32xf32>
    %150 = vector.broadcast %7 : vector<1x32xf32> to vector<16x32xf32>
    %151 = arith.mulf %149, %150 : vector<16x32xf32>
    %152 = vector.broadcast %8 : vector<1x32xf32> to vector<16x32xf32>
    %153 = arith.addf %151, %152 : vector<16x32xf32>
    %154 = vector.shape_cast %153 : vector<16x32xf32> to vector<2x8x32xf32>
    %155 = vector.shape_cast %154 : vector<2x8x32xf32> to vector<16x32xf32>
    %cst_83 = arith.constant dense<0.000000e+00> : vector<16x32xf32>
    %156 = tpu.matmul %155, %9, %cst_83 {dimension_numbers = #tpu.dot_dimension_numbers<[1], [0], [0], [1], [0, 0, 1, 1], [], []>} : vector<16x32xf32>, vector<32x32xf32>, vector<16x32xf32> -> vector<16x32xf32>
    %157 = vector.broadcast %10 : vector<1x32xf32> to vector<16x32xf32>
    %158 = arith.addf %156, %157 : vector<16x32xf32>
    %159 = vector.shape_cast %24 : vector<2x8x32xf32> to vector<16x32xf32>
    %cst_84 = arith.constant dense<0.000000e+00> : vector<16x64xf32>
    %160 = tpu.matmul %159, %11, %cst_84 {dimension_numbers = #tpu.dot_dimension_numbers<[1], [0], [0], [1], [0, 0, 1, 1], [], []>} : vector<16x32xf32>, vector<32x64xf32>, vector<16x64xf32> -> vector<16x64xf32>
    %161 = vector.broadcast %12 : vector<1x64xf32> to vector<16x64xf32>
    %162 = arith.addf %160, %161 : vector<16x64xf32>
    %163 = vector.shape_cast %158 : vector<16x32xf32> to vector<2x8x32xf32>
    %164 = vector.extract_strided_slice %162 {offsets = [0, 0], sizes = [16, 32], strides = [1, 1]} : vector<16x64xf32> to vector<16x32xf32>
    %165 = vector.shape_cast %164 : vector<16x32xf32> to vector<2x8x32xf32>
    %166 = vector.extract_strided_slice %162 {offsets = [0, 32], sizes = [16, 32], strides = [1, 1]} : vector<16x64xf32> to vector<16x32xf32>
    %167 = vector.shape_cast %166 : vector<16x32xf32> to vector<2x8x32xf32>
    %168 = vector.extract_strided_slice %163 {offsets = [0, 0, 0], sizes = [2, 8, 8], strides = [1, 1, 1]} : vector<2x8x32xf32> to vector<2x8x8xf32>
    %169 = vector.extract_strided_slice %165 {offsets = [0, 0, 0], sizes = [2, 8, 8], strides = [1, 1, 1]} : vector<2x8x32xf32> to vector<2x8x8xf32>
    %170 = vector.extract_strided_slice %167 {offsets = [0, 0, 0], sizes = [2, 8, 8], strides = [1, 1, 1]} : vector<2x8x32xf32> to vector<2x8x8xf32>
    "tpu.trace_start"() <{level = 10 : i32, message = "nqd,nkd->nqk"}> : () -> ()
    %cst_85 = arith.constant dense<0.000000e+00> : vector<2x8x8xf32>
    %171 = tpu.matmul %168, %169, %cst_85 {dimension_numbers = #tpu.dot_dimension_numbers<[2], [2], [1], [1], [0, 0, 0, 1, 1, 1], [0], [0]>} : vector<2x8x8xf32>, vector<2x8x8xf32>, vector<2x8x8xf32> -> vector<2x8x8xf32>
    "tpu.trace_stop"() : () -> ()
    %cst_86 = arith.constant 0.353553385 : f32
    %172 = vector.broadcast %cst_86 : f32 to vector<2x8x8xf32>
    %173 = arith.mulf %171, %172 : vector<2x8x8xf32>
    %cst_87 = arith.constant dense<0xFF800000> : vector<2x8xf32>
    %174 = vector.multi_reduction <maximumf>, %173, %cst_87 [2] : vector<2x8x8xf32> to vector<2x8xf32>
    %175 = vector.shape_cast %174 : vector<2x8xf32> to vector<2x8x1xf32>
    %176 = vector.broadcast %175 : vector<2x8x1xf32> to vector<2x8x8xf32>
    %177 = arith.subf %173, %176 : vector<2x8x8xf32>
    %178 = math.exp %177 : vector<2x8x8xf32>
    %cst_88 = arith.constant dense<0.000000e+00> : vector<2x8xf32>
    %179 = vector.multi_reduction <add>, %178, %cst_88 [2] : vector<2x8x8xf32> to vector<2x8xf32>
    %180 = vector.shape_cast %179 : vector<2x8xf32> to vector<2x8x1xf32>
    %181 = tpu.reciprocal %180 {approx = true} : vector<2x8x1xf32> -> vector<2x8x1xf32>
    %182 = vector.broadcast %181 : vector<2x8x1xf32> to vector<2x8x8xf32>
    %183 = arith.mulf %178, %182 : vector<2x8x8xf32>
    "tpu.trace_start"() <{level = 10 : i32, message = "nqk,nkd->nqd"}> : () -> ()
    %cst_89 = arith.constant dense<0.000000e+00> : vector<2x8x8xf32>
    %184 = tpu.matmul %183, %170, %cst_89 {dimension_numbers = #tpu.dot_dimension_numbers<[2], [1], [1], [2], [0, 0, 0, 1, 1, 2], [0], [0]>} : vector<2x8x8xf32>, vector<2x8x8xf32>, vector<2x8x8xf32> -> vector<2x8x8xf32>
    "tpu.trace_stop"() : () -> ()
    %185 = vector.extract_strided_slice %163 {offsets = [0, 0, 8], sizes = [2, 8, 8], strides = [1, 1, 1]} : vector<2x8x32xf32> to vector<2x8x8xf32>
    %186 = vector.extract_strided_slice %165 {offsets = [0, 0, 8], sizes = [2, 8, 8], strides = [1, 1, 1]} : vector<2x8x32xf32> to vector<2x8x8xf32>
    %187 = vector.extract_strided_slice %167 {offsets = [0, 0, 8], sizes = [2, 8, 8], strides = [1, 1, 1]} : vector<2x8x32xf32> to vector<2x8x8xf32>
    "tpu.trace_start"() <{level = 10 : i32, message = "nqd,nkd->nqk"}> : () -> ()
    %cst_90 = arith.constant dense<0.000000e+00> : vector<2x8x8xf32>
    %188 = tpu.matmul %185, %186, %cst_90 {dimension_numbers = #tpu.dot_dimension_numbers<[2], [2], [1], [1], [0, 0, 0, 1, 1, 1], [0], [0]>} : vector<2x8x8xf32>, vector<2x8x8xf32>, vector<2x8x8xf32> -> vector<2x8x8xf32>
    "tpu.trace_stop"() : () -> ()
    %cst_91 = arith.constant 0.353553385 : f32
    %189 = vector.broadcast %cst_91 : f32 to vector<2x8x8xf32>
    %190 = arith.mulf %188, %189 : vector<2x8x8xf32>
    %cst_92 = arith.constant dense<0xFF800000> : vector<2x8xf32>
    %191 = vector.multi_reduction <maximumf>, %190, %cst_92 [2] : vector<2x8x8xf32> to vector<2x8xf32>
    %192 = vector.shape_cast %191 : vector<2x8xf32> to vector<2x8x1xf32>
    %193 = vector.broadcast %192 : vector<2x8x1xf32> to vector<2x8x8xf32>
    %194 = arith.subf %190, %193 : vector<2x8x8xf32>
    %195 = math.exp %194 : vector<2x8x8xf32>
    %cst_93 = arith.constant dense<0.000000e+00> : vector<2x8xf32>
    %196 = vector.multi_reduction <add>, %195, %cst_93 [2] : vector<2x8x8xf32> to vector<2x8xf32>
    %197 = vector.shape_cast %196 : vector<2x8xf32> to vector<2x8x1xf32>
    %198 = tpu.reciprocal %197 {approx = true} : vector<2x8x1xf32> -> vector<2x8x1xf32>
    %199 = vector.broadcast %198 : vector<2x8x1xf32> to vector<2x8x8xf32>
    %200 = arith.mulf %195, %199 : vector<2x8x8xf32>
    "tpu.trace_start"() <{level = 10 : i32, message = "nqk,nkd->nqd"}> : () -> ()
    %cst_94 = arith.constant dense<0.000000e+00> : vector<2x8x8xf32>
    %201 = tpu.matmul %200, %187, %cst_94 {dimension_numbers = #tpu.dot_dimension_numbers<[2], [1], [1], [2], [0, 0, 0, 1, 1, 2], [0], [0]>} : vector<2x8x8xf32>, vector<2x8x8xf32>, vector<2x8x8xf32> -> vector<2x8x8xf32>
    "tpu.trace_stop"() : () -> ()
    %202 = vector.extract_strided_slice %163 {offsets = [0, 0, 16], sizes = [2, 8, 8], strides = [1, 1, 1]} : vector<2x8x32xf32> to vector<2x8x8xf32>
    %203 = vector.extract_strided_slice %165 {offsets = [0, 0, 16], sizes = [2, 8, 8], strides = [1, 1, 1]} : vector<2x8x32xf32> to vector<2x8x8xf32>
    %204 = vector.extract_strided_slice %167 {offsets = [0, 0, 16], sizes = [2, 8, 8], strides = [1, 1, 1]} : vector<2x8x32xf32> to vector<2x8x8xf32>
    "tpu.trace_start"() <{level = 10 : i32, message = "nqd,nkd->nqk"}> : () -> ()
    %cst_95 = arith.constant dense<0.000000e+00> : vector<2x8x8xf32>
    %205 = tpu.matmul %202, %203, %cst_95 {dimension_numbers = #tpu.dot_dimension_numbers<[2], [2], [1], [1], [0, 0, 0, 1, 1, 1], [0], [0]>} : vector<2x8x8xf32>, vector<2x8x8xf32>, vector<2x8x8xf32> -> vector<2x8x8xf32>
    "tpu.trace_stop"() : () -> ()
    %cst_96 = arith.constant 0.353553385 : f32
    %206 = vector.broadcast %cst_96 : f32 to vector<2x8x8xf32>
    %207 = arith.mulf %205, %206 : vector<2x8x8xf32>
    %cst_97 = arith.constant dense<0xFF800000> : vector<2x8xf32>
    %208 = vector.multi_reduction <maximumf>, %207, %cst_97 [2] : vector<2x8x8xf32> to vector<2x8xf32>
    %209 = vector.shape_cast %208 : vector<2x8xf32> to vector<2x8x1xf32>
    %210 = vector.broadcast %209 : vector<2x8x1xf32> to vector<2x8x8xf32>
    %211 = arith.subf %207, %210 : vector<2x8x8xf32>
    %212 = math.exp %211 : vector<2x8x8xf32>
    %cst_98 = arith.constant dense<0.000000e+00> : vector<2x8xf32>
    %213 = vector.multi_reduction <add>, %212, %cst_98 [2] : vector<2x8x8xf32> to vector<2x8xf32>
    %214 = vector.shape_cast %213 : vector<2x8xf32> to vector<2x8x1xf32>
    %215 = tpu.reciprocal %214 {approx = true} : vector<2x8x1xf32> -> vector<2x8x1xf32>
    %216 = vector.broadcast %215 : vector<2x8x1xf32> to vector<2x8x8xf32>
    %217 = arith.mulf %212, %216 : vector<2x8x8xf32>
    "tpu.trace_start"() <{level = 10 : i32, message = "nqk,nkd->nqd"}> : () -> ()
    %cst_99 = arith.constant dense<0.000000e+00> : vector<2x8x8xf32>
    %218 = tpu.matmul %217, %204, %cst_99 {dimension_numbers = #tpu.dot_dimension_numbers<[2], [1], [1], [2], [0, 0, 0, 1, 1, 2], [0], [0]>} : vector<2x8x8xf32>, vector<2x8x8xf32>, vector<2x8x8xf32> -> vector<2x8x8xf32>
    "tpu.trace_stop"() : () -> ()
    %219 = vector.extract_strided_slice %163 {offsets = [0, 0, 24], sizes = [2, 8, 8], strides = [1, 1, 1]} : vector<2x8x32xf32> to vector<2x8x8xf32>
    %220 = vector.extract_strided_slice %165 {offsets = [0, 0, 24], sizes = [2, 8, 8], strides = [1, 1, 1]} : vector<2x8x32xf32> to vector<2x8x8xf32>
    %221 = vector.extract_strided_slice %167 {offsets = [0, 0, 24], sizes = [2, 8, 8], strides = [1, 1, 1]} : vector<2x8x32xf32> to vector<2x8x8xf32>
    "tpu.trace_start"() <{level = 10 : i32, message = "nqd,nkd->nqk"}> : () -> ()
    %cst_100 = arith.constant dense<0.000000e+00> : vector<2x8x8xf32>
    %222 = tpu.matmul %219, %220, %cst_100 {dimension_numbers = #tpu.dot_dimension_numbers<[2], [2], [1], [1], [0, 0, 0, 1, 1, 1], [0], [0]>} : vector<2x8x8xf32>, vector<2x8x8xf32>, vector<2x8x8xf32> -> vector<2x8x8xf32>
    "tpu.trace_stop"() : () -> ()
    %cst_101 = arith.constant 0.353553385 : f32
    %223 = vector.broadcast %cst_101 : f32 to vector<2x8x8xf32>
    %224 = arith.mulf %222, %223 : vector<2x8x8xf32>
    %cst_102 = arith.constant dense<0xFF800000> : vector<2x8xf32>
    %225 = vector.multi_reduction <maximumf>, %224, %cst_102 [2] : vector<2x8x8xf32> to vector<2x8xf32>
    %226 = vector.shape_cast %225 : vector<2x8xf32> to vector<2x8x1xf32>
    %227 = vector.broadcast %226 : vector<2x8x1xf32> to vector<2x8x8xf32>
    %228 = arith.subf %224, %227 : vector<2x8x8xf32>
    %229 = math.exp %228 : vector<2x8x8xf32>
    %cst_103 = arith.constant dense<0.000000e+00> : vector<2x8xf32>
    %230 = vector.multi_reduction <add>, %229, %cst_103 [2] : vector<2x8x8xf32> to vector<2x8xf32>
    %231 = vector.shape_cast %230 : vector<2x8xf32> to vector<2x8x1xf32>
    %232 = tpu.reciprocal %231 {approx = true} : vector<2x8x1xf32> -> vector<2x8x1xf32>
    %233 = vector.broadcast %232 : vector<2x8x1xf32> to vector<2x8x8xf32>
    %234 = arith.mulf %229, %233 : vector<2x8x8xf32>
    "tpu.trace_start"() <{level = 10 : i32, message = "nqk,nkd->nqd"}> : () -> ()
    %cst_104 = arith.constant dense<0.000000e+00> : vector<2x8x8xf32>
    %235 = tpu.matmul %234, %221, %cst_104 {dimension_numbers = #tpu.dot_dimension_numbers<[2], [1], [1], [2], [0, 0, 0, 1, 1, 2], [0], [0]>} : vector<2x8x8xf32>, vector<2x8x8xf32>, vector<2x8x8xf32> -> vector<2x8x8xf32>
    "tpu.trace_stop"() : () -> ()
    %236 = tpu.concatenate %184, %201, %218, %235 in 2 : vector<2x8x8xf32>, vector<2x8x8xf32>, vector<2x8x8xf32>, vector<2x8x8xf32> -> vector<2x8x32xf32>
    %237 = vector.shape_cast %236 : vector<2x8x32xf32> to vector<16x32xf32>
    %cst_105 = arith.constant dense<0.000000e+00> : vector<16x32xf32>
    %238 = tpu.matmul %237, %13, %cst_105 {dimension_numbers = #tpu.dot_dimension_numbers<[1], [0], [0], [1], [0, 0, 1, 1], [], []>} : vector<16x32xf32>, vector<32x32xf32>, vector<16x32xf32> -> vector<16x32xf32>
    %239 = vector.broadcast %14 : vector<1x32xf32> to vector<16x32xf32>
    %240 = arith.addf %238, %239 : vector<16x32xf32>
    %241 = arith.addf %240, %153 : vector<16x32xf32>
    %cst_106 = arith.constant dense<0.000000e+00> : vector<16xf32>
    %242 = vector.multi_reduction <add>, %241, %cst_106 [1] : vector<16x32xf32> to vector<16xf32>
    %243 = vector.shape_cast %242 : vector<16xf32> to vector<16x1xf32>
    %cst_107 = arith.constant 3.200000e+01 : f32
    %244 = vector.broadcast %cst_107 : f32 to vector<16x1xf32>
    %245 = arith.divf %243, %244 : vector<16x1xf32>
    %246 = vector.broadcast %245 : vector<16x1xf32> to vector<16x32xf32>
    %247 = arith.subf %241, %246 : vector<16x32xf32>
    %248 = arith.mulf %247, %247 : vector<16x32xf32>
    %cst_108 = arith.constant dense<0.000000e+00> : vector<16xf32>
    %249 = vector.multi_reduction <add>, %248, %cst_108 [1] : vector<16x32xf32> to vector<16xf32>
    %250 = vector.shape_cast %249 : vector<16xf32> to vector<16x1xf32>
    %cst_109 = arith.constant 3.200000e+01 : f32
    %251 = vector.broadcast %cst_109 : f32 to vector<16x1xf32>
    %252 = arith.divf %250, %251 : vector<16x1xf32>
    %253 = vector.broadcast %245 : vector<16x1xf32> to vector<16x32xf32>
    %254 = arith.subf %241, %253 : vector<16x32xf32>
    %cst_110 = arith.constant 9.99999974E-6 : f32
    %255 = vector.broadcast %cst_110 : f32 to vector<16x1xf32>
    %256 = arith.addf %252, %255 : vector<16x1xf32>
    %257 = math.rsqrt %256 : vector<16x1xf32>
    %258 = vector.broadcast %257 : vector<16x1xf32> to vector<16x32xf32>
    %259 = arith.mulf %254, %258 : vector<16x32xf32>
    %260 = vector.broadcast %15 : vector<1x32xf32> to vector<16x32xf32>
    %261 = arith.mulf %259, %260 : vector<16x32xf32>
    %262 = vector.broadcast %16 : vector<1x32xf32> to vector<16x32xf32>
    %263 = arith.addf %261, %262 : vector<16x32xf32>
    %cst_111 = arith.constant dense<0.000000e+00> : vector<16x64xf32>
    %264 = tpu.matmul %263, %17, %cst_111 {dimension_numbers = #tpu.dot_dimension_numbers<[1], [0], [0], [1], [0, 0, 1, 1], [], []>} : vector<16x32xf32>, vector<32x64xf32>, vector<16x64xf32> -> vector<16x64xf32>
    %265 = vector.broadcast %18 : vector<1x64xf32> to vector<16x64xf32>
    %266 = arith.addf %264, %265 : vector<16x64xf32>
    %cst_112 = arith.constant 0.000000e+00 : f32
    %267 = vector.broadcast %cst_112 : f32 to vector<16x64xf32>
    %268 = arith.maximumf %266, %267 : vector<16x64xf32>
    %cst_113 = arith.constant dense<0.000000e+00> : vector<16x32xf32>
    %269 = tpu.matmul %268, %19, %cst_113 {dimension_numbers = #tpu.dot_dimension_numbers<[1], [0], [0], [1], [0, 0, 1, 1], [], []>} : vector<16x64xf32>, vector<64x32xf32>, vector<16x32xf32> -> vector<16x32xf32>
    %270 = vector.broadcast %20 : vector<1x32xf32> to vector<16x32xf32>
    %271 = arith.addf %269, %270 : vector<16x32xf32>
    %272 = arith.addf %271, %263 : vector<16x32xf32>
    %cst_114 = arith.constant dense<0.000000e+00> : vector<16xf32>
    %273 = vector.multi_reduction <add>, %272, %cst_114 [1] : vector<16x32xf32> to vector<16xf32>
    %274 = vector.shape_cast %273 : vector<16xf32> to vector<16x1xf32>
    %cst_115 = arith.constant 3.200000e+01 : f32
    %275 = vector.broadcast %cst_115 : f32 to vector<16x1xf32>
    %276 = arith.divf %274, %275 : vector<16x1xf32>
    %277 = vector.broadcast %276 : vector<16x1xf32> to vector<16x32xf32>
    %278 = arith.subf %272, %277 : vector<16x32xf32>
    %279 = arith.mulf %278, %278 : vector<16x32xf32>
    %cst_116 = arith.constant dense<0.000000e+00> : vector<16xf32>
    %280 = vector.multi_reduction <add>, %279, %cst_116 [1] : vector<16x32xf32> to vector<16xf32>
    %281 = vector.shape_cast %280 : vector<16xf32> to vector<16x1xf32>
    %cst_117 = arith.constant 3.200000e+01 : f32
    %282 = vector.broadcast %cst_117 : f32 to vector<16x1xf32>
    %283 = arith.divf %281, %282 : vector<16x1xf32>
    %284 = vector.broadcast %276 : vector<16x1xf32> to vector<16x32xf32>
    %285 = arith.subf %272, %284 : vector<16x32xf32>
    %cst_118 = arith.constant 9.99999974E-6 : f32
    %286 = vector.broadcast %cst_118 : f32 to vector<16x1xf32>
    %287 = arith.addf %283, %286 : vector<16x1xf32>
    %288 = math.rsqrt %287 : vector<16x1xf32>
    %289 = vector.broadcast %288 : vector<16x1xf32> to vector<16x32xf32>
    %290 = arith.mulf %285, %289 : vector<16x32xf32>
    %291 = vector.broadcast %21 : vector<1x32xf32> to vector<16x32xf32>
    %292 = arith.mulf %290, %291 : vector<16x32xf32>
    %293 = vector.broadcast %22 : vector<1x32xf32> to vector<16x32xf32>
    %294 = arith.addf %292, %293 : vector<16x32xf32>
    %295 = vector.shape_cast %294 : vector<16x32xf32> to vector<2x8x32xf32>
    %c0_119 = arith.constant 0 : index
    %c0_120 = arith.constant 0 : index
    %c0_121 = arith.constant 0 : index
    %296 = vector.load %arg25[%c0_119, %c0_120, %c0_121] : memref<2x8x32xf32, #tpu.memory_space<vmem>>, vector<2x8x32xf32>
    tpu.vector_store %arg25[%c0_119, %c0_120, %c0_121], %295 {strides = array<i32>} : memref<2x8x32xf32, #tpu.memory_space<vmem>>, vector<2x8x32xf32>,
    return
  }
}

</mosaic_0001>

<bundles_post_ra>
// kernel: decoder_forward.3
= control target key start
LH: loop header
LB: loop body
LE: loop exit
PB: predicated region body
PF: predicated region fallthrough
CT: control target
= control target key end

     0   :  { %s5334_s0 = inlined_call_operand.vmem [shape: f32[2,8,32], index: 0, kind: input, shape index: {}]   ;;  %s5335_s1 = inlined_call_operand.vmem [shape: f32[2,8,32], index: 1, kind: input, shape index: {}]   ;;  %s5336_s2 = inlined_call_operand.vmem [shape: f32[8,8], index: 2, kind: input, shape index: {}]   ;;  %s5337_s3 = inlined_call_operand.vmem [shape: f32[32,32], index: 3, kind: input, shape index: {}]   ;;  %s5338_s4 = inlined_call_operand.vmem [shape: f32[1,32], index: 4, kind: input, shape index: {}]   ;;  %s5339_s5 = inlined_call_operand.vmem [shape: f32[32,64], index: 5, kind: input, shape index: {}]   ;;  %s5340_s6 = inlined_call_operand.vmem [shape: f32[1,64], index: 6, kind: input, shape index: {}]   ;;  %s5341_s7 = inlined_call_operand.vmem [shape: f32[32,32], index: 7, kind: input, shape index: {}]   ;;  %s5342_s8 = inlined_call_operand.vmem [shape: f32[1,32], index: 8, kind: input, shape index: {}]   ;;  %s5343_s9 = inlined_call_operand.vmem [shape: f32[1,32], index: 9, kind: input, shape index: {}]   ;;  %s5344_s10 = inlined_call_operand.vmem [shape: f32[1,32], index: 10, kind: input, shape index: {}]   ;;  %s5345_s11 = inlined_call_operand.vmem [shape: f32[32,32], index: 11, kind: input, shape index: {}]   ;;  %s5346_s12 = inlined_call_operand.vmem [shape: f32[1,32], index: 12, kind: input, shape index: {}]   ;;  %s5347_s13 = inlined_call_operand.vmem [shape: f32[32,64], index: 13, kind: input, shape index: {}]   ;;  %s5348_s14 = inlined_call_operand.vmem [shape: f32[1,64], index: 14, kind: input, shape index: {}]   ;;  %s5349_s15 = inlined_call_operand.vmem [shape: f32[32,32], index: 15, kind: input, shape index: {}]   ;;  %s5350_s16 = inlined_call_operand.vmem [shape: f32[1,32], index: 16, kind: input, shape index: {}]   ;;  %s5351_s17 = inlined_call_operand.hbm [shape: f32[1,32], index: 17, kind: input, shape index: {}]   ;;  %s5352_s18 = inlined_call_operand.hbm [shape: f32[1,32], index: 18, kind: input, shape index: {}]   ;;  %s5353_s19 = inlined_call_operand.vmem [shape: f32[32,64], index: 19, kind: input, shape index: {}]   ;;  %s5354_s20 = inlined_call_operand.hbm [shape: f32[1,64], index: 20, kind: input, shape index: {}]   ;;  %s5355_s21 = inlined_call_operand.vmem [shape: f32[64,32], index: 21, kind: input, shape index: {}]   ;;  %s5356_s22 = inlined_call_operand.hbm [shape: f32[1,32], index: 22, kind: input, shape index: {}]   ;;  %s5357_s23 = inlined_call_operand.hbm [shape: f32[1,32], index: 23, kind: input, shape index: {}]   ;;  %s5358_s24 = inlined_call_operand.hbm [shape: f32[1,32], index: 24, kind: input, shape index: {}]   ;;  %s5359_s25 = inlined_call_operand.hbm [shape: f32[2,8,32], index: 25, kind: output, shape index: {}]  }
   0x1   :  { %5365 = sst [smem:[#allocation19_spill]] %s5334_s0 }
   0x2   :  { %5366 = sst [smem:[#allocation20_spill]] %s5335_s1 }
   0x3   :  { %5367 = sst [smem:[#allocation21_spill]] %s5336_s2 }
   0x4   :  { %5368 = sst [smem:[#allocation22_spill]] %s5337_s3 }
   0x5   :  { %5369 = sst [smem:[#allocation23_spill]] %s5338_s4 }
   0x6   :  { %5370 = sst [smem:[#allocation24_spill]] %s5339_s5 }
   0x7   :  { %5371 = sst [smem:[#allocation25_spill]] %s5340_s6 }
   0x8   :  { %5372 = sst [smem:[#allocation26_spill]] %s5341_s7 }
   0x9   :  { %5373 = sst [smem:[#allocation27_spill]] %s5342_s8 }
   0xa   :  { %5374 = sst [smem:[#allocation28_spill]] %s5343_s9 }
   0xb   :  { %30 = vsyncpa [#allocation3], 0 }
   0xc   :  { %31 = vsyncpa [#allocation6], 0 }
   0xd   :  { %32 = vsyncpa [#allocation9], 0 }
   0xe   :  { %33 = vsyncpa [#allocation12], 0 }
   0xf   :  { %34 = vsyncpa [#allocation4], 0  ;;  %s4559_s29 = smov [#allocation5]   ;;  %s4560_s6 = smov [#allocation8]  }
  0x10   :  { %s85_s2 = sshll.u32 %s4559_s29, 4  ;;  %s109_s30 = sshll.u32 %s4560_s6, 4  ;;  %s86_s2 = int_to_ptr.vmem [resolvable:$true] %s85_s2  ;;  %s110_s30 = int_to_ptr.vmem [resolvable:$true] %s109_s30 }
  0x11   :  { %s4395_s26 = scalar_lea.hbm %s5352_s18, 16 }
  0x12   :  { %p4396_p0 = scmp.ne.s32.totalorder %s5352_s18, %s4395_s26  ;;  %p4399_p1 = scmp.lt.u32.totalorder %s4395_s26, %s5352_s18 }
  0x14   :  { %p4401_p2 = pnand %p4399_p1, %p4396_p0 }
  0x16   :  { %4404 = shalt.err (!%p4401_p2)
}
  0x17   :  { %s4405_s28 = scalar_lea.vmem %s86_s2, 16  ;;  %s4409_s9 = scalar_lea.vmem %s86_s2, 32 }
  0x18   :  { %p4406_p3 = scmp.ne.s32.totalorder %s86_s2, %s4405_s28  ;;  %p4410_p4 = scmp.lt.s32.totalorder %s86_s2, %s86_s2 }
  0x19   :  { %p4411_p5 = scmp.lt.s32.totalorder %s4409_s9, %s4405_s28 }
  0x1b   :  { %p4412_p6 = por %p4411_p5, %p4410_p4 }
  0x1d   :  { %p4413_p7 = pnand %p4412_p6, %p4406_p3 }
  0x1f   :  { %4416 = shalt.err (!%p4413_p7)
}
  0x20   :  { %88 = dma.hbm_to_vmem [thread:$0]  %s5352_s18, 16, %s86_s2, [#allocation6]  }
  0x21   :  { %s4417_s7 = scalar_lea.hbm %s5356_s22, 16 }
  0x22   :  { %p4418_p8 = scmp.ne.s32.totalorder %s5356_s22, %s4417_s7  ;;  %p4421_p9 = scmp.lt.u32.totalorder %s4417_s7, %s5356_s22 }
  0x24   :  { %p4423_p10 = pnand %p4421_p9, %p4418_p8 }
  0x26   :  { %4426 = shalt.err (!%p4423_p10)
}
  0x27   :  { %s4427_s27 = scalar_lea.vmem %s110_s30, 16  ;;  %s4431_s4 = scalar_lea.vmem %s110_s30, 32 }
  0x28   :  { %p4428_p11 = scmp.ne.s32.totalorder %s110_s30, %s4427_s27  ;;  %p4432_p12 = scmp.lt.s32.totalorder %s110_s30, %s110_s30 }
  0x29   :  { %p4433_p13 = scmp.lt.s32.totalorder %s4431_s4, %s4427_s27 }
  0x2b   :  { %p4434_p0 = por %p4433_p13, %p4432_p12 }
  0x2d   :  { %p4435_p1 = pnand %p4434_p0, %p4428_p11 }
  0x2f   :  { %4438 = shalt.err (!%p4435_p1)
}
  0x30   :  { %112 = dma.hbm_to_vmem [thread:$0]  %s5356_s22, 16, %s110_s30, [#allocation9]  }
  0x31   :  { %s4561_s28 = smov [#allocation2]   ;;  %s4562_s5 = smov [#allocation7]  }
  0x32   :  { %s75_s9 = sshll.u32 %s4561_s28, 4  ;;  %s97_s0 = sshll.u32 %s4562_s5, 4  ;;  %s76_s9 = int_to_ptr.vmem [resolvable:$true] %s75_s9  ;;  %s98_s0 = int_to_ptr.vmem [resolvable:$true] %s97_s0 }
  0x33   :  { %s4439_s7 = scalar_lea.hbm %s5351_s17, 16 }
  0x34   :  { %p4440_p2 = scmp.ne.s32.totalorder %s5351_s17, %s4439_s7  ;;  %p4443_p3 = scmp.lt.u32.totalorder %s4439_s7, %s5351_s17 }
  0x36   :  { %p4445_p4 = pnand %p4443_p3, %p4440_p2 }
  0x38   :  { %4448 = shalt.err (!%p4445_p4)
}
  0x39   :  { %s4449_s22 = scalar_lea.vmem %s76_s9, 16  ;;  %s4453_s30 = scalar_lea.vmem %s76_s9, 32 }
  0x3a   :  { %p4450_p5 = scmp.ne.s32.totalorder %s76_s9, %s4449_s22  ;;  %p4454_p6 = scmp.lt.s32.totalorder %s76_s9, %s76_s9 }
  0x3b   :  { %p4455_p7 = scmp.lt.s32.totalorder %s4453_s30, %s4449_s22 }
  0x3d   :  { %p4456_p8 = por %p4455_p7, %p4454_p6 }
  0x3f   :  { %p4457_p9 = pnand %p4456_p8, %p4450_p5 }
  0x41   :  { %4460 = shalt.err (!%p4457_p9)
}
  0x42   :  { %78 = dma.hbm_to_vmem [thread:$0]  %s5351_s17, 16, %s76_s9, [#allocation3]  }
  0x43   :  { %s4461_s28 = scalar_lea.hbm %s5354_s20, 16 }
  0x44   :  { %p4462_p10 = scmp.ne.s32.totalorder %s5354_s20, %s4461_s28  ;;  %p4465_p11 = scmp.lt.u32.totalorder %s4461_s28, %s5354_s20 }
  0x46   :  { %p4467_p12 = pnand %p4465_p11, %p4462_p10 }
  0x48   :  { %4470 = shalt.err (!%p4467_p12)
}
  0x49   :  { %s4471_s3 = scalar_lea.vmem %s98_s0, 16  ;;  %s4475_s26 = scalar_lea.vmem %s98_s0, 32 }
  0x4a   :  { %p4472_p13 = scmp.ne.s32.totalorder %s98_s0, %s4471_s3  ;;  %p4476_p0 = scmp.lt.s32.totalorder %s98_s0, %s98_s0 }
  0x4b   :  { %p4477_p1 = scmp.lt.s32.totalorder %s4475_s26, %s4471_s3 }
  0x4d   :  { %p4478_p2 = por %p4477_p1, %p4476_p0 }
  0x4f   :  { %p4479_p3 = pnand %p4478_p2, %p4472_p13 }
  0x51   :  { %4482 = shalt.err (!%p4479_p3)
}
  0x52   :  { %100 = dma.hbm_to_vmem [thread:$0]  %s5354_s20, 16, %s98_s0, [#allocation6]  }
  0x53   :  { %s4563_s1 = smov [#allocation10]   ;;  %s4564_s22 = smov [#allocation11]  }
  0x54   :  { %s119_s8 = sshll.u32 %s4563_s1, 4  ;;  %s129_s30 = sshll.u32 %s4564_s22, 4  ;;  %s120_s8 = int_to_ptr.vmem [resolvable:$true] %s119_s8  ;;  %s130_s30 = int_to_ptr.vmem [resolvable:$true] %s129_s30 }
  0x55   :  { %s4483_s18 = scalar_lea.hbm %s5357_s23, 16 }
  0x56   :  { %p4484_p4 = scmp.ne.s32.totalorder %s5357_s23, %s4483_s18  ;;  %p4487_p5 = scmp.lt.u32.totalorder %s4483_s18, %s5357_s23 }
  0x58   :  { %p4489_p6 = pnand %p4487_p5, %p4484_p4 }
  0x5a   :  { %4492 = shalt.err (!%p4489_p6)
}
  0x5b   :  { %s4493_s20 = scalar_lea.vmem %s120_s8, 16  ;;  %s4497_s0 = scalar_lea.vmem %s120_s8, 32 }
  0x5c   :  { %p4494_p7 = scmp.ne.s32.totalorder %s120_s8, %s4493_s20  ;;  %p4498_p8 = scmp.lt.s32.totalorder %s120_s8, %s120_s8 }
  0x5d   :  { %p4499_p9 = scmp.lt.s32.totalorder %s4497_s0, %s4493_s20 }
  0x5f   :  { %p4500_p10 = por %p4499_p9, %p4498_p8 }
  0x61   :  { %p4501_p11 = pnand %p4500_p10, %p4494_p7 }
  0x63   :  { %4504 = shalt.err (!%p4501_p11)
}
  0x64   :  { %122 = dma.hbm_to_vmem [thread:$0]  %s5357_s23, 16, %s120_s8, [#allocation9]  }
  0x65   :  { %s4505_s17 = scalar_lea.hbm %s5358_s24, 16 }
  0x66   :  { %p4506_p12 = scmp.ne.s32.totalorder %s5358_s24, %s4505_s17  ;;  %p4509_p13 = scmp.lt.u32.totalorder %s4505_s17, %s5358_s24 }
  0x68   :  { %p4511_p0 = pnand %p4509_p13, %p4506_p12 }
  0x6a   :  { %4514 = shalt.err (!%p4511_p0)
}
  0x6b   :  { %s4515_s4 = scalar_lea.vmem %s130_s30, 16  ;;  %s4519_s18 = scalar_lea.vmem %s130_s30, 32 }
  0x6c   :  { %p4516_p1 = scmp.ne.s32.totalorder %s130_s30, %s4515_s4  ;;  %p4520_p2 = scmp.lt.s32.totalorder %s130_s30, %s130_s30 }
  0x6d   :  { %p4521_p3 = scmp.lt.s32.totalorder %s4519_s18, %s4515_s4 }
  0x6f   :  { %p4522_p4 = por %p4521_p3, %p4520_p2 }
  0x71   :  { %p4523_p5 = pnand %p4522_p4, %p4516_p1 }
  0x73   :  { %4526 = shalt.err (!%p4523_p5)
}
  0x74   :  { %132 = dma.hbm_to_vmem [thread:$0]  %s5358_s24, 16, %s130_s30, [#allocation12]  }
  0x75   :  { %4549 = dma.done.wait [#allocation3], 16  }
  0x76   :  { %4550 = vsyncadd [#allocation3], 4294967280 }
  0x77   :  { %4551 = dma.done.wait [#allocation6], 32  }
  0x78   :  { %4552 = vsyncadd [#allocation6], 4294967264 }
  0x79   :  { %4553 = dma.done.wait [#allocation9], 32  }
  0x7a   :  { %4554 = vsyncadd [#allocation9], 4294967264 }
  0x7b   :  { %4555 = dma.done.wait [#allocation12], 16  }
  0x7c   :  { %4556 = vsyncadd [#allocation12], 4294967280  ;;  %vm212_vm0 = vcmask 261120   ;;  %s5375_s5 = sld [smem:[#allocation22_spill]]  ;;  %s5376_s26 = sld [smem:[#allocation19_spill]]  ;;  %v4565_v14 = vmov 0.0  }
  0x7d   :  { %s5377_s1 = sld [smem:[#allocation24_spill]]  ;;  %3993 = vmatprep.subr.mxu0 %v4565_v14  ;;  %vm4566_vm1 = vmmov 0   ;;  %s5378_s20 = sld [smem:[#allocation25_spill]]  ;;  %vm376_vm2 = vcmask 64512   ;;  %vm1737_vm4 = vcmask 130048   ;;  %vm1740_vm5 = vcmask 195584  }
  0x7e   :  { %3995 = vmatprep.mubr.msk.f32.mxu0 %vm4566_vm1, %v4565_v14  ;;  %s5379_s24 = sld [smem:[#allocation23_spill]]  ;;  %s4567_s30 = smov 96   ;;  %vm3629_vm6 = vcmask 523264  }
  0x7f   :  { %s4568_s7 = smov 120   ;;  %s5380_s17 = sld [smem:[#allocation21_spill]] }
  0x80   :  { %s4569_s9 = smov 88   ;;  %s4571_s22 = smov 80  }
  0x81   :  { %s4572_s27 = smov 104   ;;  %s4573_s4 = smov 72  }
  0x82   :  { %v152_v0 = vld [vmem:[%s5375_s5] sm:$0xff]  ;;  %v153_v1 = vld [vmem:[%s5375_s5 + $0x8] sm:$0xff]  ;;  %v154_v2 = vld [vmem:[%s5375_s5 + $0x10] sm:$0xff]  ;;  %s4574_s18 = smov 8   ;;  %s4575_s23 = smov 16  }
  0x83   :  { %v4227_v3 = vpack.c.bf16 %v153_v1, %v152_v0  ;;  %v155_v4 = vld [vmem:[%s5375_s5 + $0x18] sm:$0xff]  ;;  %v4796_v5 = vld [vmem:[%s5376_s26] sm:$0xff]  ;;  %v158_v8 = vld [vmem:[%s5377_s1 + $0x8] sm:$0xff]  ;;  %s5381_s28 = sld [smem:[#allocation26_spill]]  ;;  %s4576_s3 = smov 24  }
  0x84   :  { %v4231_v6 = vpack.c.bf16 %v155_v4, %v154_v2  ;;  %3979 = vmatprep.mubr.msk.f32.mxu1 %vm212_vm0, %v4796_v5  ;;  %v157_v7 = vld [vmem:[%s5377_s1] sm:$0xff]  ;;  %v159_v10 = vld [vmem:[%s5377_s1 + $0x10] sm:$0xff]  ;;  %v160_v11 = vld [vmem:[%s5377_s1 + $0x18] sm:$0xff]  ;;  %s4570_s1 = smov 112   ;;  %s5382_s8 = sld [smem:[#allocation27_spill]] }
  0x85   :  { %4228 = vmatprep.subr.bf16.mxu1 %v4227_v3  ;;  %v4235_v9 = vpack.c.bf16 %v158_v8, %v157_v7  ;;  %v4815_v12 = vld [vmem:[%s5376_s26 + $0x8] sm:$0xff]  ;;  %v4239_v13 = vpack.c.bf16 %v160_v11, %v159_v10  ;;  %v3780_v17 = vld [vmem:[%s5378_s20] ss:$0 sm:$0xff]  ;;  %s5383_s29 = sld [smem:[#allocation20_spill]] }
  0x86   :  { %4230 = vmatpush3.bf16.msra.mxu1 %v4227_v3  ;;  %v3777_v19 = vld [vmem:[%s5379_s24] ss:$0 sm:$0xff] }
  0x87   :  { %4232 = vmatprep.subr.bf16.mxu1 %v4231_v6  ;;  %v4867_v26 = vld [vmem:[%s5380_s17] sm:$0xff] }
  0x88   :  { %vm375_vm3 = vcmp.gt.f32.partialorder %v4867_v26, 0.0 }
  0x8a   :  { %4234 = vmatpush3.bf16.msra.mxu1 %v4231_v6 }
  0x8b   :  { %4236 = vmatprep.subr.bf16.mxu1 %v4235_v9 }
  0x8d   :  { %3980 = vmatmul.mubr.msk.f32.vlgmr.msra.gmra.mrb[0].mxu1 %vm212_vm0, %v4815_v12 }
  0x8e   :  { %4238 = vmatpush3.bf16.msra.mxu1 %v4235_v9  ;;  %3990 = vmatprep.mubr.msk.f32.mxu1 %vm212_vm0, %v4796_v5 }
  0x8f   :  { %4240 = vmatprep.subr.bf16.mxu1 %v4239_v13 }
  0x92   :  { %4242 = vmatpush3.bf16.msra.mxu1 %v4239_v13 }
  0x93   :  { %3998 = vmatprep.subr.mxu1 %v4565_v14 }
  0x95   :  { %3991 = vmatmul.mubr.msk.f32.vlgmr.msra.gmra.mrb[2].mxu1 %vm212_vm0, %v4815_v12 }
  0x96   :  { %4000 = vmatprep.mubr.msk.f32.mxu1 %vm4566_vm1, %v4565_v14 }
 0x160   :  { %v3981_v15 = vpop.f32.mrb[0].mxu1 }
 0x161   :  { %v285_v16 = vpop.f32.mrb[1].mxu1  ;;  %v4843_v23 = vadd.f32 %v3981_v15, %v3777_v19 }
 0x162   :  { %v4848_v24 = vadd.f32 %v3777_v19, %v285_v16 }
 0x168   :  { %v3992_v18 = vpop.f32.mrb[2].mxu1 }
 0x169   :  { %v4835_v20 = vadd.f32 %v3992_v18, %v3780_v17  ;;  %v366_v21 = vpop.f32.mrb[3].mxu1 }
 0x16a   :  { %v4837_v22 = vadd.f32 %v3780_v17, %v366_v21 }
 0x16b   :  { %633 = vrot.lane.b32.xlu1 %v4835_v20, %s4567_s30  ;;  %3999 = vmatpush3.xpose.msk.msra.mxu1 %vm376_vm2, %v4835_v20 }
 0x16c   :  { %3994 = vmatpush3.xpose.msk.msra.mxu0 %vm376_vm2, %v4837_v22  ;;  %4008 = vmatprep.subr.mxu1 %v4565_v14 }
 0x16d   :  { %4003 = vmatprep.subr.mxu0 %v4565_v14 }
 0x16e   :  { %4001 = vmatmul.mubr.msk.f32.vlgmr.msra.gmra.mrb[4].mxu1 %vm376_vm2, %v4843_v23 }
 0x16f   :  { %711 = vrot.lane.b32.xlu1 %v4837_v22, %s4568_s7  ;;  %3996 = vmatmul.mubr.msk.f32.vlgmr.msra.gmra.mrb[0].mxu0 %vm376_vm2, %v4848_v24 }
 0x170   :  { %4010 = vmatprep.mubr.msk.f32.mxu1 %vm4566_vm1, %v4565_v14  ;;  %4005 = vmatprep.mubr.msk.f32.mxu0 %vm4566_vm1, %v4565_v14 }
 0x173   :  { %789 = vrot.lane.b32.xlu1 %v4835_v20, %s4568_s7 }
 0x1dd   :  { %v634_v25 = vpop.permute.xlu1 %633 }
 0x1de   :  { %4009 = vmatpush3.msra.mxu1 %v634_v25 }
 0x1df   :  { %4018 = vmatprep.subr.mxu1 %v4565_v14 }
 0x1e1   :  { %v712_v48 = vpop.permute.xlu1 %711 }
 0x1e5   :  { %v790_v49 = vpop.permute.xlu1 %789 }
 0x241   :  { %v525_v27 = vpop.f32.mrb[4].mxu1 }
 0x242   :  { %v449_v28 = vpop.f32.mrb[0].mxu0  ;;  %v4002_v29 = vpop.f32.mrb[5].mxu1  ;;  %v530_v30 = vmul.f32 0.35355338, %v525_v27 }
 0x243   :  { %v529_v31 = vmul.f32 0.35355338, %v449_v28  ;;  %v3997_v32 = vpop.f32.mrb[1].mxu0 }
 0x244   :  { %v534_v35 = vsel %vm375_vm3, -10000.0, %v530_v30 }
 0x245   :  { %v533_v33 = vsel %vm375_vm3, -10000.0, %v529_v31  ;;  %v538_v36 = vsel %vm376_vm2, %v534_v35, -inf }
 0x246   :  { %v535_v34 = vsel %vm376_vm2, %v533_v33, -inf }
 0x247   :  { %536 = vmax.xlane.f32.xlu0 %v535_v34 }
 0x24b   :  { %539 = vmax.xlane.f32.xlu0 %v538_v36 }
 0x261   :  { %557 = vrot.lane.b32.xlu0 %v4837_v22, %s4567_s30 }
 0x265   :  { %709 = vrot.lane.b32.xlu0 %v4848_v24, %s4568_s7 }
 0x2d4   :  { %v537_v37 = vpop.xlane.xlu0 %536 }
 0x2d5   :  { %v541_v38 = vsub.f32 %v533_v33, %v537_v37 }
 0x2d7   :  { %v543_v41 = vmul.f32 1.442695, %v541_v38 }
 0x2d8   :  { %v540_v39 = vpop.xlane.xlu0 %539 }
 0x2d9   :  { %v542_v40 = vsub.f32 %v534_v35, %v540_v39 }
 0x2db   :  { %v545_v42 = vmul.f32 1.442695, %v542_v40 }
 0x2dc   :  { %v558_v43 = vpop.permute.xlu0 %557 }
 0x2dd   :  { %4319 = vpow2.f32 %v545_v42  ;;  %4004 = vmatpush3.msra.mxu0 %v558_v43 }
 0x2de   :  { %4013 = vmatprep.subr.mxu0 %v4565_v14  ;;  %4321 = vpow2.f32 %v543_v41 }
 0x2e0   :  { %v710_v57 = vpop.permute.xlu0 %709 }
 0x2e7   :  { %v4320_v44 = vpop.eup %4319 }
 0x2e8   :  { %v550_v45 = vsel %vm376_vm2, %v4320_v44, 0.0  ;;  %v4322_v46 = vpop.eup %4321 }
 0x2e9   :  { %551 = vadd.xlane.f32.xlu1 %v550_v45  ;;  %v547_v47 = vsel %vm376_vm2, %v4322_v46, 0.0 }
 0x2ed   :  { %548 = vadd.xlane.f32.xlu1 %v547_v47 }
 0x2fe   :  { %787 = vrot.lane.b32.xlu1 %v4843_v23, %s4568_s7 }
 0x376   :  { %v552_v50 = vpop.xlane.xlu1 %551 }
 0x377   :  { %4323 = vrcp.f32 %v552_v50 }
 0x37a   :  { %v549_v51 = vpop.xlane.xlu1 %548 }
 0x37b   :  { %4325 = vrcp.f32 %v549_v51 }
 0x37e   :  { %v788_v56 = vpop.permute.xlu1 %787 }
 0x381   :  { %v4324_v52 = vpop.eup %4323 }
 0x382   :  { %v556_v53 = vmul.f32 %v4324_v52, %v4320_v44 }
 0x384   :  { %4011 = vmatmul.mubr.msk.f32.vlgmr.msra.gmra.mrb[6].mxu1 %vm376_vm2, %v556_v53 }
 0x385   :  { %v4326_v54 = vpop.eup %4325  ;;  %4019 = vmatpush3.xpose.msk.msra.mxu1 %vm376_vm2, %v790_v49  ;;  %4020 = vmatprep.mubr.msk.f32.mxu1 %vm4566_vm1, %v4565_v14 }
 0x386   :  { %v555_v55 = vmul.f32 %v4326_v54, %v4322_v46  ;;  %4028 = vmatprep.subr.mxu1 %v4565_v14 }
 0x388   :  { %4006 = vmatmul.mubr.msk.f32.vlgmr.msra.gmra.mrb[2].mxu0 %vm376_vm2, %v555_v55  ;;  %4021 = vmatmul.mubr.msk.f32.vlgmr.msra.gmra.mrb[8].mxu1 %vm376_vm2, %v788_v56 }
 0x389   :  { %4014 = vmatpush3.xpose.msk.msra.mxu0 %vm376_vm2, %v712_v48  ;;  %4015 = vmatprep.mubr.msk.f32.mxu0 %vm4566_vm1, %v4565_v14 }
 0x38a   :  { %4023 = vmatprep.subr.mxu0 %v4565_v14  ;;  %4030 = vmatprep.mubr.msk.f32.mxu1 %vm4566_vm1, %v4565_v14 }
 0x38c   :  { %4016 = vmatmul.mubr.msk.f32.vlgmr.msra.gmra.mrb[4].mxu0 %vm376_vm2, %v710_v57 }
 0x38d   :  { %4025 = vmatprep.mubr.msk.f32.mxu0 %vm4566_vm1, %v4565_v14 }
 0x457   :  { %v4901_v58 = vpop.f32.mrb[6].mxu1 }
 0x458   :  { %v4012_v59 = vpop.f32.mrb[7].mxu1 }
 0x45b   :  { %v4903_v60 = vpop.f32.mrb[2].mxu0  ;;  %v861_v61 = vpop.f32.mrb[8].mxu1 }
 0x45c   :  { %v866_v62 = vmul.f32 0.35355338, %v861_v61  ;;  %v4007_v63 = vpop.f32.mrb[3].mxu0  ;;  %v4022_v0 = vpop.f32.mrb[9].mxu1 }
 0x45e   :  { %v868_v1 = vsel %vm375_vm3, -10000.0, %v866_v62 }
 0x45f   :  { %v783_v2 = vpop.f32.mrb[4].mxu0  ;;  %v872_v3 = vsel %vm376_vm2, %v868_v1, -inf }
 0x460   :  { %v865_v4 = vmul.f32 0.35355338, %v783_v2  ;;  %873 = vmax.xlane.f32.xlu1 %v872_v3  ;;  %v4017_v6 = vpop.f32.mrb[5].mxu0 }
 0x462   :  { %v867_v7 = vsel %vm375_vm3, -10000.0, %v865_v4 }
 0x463   :  { %v869_v8 = vsel %vm376_vm2, %v867_v7, -inf }
 0x464   :  { %870 = vmax.xlane.f32.xlu0 %v869_v8 }
 0x471   :  { %967 = vrot.lane.b32.xlu1 %v4835_v20, %s4569_s9 }
 0x475   :  { %1045 = vrot.lane.b32.xlu1 %v4837_v22, %s4570_s1 }
 0x479   :  { %1123 = vrot.lane.b32.xlu1 %v4835_v20, %s4570_s1 }
 0x47a   :  { %891 = vrot.lane.b32.xlu0 %v4837_v22, %s4569_s9 }
 0x47d   :  { %1121 = vrot.lane.b32.xlu1 %v4843_v23, %s4570_s1 }
 0x4ed   :  { %v874_v9 = vpop.xlane.xlu1 %873 }
 0x4ee   :  { %v876_v10 = vsub.f32 %v868_v1, %v874_v9 }
 0x4f0   :  { %v879_v11 = vmul.f32 1.442695, %v876_v10 }
 0x4f1   :  { %v968_v13 = vpop.permute.xlu1 %967  ;;  %v871_v15 = vpop.xlane.xlu0 %870 }
 0x4f2   :  { %4327 = vpow2.f32 %v879_v11  ;;  %v875_v16 = vsub.f32 %v867_v7, %v871_v15  ;;  %4029 = vmatpush3.msra.mxu1 %v968_v13 }
 0x4f3   :  { %4038 = vmatprep.subr.mxu1 %v4565_v14 }
 0x4f4   :  { %v877_v17 = vmul.f32 1.442695, %v875_v16 }
 0x4f5   :  { %v892_v18 = vpop.permute.xlu0 %891  ;;  %v1046_v30 = vpop.permute.xlu1 %1045 }
 0x4f6   :  { %4329 = vpow2.f32 %v877_v17  ;;  %4024 = vmatpush3.msra.mxu0 %v892_v18 }
 0x4f7   :  { %4033 = vmatprep.subr.mxu0 %v4565_v14 }
 0x4f9   :  { %v1124_v32 = vpop.permute.xlu1 %1123 }
 0x4fc   :  { %v4328_v19 = vpop.eup %4327 }
 0x4fd   :  { %v884_v21 = vsel %vm376_vm2, %v4328_v19, 0.0  ;;  %v1122_v36 = vpop.permute.xlu1 %1121 }
 0x4fe   :  { %885 = vadd.xlane.f32.xlu0 %v884_v21 }
 0x500   :  { %v4330_v25 = vpop.eup %4329 }
 0x501   :  { %v881_v27 = vsel %vm376_vm2, %v4330_v25, 0.0 }
 0x502   :  { %882 = vadd.xlane.f32.xlu0 %v881_v27 }
 0x518   :  { %1043 = vrot.lane.b32.xlu0 %v4848_v24, %s4570_s1 }
 0x58b   :  { %v886_v28 = vpop.xlane.xlu0 %885 }
 0x58c   :  { %4331 = vrcp.f32 %v886_v28 }
 0x58f   :  { %v883_v29 = vpop.xlane.xlu0 %882 }
 0x590   :  { %4333 = vrcp.f32 %v883_v29 }
 0x593   :  { %v1044_v37 = vpop.permute.xlu0 %1043 }
 0x596   :  { %v4332_v31 = vpop.eup %4331 }
 0x597   :  { %v890_v33 = vmul.f32 %v4332_v31, %v4328_v19 }
 0x599   :  { %4031 = vmatmul.mubr.msk.f32.vlgmr.msra.gmra.mrb[10].mxu1 %vm376_vm2, %v890_v33 }
 0x59a   :  { %v4334_v34 = vpop.eup %4333  ;;  %4039 = vmatpush3.xpose.msk.msra.mxu1 %vm376_vm2, %v1124_v32  ;;  %4040 = vmatprep.mubr.msk.f32.mxu1 %vm4566_vm1, %v4565_v14 }
 0x59b   :  { %v889_v35 = vmul.f32 %v4334_v34, %v4330_v25  ;;  %4048 = vmatprep.subr.mxu1 %v4565_v14 }
 0x59d   :  { %4026 = vmatmul.mubr.msk.f32.vlgmr.msra.gmra.mrb[6].mxu0 %vm376_vm2, %v889_v35  ;;  %4041 = vmatmul.mubr.msk.f32.vlgmr.msra.gmra.mrb[12].mxu1 %vm376_vm2, %v1122_v36 }
 0x59e   :  { %4034 = vmatpush3.xpose.msk.msra.mxu0 %vm376_vm2, %v1046_v30  ;;  %4035 = vmatprep.mubr.msk.f32.mxu0 %vm4566_vm1, %v4565_v14 }
 0x59f   :  { %4043 = vmatprep.subr.mxu0 %v4565_v14  ;;  %4050 = vmatprep.mubr.msk.f32.mxu1 %vm4566_vm1, %v4565_v14 }
 0x5a1   :  { %4036 = vmatmul.mubr.msk.f32.vlgmr.msra.gmra.mrb[8].mxu0 %vm376_vm2, %v1044_v37 }
 0x5a2   :  { %4045 = vmatprep.mubr.msk.f32.mxu0 %vm4566_vm1, %v4565_v14 }
 0x66c   :  { %v4943_v38 = vpop.f32.mrb[10].mxu1 }
 0x66d   :  { %v4032_v39 = vpop.f32.mrb[11].mxu1 }
 0x670   :  { %v4945_v40 = vpop.f32.mrb[6].mxu0  ;;  %v1195_v41 = vpop.f32.mrb[12].mxu1 }
 0x671   :  { %v1200_v42 = vmul.f32 0.35355338, %v1195_v41  ;;  %v4027_v43 = vpop.f32.mrb[7].mxu0  ;;  %v4042_v44 = vpop.f32.mrb[13].mxu1 }
 0x673   :  { %v1202_v45 = vsel %vm375_vm3, -10000.0, %v1200_v42 }
 0x674   :  { %v1117_v46 = vpop.f32.mrb[8].mxu0  ;;  %v1206_v47 = vsel %vm376_vm2, %v1202_v45, -inf }
 0x675   :  { %v1199_v48 = vmul.f32 0.35355338, %v1117_v46  ;;  %1207 = vmax.xlane.f32.xlu1 %v1206_v47  ;;  %v4037_v49 = vpop.f32.mrb[9].mxu0 }
 0x677   :  { %v1201_v50 = vsel %vm375_vm3, -10000.0, %v1199_v48  ;;  %v163_v48 = vld [vmem:[%s5381_s28 + $0x8] sm:$0xff] }
 0x678   :  { %v1203_v51 = vsel %vm376_vm2, %v1201_v50, -inf }
 0x679   :  { %1204 = vmax.xlane.f32.xlu0 %v1203_v51  ;;  %v165_v51 = vld [vmem:[%s5381_s28 + $0x18] sm:$0xff] }
 0x686   :  { %1301 = vrot.lane.b32.xlu1 %v4835_v20, %s4571_s22 }
 0x68a   :  { %1379 = vrot.lane.b32.xlu1 %v4837_v22, %s4572_s27 }
 0x68e   :  { %1457 = vrot.lane.b32.xlu1 %v4835_v20, %s4572_s27 }
 0x68f   :  { %1225 = vrot.lane.b32.xlu0 %v4837_v22, %s4571_s22 }
 0x692   :  { %1455 = vrot.lane.b32.xlu1 %v4843_v23, %s4572_s27 }
 0x702   :  { %v1208_v52 = vpop.xlane.xlu1 %1207 }
 0x703   :  { %v1210_v53 = vsub.f32 %v1202_v45, %v1208_v52 }
 0x705   :  { %v1213_v54 = vmul.f32 1.442695, %v1210_v53 }
 0x706   :  { %v1302_v55 = vpop.permute.xlu1 %1301  ;;  %v1205_v56 = vpop.xlane.xlu0 %1204 }
 0x707   :  { %4335 = vpow2.f32 %v1213_v54  ;;  %v1209_v57 = vsub.f32 %v1201_v50, %v1205_v56  ;;  %4049 = vmatpush3.msra.mxu1 %v1302_v55  ;;  %v164_v50 = vld [vmem:[%s5381_s28 + $0x10] sm:$0xff] }
 0x708   :  { %4058 = vmatprep.subr.mxu1 %v4565_v14  ;;  %v4247_v52 = vpack.c.bf16 %v165_v51, %v164_v50 }
 0x709   :  { %v1211_v59 = vmul.f32 1.442695, %v1209_v57 }
 0x70a   :  { %v1226_v61 = vpop.permute.xlu0 %1225  ;;  %v1380_v3 = vpop.permute.xlu1 %1379 }
 0x70b   :  { %4337 = vpow2.f32 %v1211_v59  ;;  %4044 = vmatpush3.msra.mxu0 %v1226_v61 }
 0x70c   :  { %4053 = vmatprep.subr.mxu0 %v4565_v14 }
 0x70e   :  { %v1458_v6 = vpop.permute.xlu1 %1457 }
 0x711   :  { %v4336_v62 = vpop.eup %4335 }
 0x712   :  { %v1218_v63 = vsel %vm376_vm2, %v4336_v62, 0.0 }
 0x713   :  { %1219 = vadd.xlane.f32.xlu0 %v1218_v63 }
 0x715   :  { %v4338_v23 = vpop.eup %4337 }
 0x716   :  { %v1215_v0 = vsel %vm376_vm2, %v4338_v23, 0.0 }
 0x717   :  { %1216 = vadd.xlane.f32.xlu0 %v1215_v0 }
 0x72d   :  { %1377 = vrot.lane.b32.xlu0 %v4848_v24, %s4572_s27  ;;  %v1456_v24 = vpop.permute.xlu1 %1455 }
 0x7a0   :  { %v1220_v1 = vpop.xlane.xlu0 %1219 }
 0x7a1   :  { %4339 = vrcp.f32 %v1220_v1 }
 0x7a4   :  { %v1217_v2 = vpop.xlane.xlu0 %1216 }
 0x7a5   :  { %4341 = vrcp.f32 %v1217_v2 }
 0x7a8   :  { %v1378_v10 = vpop.permute.xlu0 %1377 }
 0x7ab   :  { %v4340_v4 = vpop.eup %4339 }
 0x7ac   :  { %v1224_v7 = vmul.f32 %v4340_v4, %v4336_v62 }
 0x7ae   :  { %4051 = vmatmul.mubr.msk.f32.vlgmr.msra.gmra.mrb[14].mxu1 %vm376_vm2, %v1224_v7 }
 0x7af   :  { %v4342_v8 = vpop.eup %4341  ;;  %4059 = vmatpush3.xpose.msk.msra.mxu1 %vm376_vm2, %v1458_v6  ;;  %4060 = vmatprep.mubr.msk.f32.mxu1 %vm4566_vm1, %v4565_v14 }
 0x7b0   :  { %v1223_v9 = vmul.f32 %v4342_v8, %v4338_v23  ;;  %4068 = vmatprep.subr.mxu1 %v4565_v14 }
 0x7b2   :  { %4046 = vmatmul.mubr.msk.f32.vlgmr.msra.gmra.mrb[10].mxu0 %vm376_vm2, %v1223_v9  ;;  %4061 = vmatmul.mubr.msk.f32.vlgmr.msra.gmra.mrb[16].mxu1 %vm376_vm2, %v1456_v24 }
 0x7b3   :  { %4054 = vmatpush3.xpose.msk.msra.mxu0 %vm376_vm2, %v1380_v3  ;;  %4055 = vmatprep.mubr.msk.f32.mxu0 %vm4566_vm1, %v4565_v14 }
 0x7b4   :  { %4063 = vmatprep.subr.mxu0 %v4565_v14  ;;  %4070 = vmatprep.mubr.msk.f32.mxu1 %vm4566_vm1, %v4565_v14 }
 0x7b6   :  { %4056 = vmatmul.mubr.msk.f32.vlgmr.msra.gmra.mrb[12].mxu0 %vm376_vm2, %v1378_v10 }
 0x7b7   :  { %4065 = vmatprep.mubr.msk.f32.mxu0 %vm4566_vm1, %v4565_v14 }
 0x881   :  { %v1373_v11 = vpop.f32.mrb[14].mxu1 }
 0x882   :  { %v4052_v13 = vpop.f32.mrb[15].mxu1 }
 0x885   :  { %v1297_v15 = vpop.f32.mrb[10].mxu0  ;;  %v1529_v16 = vpop.f32.mrb[16].mxu1 }
 0x886   :  { %v1534_v17 = vmul.f32 0.35355338, %v1529_v16  ;;  %v4047_v18 = vpop.f32.mrb[11].mxu0  ;;  %v4062_v19 = vpop.f32.mrb[17].mxu1 }
 0x888   :  { %v1536_v21 = vsel %vm375_vm3, -10000.0, %v1534_v17 }
 0x889   :  { %v1451_v25 = vpop.f32.mrb[12].mxu0  ;;  %v1540_v27 = vsel %vm376_vm2, %v1536_v21, -inf }
 0x88a   :  { %v1533_v28 = vmul.f32 0.35355338, %v1451_v25  ;;  %1541 = vmax.xlane.f32.xlu1 %v1540_v27  ;;  %v4057_v29 = vpop.f32.mrb[13].mxu0 }
 0x88b   :  { %v175_v29 = vld [vmem:[%s5347_s13 + $0x8] sm:$0xff] }
 0x88c   :  { %v1535_v30 = vsel %vm375_vm3, -10000.0, %v1533_v28 }
 0x88d   :  { %v1537_v31 = vsel %vm376_vm2, %v1535_v30, -inf }
 0x88e   :  { %1538 = vmax.xlane.f32.xlu0 %v1537_v31  ;;  %v176_v31 = vld [vmem:[%s5347_s13 + $0x10] sm:$0xff] }
 0x89b   :  { %1635 = vrot.lane.b32.xlu1 %v4835_v20, %s4573_s4 }
 0x89f   :  { %1713 = vrot.lane.b32.xlu1 %v4945_v40, %s4574_s18 }
 0x8a3   :  { %1715 = vrot.lane.b32.xlu1 %v4943_v38, %s4574_s18 }
 0x8a7   :  { %1723 = vrot.lane.b32.xlu1 %v1373_v11, %s4575_s23 }
 0x917   :  { %v1542_v32 = vpop.xlane.xlu1 %1541 }
 0x918   :  { %v1544_v26 = vsub.f32 %v1536_v21, %v1542_v32  ;;  %v177_v32 = vld [vmem:[%s5347_s13 + $0x18] sm:$0xff] }
 0x91a   :  { %v1547_v33 = vmul.f32 1.442695, %v1544_v26  ;;  %v169_v26 = vld [vmem:[%s5345_s11] sm:$0xff] }
 0x91b   :  { %v1636_v34 = vpop.permute.xlu1 %1635  ;;  %v1539_v35 = vpop.xlane.xlu0 %1538 }
 0x91c   :  { %4343 = vpow2.f32 %v1547_v33  ;;  %v1543_v36 = vsub.f32 %v1535_v30, %v1539_v35  ;;  %4069 = vmatpush3.msra.mxu1 %v1636_v34  ;;  %v4263_v33 = vpack.c.bf16 %v177_v32, %v176_v31  ;;  %v170_v34 = vld [vmem:[%s5345_s11 + $0x8] sm:$0xff] }
 0x91d   :  { %v4251_v35 = vpack.c.bf16 %v170_v34, %v169_v26 }
 0x91e   :  { %v1545_v37 = vmul.f32 1.442695, %v1543_v36  ;;  %v204_v36 = vld [vmem:[%s5383_s29] sm:$0xff] }
 0x91f   :  { %v1714_v57 = vpop.permute.xlu1 %1713  ;;  %4252 = vmatprep.subr.bf16.mxu1 %v4251_v35 }
 0x920   :  { %4345 = vpow2.f32 %v1545_v37  ;;  %v1735_v63 = vsel %vm376_vm2, %v4903_v60, %v1714_v57  ;;  %v3807_v60 = vld [vmem:[%s5382_s8] ss:$0 sm:$0xff]  ;;  %v205_v37 = vld [vmem:[%s5383_s29 + $0x8] sm:$0xff]  ;;  %s5384_s8 = sld [smem:[#allocation28_spill]] }
 0x923   :  { %v1716_v59 = vpop.permute.xlu1 %1715 }
 0x924   :  { %v1736_v0 = vsel %vm376_vm2, %v4901_v58, %v1716_v59 }
 0x926   :  { %v4344_v20 = vpop.eup %4343 }
 0x927   :  { %v1552_v39 = vsel %vm376_vm2, %v4344_v20, 0.0  ;;  %v1724_v61 = vpop.permute.xlu1 %1723 }
 0x928   :  { %1553 = vadd.xlane.f32.xlu0 %v1552_v39  ;;  %v1739_v3 = vsel %vm1737_vm4, %v1736_v0, %v1724_v61  ;;  %v172_v39 = vld [vmem:[%s5345_s11 + $0x18] sm:$0xff] }
 0x92a   :  { %v4346_v40 = vpop.eup %4345 }
 0x92b   :  { %v1549_v38 = vsel %vm376_vm2, %v4346_v40, 0.0 }
 0x92c   :  { %1550 = vadd.xlane.f32.xlu0 %v1549_v38 }
 0x942   :  { %1559 = vrot.lane.b32.xlu0 %v4837_v22, %s4573_s4  ;;  %v162_v22 = vld [vmem:[%s5381_s28] sm:$0xff] }
 0x943   :  { %v4243_v49 = vpack.c.bf16 %v163_v48, %v162_v22  ;;  %v3811_v48 = vld [vmem:[%s5344_s10] ss:$0 sm:$0xff] }
 0x946   :  { %1721 = vrot.lane.b32.xlu0 %v1297_v15, %s4575_s23 }
 0x9b5   :  { %v1554_v41 = vpop.xlane.xlu0 %1553 }
 0x9b6   :  { %4347 = vrcp.f32 %v1554_v41 }
 0x9b9   :  { %v1551_v42 = vpop.xlane.xlu0 %1550 }
 0x9ba   :  { %4349 = vrcp.f32 %v1551_v42 }
 0x9bd   :  { %v1560_v43 = vpop.permute.xlu0 %1559 }
 0x9be   :  { %4064 = vmatpush3.msra.mxu0 %v1560_v43 }
 0x9bf   :  { %4244 = vmatprep.subr.bf16.mxu0 %v4243_v49 }
 0x9c0   :  { %v4348_v44 = vpop.eup %4347 }
 0x9c1   :  { %v1558_v45 = vmul.f32 %v4348_v44, %v4344_v20  ;;  %v1722_v62 = vpop.permute.xlu0 %1721  ;;  %v171_v20 = vld [vmem:[%s5345_s11 + $0x10] sm:$0xff] }
 0x9c2   :  { %v1738_v1 = vsel %vm1737_vm4, %v1735_v63, %v1722_v62  ;;  %v3812_v62 = vld [vmem:[%s5346_s12] ss:$0 sm:$0xff] }
 0x9c3   :  { %4071 = vmatmul.mubr.msk.f32.vlgmr.msra.gmra.mrb[18].mxu1 %vm376_vm2, %v1558_v45 }
 0x9c4   :  { %v4350_v46 = vpop.eup %4349  ;;  %4254 = vmatpush3.bf16.msra.mxu1 %v4251_v35 }
 0x9c5   :  { %v1557_v47 = vmul.f32 %v4350_v46, %v4346_v40  ;;  %v4255_v40 = vpack.c.bf16 %v172_v39, %v171_v20 }
 0x9c7   :  { %4066 = vmatmul.mubr.msk.f32.vlgmr.msra.gmra.mrb[14].mxu0 %vm376_vm2, %v1557_v47  ;;  %4256 = vmatprep.subr.bf16.mxu1 %v4255_v40  ;;  %v3810_v47 = vld [vmem:[%s5384_s8] ss:$0 sm:$0xff] }
 0x9c8   :  { %4246 = vmatpush3.bf16.msra.mxu0 %v4243_v49  ;;  %4258 = vmatpush3.bf16.msra.mxu1 %v4255_v40 }
 0x9c9   :  { %4248 = vmatprep.subr.bf16.mxu0 %v4247_v52  ;;  %4106 = vmatprep.subr.mxu1 %v4565_v14 }
 0x9cc   :  { %4250 = vmatpush3.bf16.msra.mxu0 %v4247_v52 }
 0xa96   :  { %v1707_v53 = vpop.f32.mrb[18].mxu1 }
 0xa97   :  { %1731 = vrot.lane.b32.xlu1 %v1707_v53, %s4576_s3  ;;  %v4072_v54 = vpop.f32.mrb[19].mxu1 }
 0xa9a   :  { %v1631_v55 = vpop.f32.mrb[14].mxu0 }
 0xa9b   :  { %1729 = vrot.lane.b32.xlu0 %v1631_v55, %s4576_s3  ;;  %v4067_v56 = vpop.f32.mrb[15].mxu0  ;;  %v3815_v55 = vld [vmem:[%s5348_s14] ss:$0 sm:$0xff] }
 0xb09   :  { %v1732_v23 = vpop.permute.xlu1 %1731 }
 0xb0a   :  { %v1742_v6 = vsel %vm1740_vm5, %v1739_v3, %v1732_v23 }
 0xb0d   :  { %v1730_v2 = vpop.permute.xlu0 %1729 }
 0xb0e   :  { %v1741_v4 = vsel %vm1740_vm5, %v1738_v1, %v1730_v2 }
 0xb0f   :  { %4081 = vmatprep.mubr.msk.f32.mxu0 %vm212_vm0, %v1741_v4 }
 0xb10   :  { %4082 = vmatmul.mubr.msk.f32.vlgmr.msra.gmra.mrb[16].mxu0 %vm212_vm0, %v1742_v6 }
 0xb11   :  { %4103 = vmatprep.mubr.msk.f32.mxu0 %vm212_vm0, %v204_v36 }
 0xbe3   :  { %v4083_v7 = vpop.f32.mrb[16].mxu0 }
 0xbe4   :  { %v1827_v8 = vadd.f32 %v4083_v7, %v3807_v60  ;;  %v1821_v58 = vpop.f32.mrb[17].mxu0 }
 0xbe5   :  { %v1822_v9 = vadd.f32 %v3807_v60, %v1821_v58 }
 0xbe6   :  { %v1831_v24 = vadd.f32 %v1827_v8, %v4815_v12 }
 0xbe7   :  { %v1830_v10 = vadd.f32 %v1822_v9, %v4796_v5  ;;  %v174_v5 = vld [vmem:[%s5347_s13] sm:$0xff] }
 0xbe8   :  { %v1835_v11 = vsel %vm212_vm0, %v1831_v24, 0.0  ;;  %v4259_v30 = vpack.c.bf16 %v175_v29, %v174_v5 }
 0xbe9   :  { %1836 = vadd.xlane.f32.xlu1 %v1835_v11  ;;  %v1832_v13 = vsel %vm212_vm0, %v1830_v10, 0.0 }
 0xbea   :  { %1833 = vadd.xlane.f32.xlu0 %v1832_v13  ;;  %4260 = vmatprep.subr.bf16.mxu0 %v4259_v30 }
 0xbeb   :  { %4262 = vmatpush3.bf16.msra.mxu0 %v4259_v30 }
 0xbec   :  { %4264 = vmatprep.subr.bf16.mxu0 %v4263_v33 }
 0xbef   :  { %4266 = vmatpush3.bf16.msra.mxu0 %v4263_v33 }
 0xbf0   :  { %4116 = vmatprep.subr.mxu0 %v4565_v14 }
 0xbf2   :  { %4104 = vmatmul.mubr.msk.f32.vlgmr.msra.gmra.mrb[18].mxu0 %vm212_vm0, %v205_v37 }
 0xbf3   :  { %4118 = vmatprep.mubr.msk.f32.mxu0 %vm4566_vm1, %v4565_v14 }
 0xc76   :  { %v1837_v15 = vpop.xlane.xlu1 %1836 }
 0xc77   :  { %v1840_v16 = vmul.f32 0.03125, %v1837_v15  ;;  %v1834_v17 = vpop.xlane.xlu0 %1833 }
 0xc78   :  { %v1839_v18 = vmul.f32 0.03125, %v1834_v17 }
 0xc79   :  { %v1842_v19 = vsub.f32 %v1831_v24, %v1840_v16 }
 0xc7a   :  { %v1841_v21 = vsub.f32 %v1830_v10, %v1839_v18 }
 0xc7b   :  { %v1844_v28 = vmul.f32 %v1842_v19, %v1842_v19 }
 0xc7c   :  { %v1843_v25 = vmul.f32 %v1841_v21, %v1841_v21 }
 0xc7d   :  { %v1848_v12 = vsel %vm212_vm0, %v1844_v28, 0.0 }
 0xc7e   :  { %v1845_v27 = vsel %vm212_vm0, %v1843_v25, 0.0 }
 0xc7f   :  { %1846 = vadd.xlane.f32.xlu0 %v1845_v27 }
 0xc83   :  { %1849 = vadd.xlane.f32.xlu0 %v1848_v12 }
 0xcc5   :  { %v4105_v56 = vpop.f32.mrb[18].mxu0 }
 0xcc6   :  { %v5093_v57 = vadd.f32 %v4105_v56, %v3815_v55  ;;  %v2040_v59 = vpop.f32.mrb[19].mxu0 }
 0xcc7   :  { %v5095_v61 = vadd.f32 %v3815_v55, %v2040_v59 }
 0xd0c   :  { %v1847_v38 = vpop.xlane.xlu0 %1846 }
 0xd0d   :  { %v1851_v41 = vmul.f32 0.03125, %v1847_v38 }
 0xd0f   :  { %v1853_v42 = vadd.f32 1e-05, %v1851_v41 }
 0xd10   :  { %v1850_v43 = vpop.xlane.xlu0 %1849 }
 0xd11   :  { %4351 = vrsqrt.f32 %v1853_v42  ;;  %v1852_v44 = vmul.f32 0.03125, %v1850_v43 }
 0xd13   :  { %v1854_v45 = vadd.f32 1e-05, %v1852_v44 }
 0xd15   :  { %4353 = vrsqrt.f32 %v1854_v45 }
 0xd1b   :  { %v4352_v46 = vpop.eup %4351 }
 0xd1c   :  { %v1857_v22 = vmul.f32 %v4352_v46, %v1841_v21 }
 0xd1e   :  { %v1865_v49 = vmul.f32 %v3810_v47, %v1857_v22 }
 0xd1f   :  { %v4354_v50 = vpop.eup %4353 }
 0xd20   :  { %v1858_v51 = vmul.f32 %v4354_v50, %v1842_v19  ;;  %v5080_v52 = vadd.f32 %v3811_v48, %v1865_v49 }
 0xd22   :  { %v1866_v53 = vmul.f32 %v3810_v47, %v1858_v51  ;;  %4092 = vmatprep.mubr.msk.f32.mxu1 %vm212_vm0, %v5080_v52 }
 0xd24   :  { %v5084_v54 = vadd.f32 %v3811_v48, %v1866_v53 }
 0xd26   :  { %4093 = vmatmul.mubr.msk.f32.vlgmr.msra.gmra.mrb[20].mxu1 %vm212_vm0, %v5084_v54 }
 0xd27   :  { %4108 = vmatprep.mubr.msk.f32.mxu1 %vm4566_vm1, %v4565_v14  ;;  %4107 = vmatpush3.xpose.msk.msra.mxu1 %vm376_vm2, %v5095_v61 }
 0xd28   :  { %4111 = vmatprep.subr.mxu1 %v4565_v14 }
 0xdf9   :  { %v4094_v63 = vpop.f32.mrb[20].mxu1 }
 0xdfa   :  { %v1953_v23 = vpop.f32.mrb[21].mxu1  ;;  %v5111_v1 = vadd.f32 %v4094_v63, %v3812_v62 }
 0xdfb   :  { %v5103_v0 = vadd.f32 %v3812_v62, %v1953_v23 }
 0xdfd   :  { %4109 = vmatmul.mubr.msk.f32.vlgmr.msra.gmra.mrb[22].mxu1 %vm376_vm2, %v5103_v0 }
 0xdfe   :  { %4112 = vmatpush3.xpose.msk.msra.mxu1 %vm376_vm2, %v5093_v57  ;;  %4113 = vmatprep.mubr.msk.f32.mxu1 %vm4566_vm1, %v4565_v14 }
 0xdff   :  { %4121 = vmatprep.subr.mxu1 %v4565_v14 }
 0xe01   :  { %4114 = vmatmul.mubr.msk.f32.vlgmr.msra.gmra.mrb[24].mxu1 %vm376_vm2, %v5111_v1 }
 0xe02   :  { %4123 = vmatprep.mubr.msk.f32.mxu1 %vm4566_vm1, %v4565_v14 }
 0xed0   :  { %v2121_v2 = vpop.f32.mrb[22].mxu1 }
 0xed1   :  { %v2201_v3 = vmul.f32 0.35355338, %v2121_v2  ;;  %v4110_v4 = vpop.f32.mrb[23].mxu1 }
 0xed3   :  { %v2203_v6 = vsel %vm376_vm2, %v2201_v3, -inf }
 0xed4   :  { %2204 = vmax.xlane.f32.xlu0 %v2203_v6  ;;  %v2197_v60 = vpop.f32.mrb[24].mxu1 }
 0xed5   :  { %v2202_v7 = vmul.f32 0.35355338, %v2197_v60  ;;  %v4115_v8 = vpop.f32.mrb[25].mxu1 }
 0xed7   :  { %v2206_v58 = vsel %vm376_vm2, %v2202_v7, -inf }
 0xed8   :  { %2207 = vmax.xlane.f32.xlu1 %v2206_v58 }
 0xee9   :  { %2301 = vrot.lane.b32.xlu1 %v5093_v57, %s4567_s30 }
 0xeea   :  { %2225 = vrot.lane.b32.xlu0 %v5095_v61, %s4567_s30 }
 0xeed   :  { %2379 = vrot.lane.b32.xlu1 %v5095_v61, %s4568_s7 }
 0xef1   :  { %2457 = vrot.lane.b32.xlu1 %v5093_v57, %s4568_s7 }
 0xf61   :  { %v2205_v9 = vpop.xlane.xlu0 %2204 }
 0xf62   :  { %v2209_v24 = vsub.f32 %v2201_v3, %v2205_v9 }
 0xf64   :  { %v2211_v10 = vmul.f32 1.442695, %v2209_v24 }
 0xf65   :  { %v2226_v11 = vpop.permute.xlu0 %2225  ;;  %v2208_v13 = vpop.xlane.xlu1 %2207 }
 0xf66   :  { %4355 = vpow2.f32 %v2211_v10  ;;  %v2210_v15 = vsub.f32 %v2202_v7, %v2208_v13  ;;  %4117 = vmatpush3.msra.mxu0 %v2226_v11 }
 0xf67   :  { %4126 = vmatprep.subr.mxu0 %v4565_v14 }
 0xf68   :  { %v2213_v16 = vmul.f32 1.442695, %v2210_v15 }
 0xf69   :  { %v2302_v17 = vpop.permute.xlu1 %2301 }
 0xf6a   :  { %4357 = vpow2.f32 %v2213_v16  ;;  %4122 = vmatpush3.msra.mxu1 %v2302_v17 }
 0xf6b   :  { %4131 = vmatprep.subr.mxu1 %v4565_v14 }
 0xf6d   :  { %v2380_v27 = vpop.permute.xlu1 %2379 }
 0xf70   :  { %v4356_v18 = vpop.eup %4355 }
 0xf71   :  { %v2215_v19 = vsel %vm376_vm2, %v4356_v18, 0.0  ;;  %v2458_v28 = vpop.permute.xlu1 %2457 }
 0xf72   :  { %2216 = vadd.xlane.f32.xlu0 %v2215_v19 }
 0xf74   :  { %v4358_v21 = vpop.eup %4357 }
 0xf75   :  { %v2218_v25 = vsel %vm376_vm2, %v4358_v21, 0.0 }
 0xf76   :  { %2219 = vadd.xlane.f32.xlu1 %v2218_v25 }
 0xf87   :  { %2455 = vrot.lane.b32.xlu1 %v5111_v1, %s4568_s7 }
 0xf88   :  { %2377 = vrot.lane.b32.xlu0 %v5103_v0, %s4568_s7 }
 0xfff   :  { %v2217_v12 = vpop.xlane.xlu0 %2216 }
0x1000   :  { %4359 = vrcp.f32 %v2217_v12 }
0x1003   :  { %v2220_v5 = vpop.xlane.xlu1 %2219  ;;  %v2378_v26 = vpop.permute.xlu0 %2377 }
0x1004   :  { %4361 = vrcp.f32 %v2220_v5 }
0x1007   :  { %v2456_v33 = vpop.permute.xlu1 %2455 }
0x100a   :  { %v4360_v29 = vpop.eup %4359 }
0x100b   :  { %v2223_v30 = vmul.f32 %v4360_v29, %v4356_v18 }
0x100d   :  { %4119 = vmatmul.mubr.msk.f32.vlgmr.msra.gmra.mrb[20].mxu0 %vm376_vm2, %v2223_v30 }
0x100e   :  { %v4362_v31 = vpop.eup %4361  ;;  %4127 = vmatpush3.xpose.msk.msra.mxu0 %vm376_vm2, %v2380_v27  ;;  %4128 = vmatprep.mubr.msk.f32.mxu0 %vm4566_vm1, %v4565_v14 }
0x100f   :  { %v2224_v32 = vmul.f32 %v4362_v31, %v4358_v21  ;;  %4136 = vmatprep.subr.mxu0 %v4565_v14 }
0x1011   :  { %4124 = vmatmul.mubr.msk.f32.vlgmr.msra.gmra.mrb[26].mxu1 %vm376_vm2, %v2224_v32  ;;  %4129 = vmatmul.mubr.msk.f32.vlgmr.msra.gmra.mrb[22].mxu0 %vm376_vm2, %v2378_v26 }
0x1012   :  { %4132 = vmatpush3.xpose.msk.msra.mxu1 %vm376_vm2, %v2458_v28  ;;  %4133 = vmatprep.mubr.msk.f32.mxu1 %vm4566_vm1, %v4565_v14 }
0x1013   :  { %4141 = vmatprep.subr.mxu1 %v4565_v14  ;;  %4138 = vmatprep.mubr.msk.f32.mxu0 %vm4566_vm1, %v4565_v14 }
0x1015   :  { %4134 = vmatmul.mubr.msk.f32.vlgmr.msra.gmra.mrb[28].mxu1 %vm376_vm2, %v2456_v33 }
0x1016   :  { %4143 = vmatprep.mubr.msk.f32.mxu1 %vm4566_vm1, %v4565_v14 }
0x10e0   :  { %v5152_v34 = vpop.f32.mrb[20].mxu0 }
0x10e1   :  { %v4120_v35 = vpop.f32.mrb[21].mxu0 }
0x10e4   :  { %v5154_v36 = vpop.f32.mrb[26].mxu1  ;;  %v2451_v37 = vpop.f32.mrb[22].mxu0 }
0x10e5   :  { %v2533_v20 = vmul.f32 0.35355338, %v2451_v37  ;;  %v4125_v39 = vpop.f32.mrb[27].mxu1  ;;  %v4130_v40 = vpop.f32.mrb[23].mxu0 }
0x10e7   :  { %v2535_v38 = vsel %vm376_vm2, %v2533_v20, -inf }
0x10e8   :  { %2536 = vmax.xlane.f32.xlu0 %v2535_v38  ;;  %v2529_v41 = vpop.f32.mrb[28].mxu1 }
0x10e9   :  { %v2534_v42 = vmul.f32 0.35355338, %v2529_v41  ;;  %v4135_v43 = vpop.f32.mrb[29].mxu1 }
0x10eb   :  { %v2538_v44 = vsel %vm376_vm2, %v2534_v42, -inf }
0x10ec   :  { %2539 = vmax.xlane.f32.xlu1 %v2538_v44 }
0x10fd   :  { %2633 = vrot.lane.b32.xlu1 %v5093_v57, %s4569_s9 }
0x10fe   :  { %2557 = vrot.lane.b32.xlu0 %v5095_v61, %s4569_s9 }
0x1101   :  { %2711 = vrot.lane.b32.xlu1 %v5095_v61, %s4570_s1 }
0x1105   :  { %2789 = vrot.lane.b32.xlu1 %v5093_v57, %s4570_s1 }
0x1109   :  { %2787 = vrot.lane.b32.xlu1 %v5111_v1, %s4570_s1 }
0x1175   :  { %v2537_v45 = vpop.xlane.xlu0 %2536 }
0x1176   :  { %v2541_v46 = vsub.f32 %v2533_v20, %v2537_v45 }
0x1178   :  { %v2543_v47 = vmul.f32 1.442695, %v2541_v46 }
0x1179   :  { %v2558_v22 = vpop.permute.xlu0 %2557  ;;  %v2540_v48 = vpop.xlane.xlu1 %2539 }
0x117a   :  { %4363 = vpow2.f32 %v2543_v47  ;;  %v2542_v49 = vsub.f32 %v2534_v42, %v2540_v48  ;;  %4137 = vmatpush3.msra.mxu0 %v2558_v22 }
0x117b   :  { %4146 = vmatprep.subr.mxu0 %v4565_v14 }
0x117c   :  { %v2545_v50 = vmul.f32 1.442695, %v2542_v49 }
0x117d   :  { %v2634_v51 = vpop.permute.xlu1 %2633 }
0x117e   :  { %4365 = vpow2.f32 %v2545_v50  ;;  %4142 = vmatpush3.msra.mxu1 %v2634_v51 }
0x117f   :  { %4151 = vmatprep.subr.mxu1 %v4565_v14 }
0x1181   :  { %v2712_v23 = vpop.permute.xlu1 %2711 }
0x1184   :  { %v4364_v53 = vpop.eup %4363 }
0x1185   :  { %v2547_v55 = vsel %vm376_vm2, %v4364_v53, 0.0  ;;  %v2790_v6 = vpop.permute.xlu1 %2789 }
0x1186   :  { %2548 = vadd.xlane.f32.xlu0 %v2547_v55 }
0x1188   :  { %v4366_v56 = vpop.eup %4365 }
0x1189   :  { %v2550_v59 = vsel %vm376_vm2, %v4366_v56, 0.0  ;;  %v2788_v8 = vpop.permute.xlu1 %2787 }
0x118a   :  { %2551 = vadd.xlane.f32.xlu0 %v2550_v59 }
0x11a0   :  { %2709 = vrot.lane.b32.xlu0 %v5103_v0, %s4570_s1 }
0x1213   :  { %v2549_v62 = vpop.xlane.xlu0 %2548 }
0x1214   :  { %4367 = vrcp.f32 %v2549_v62 }
0x1217   :  { %v2552_v63 = vpop.xlane.xlu0 %2551 }
0x1218   :  { %4369 = vrcp.f32 %v2552_v63 }
0x121b   :  { %v2710_v7 = vpop.permute.xlu0 %2709 }
0x121e   :  { %v4368_v2 = vpop.eup %4367 }
0x121f   :  { %v2555_v3 = vmul.f32 %v4368_v2, %v4364_v53 }
0x1221   :  { %4139 = vmatmul.mubr.msk.f32.vlgmr.msra.gmra.mrb[24].mxu0 %vm376_vm2, %v2555_v3 }
0x1222   :  { %v4370_v4 = vpop.eup %4369  ;;  %4147 = vmatpush3.xpose.msk.msra.mxu0 %vm376_vm2, %v2712_v23  ;;  %4148 = vmatprep.mubr.msk.f32.mxu0 %vm4566_vm1, %v4565_v14 }
0x1223   :  { %v2556_v60 = vmul.f32 %v4370_v4, %v4366_v56  ;;  %4156 = vmatprep.subr.mxu0 %v4565_v14 }
0x1225   :  { %4144 = vmatmul.mubr.msk.f32.vlgmr.msra.gmra.mrb[30].mxu1 %vm376_vm2, %v2556_v60  ;;  %4149 = vmatmul.mubr.msk.f32.vlgmr.msra.gmra.mrb[26].mxu0 %vm376_vm2, %v2710_v7 }
0x1226   :  { %4152 = vmatpush3.xpose.msk.msra.mxu1 %vm376_vm2, %v2790_v6  ;;  %4153 = vmatprep.mubr.msk.f32.mxu1 %vm4566_vm1, %v4565_v14 }
0x1227   :  { %4161 = vmatprep.subr.mxu1 %v4565_v14  ;;  %4158 = vmatprep.mubr.msk.f32.mxu0 %vm4566_vm1, %v4565_v14 }
0x1229   :  { %4154 = vmatmul.mubr.msk.f32.vlgmr.msra.gmra.mrb[32].mxu1 %vm376_vm2, %v2788_v8 }
0x122a   :  { %4163 = vmatprep.mubr.msk.f32.mxu1 %vm4566_vm1, %v4565_v14 }
0x12f4   :  { %v5190_v58 = vpop.f32.mrb[24].mxu0 }
0x12f5   :  { %v4140_v9 = vpop.f32.mrb[25].mxu0 }
0x12f8   :  { %v5192_v24 = vpop.f32.mrb[30].mxu1  ;;  %v2783_v10 = vpop.f32.mrb[26].mxu0 }
0x12f9   :  { %v2865_v11 = vmul.f32 0.35355338, %v2783_v10  ;;  %v4145_v13 = vpop.f32.mrb[31].mxu1  ;;  %v4150_v15 = vpop.f32.mrb[27].mxu0 }
0x12fa   :  { %v180_v13 = vld [vmem:[%s5349_s15 + $0x8] sm:$0xff] }
0x12fb   :  { %v2867_v16 = vsel %vm376_vm2, %v2865_v11, -inf }
0x12fc   :  { %2868 = vmax.xlane.f32.xlu0 %v2867_v16  ;;  %v2861_v17 = vpop.f32.mrb[32].mxu1  ;;  %v181_v16 = vld [vmem:[%s5349_s15 + $0x10] sm:$0xff] }
0x12fd   :  { %v2866_v18 = vmul.f32 0.35355338, %v2861_v17  ;;  %v4155_v19 = vpop.f32.mrb[33].mxu1  ;;  %v182_v17 = vld [vmem:[%s5349_s15 + $0x18] sm:$0xff] }
0x12ff   :  { %v2870_v21 = vsel %vm376_vm2, %v2866_v18, -inf }
0x1300   :  { %2871 = vmax.xlane.f32.xlu1 %v2870_v21 }
0x1311   :  { %2965 = vrot.lane.b32.xlu1 %v5093_v57, %s4571_s22 }
0x1312   :  { %2889 = vrot.lane.b32.xlu0 %v5095_v61, %s4571_s22 }
0x1315   :  { %3043 = vrot.lane.b32.xlu1 %v5095_v61, %s4572_s27 }
0x1319   :  { %3121 = vrot.lane.b32.xlu1 %v5093_v57, %s4572_s27 }
0x131d   :  { %3119 = vrot.lane.b32.xlu1 %v5111_v1, %s4572_s27 }
0x1389   :  { %v2869_v25 = vpop.xlane.xlu0 %2868 }
0x138a   :  { %v2873_v27 = vsub.f32 %v2865_v11, %v2869_v25 }
0x138c   :  { %v2875_v28 = vmul.f32 1.442695, %v2873_v27 }
0x138d   :  { %v2890_v12 = vpop.permute.xlu0 %2889  ;;  %v2872_v5 = vpop.xlane.xlu1 %2871 }
0x138e   :  { %4371 = vpow2.f32 %v2875_v28  ;;  %v2874_v29 = vsub.f32 %v2866_v18, %v2872_v5  ;;  %4157 = vmatpush3.msra.mxu0 %v2890_v12  ;;  %v4271_v18 = vpack.c.bf16 %v182_v17, %v181_v16 }
0x138f   :  { %4166 = vmatprep.subr.mxu0 %v4565_v14 }
0x1390   :  { %v2877_v30 = vmul.f32 1.442695, %v2874_v29 }
0x1391   :  { %v2966_v31 = vpop.permute.xlu1 %2965 }
0x1392   :  { %4373 = vpow2.f32 %v2877_v30  ;;  %4162 = vmatpush3.msra.mxu1 %v2966_v31 }
0x1393   :  { %4171 = vmatprep.subr.mxu1 %v4565_v14 }
0x1395   :  { %v3044_v20 = vpop.permute.xlu1 %3043 }
0x1398   :  { %v4372_v32 = vpop.eup %4371 }
0x1399   :  { %v2879_v26 = vsel %vm376_vm2, %v4372_v32, 0.0  ;;  %v3122_v41 = vpop.permute.xlu1 %3121 }
0x139a   :  { %2880 = vadd.xlane.f32.xlu0 %v2879_v26 }
0x139c   :  { %v4374_v1 = vpop.eup %4373 }
0x139d   :  { %v2882_v33 = vsel %vm376_vm2, %v4374_v1, 0.0  ;;  %v3120_v43 = vpop.permute.xlu1 %3119 }
0x139e   :  { %2883 = vadd.xlane.f32.xlu0 %v2882_v33 }
0x13b4   :  { %3041 = vrot.lane.b32.xlu0 %v5103_v0, %s4572_s27 }
0x1427   :  { %v2881_v35 = vpop.xlane.xlu0 %2880 }
0x1428   :  { %4375 = vrcp.f32 %v2881_v35 }
0x142b   :  { %v2884_v37 = vpop.xlane.xlu0 %2883 }
0x142c   :  { %4377 = vrcp.f32 %v2884_v37 }
0x142f   :  { %v3042_v0 = vpop.permute.xlu0 %3041 }
0x1432   :  { %v4376_v39 = vpop.eup %4375 }
0x1433   :  { %v2887_v40 = vmul.f32 %v4376_v39, %v4372_v32 }
0x1435   :  { %4159 = vmatmul.mubr.msk.f32.vlgmr.msra.gmra.mrb[28].mxu0 %vm376_vm2, %v2887_v40 }
0x1436   :  { %v4378_v38 = vpop.eup %4377  ;;  %4167 = vmatpush3.xpose.msk.msra.mxu0 %vm376_vm2, %v3044_v20  ;;  %4168 = vmatprep.mubr.msk.f32.mxu0 %vm4566_vm1, %v4565_v14 }
0x1437   :  { %v2888_v42 = vmul.f32 %v4378_v38, %v4374_v1  ;;  %4176 = vmatprep.subr.mxu0 %v4565_v14 }
0x1439   :  { %4164 = vmatmul.mubr.msk.f32.vlgmr.msra.gmra.mrb[34].mxu1 %vm376_vm2, %v2888_v42  ;;  %4169 = vmatmul.mubr.msk.f32.vlgmr.msra.gmra.mrb[30].mxu0 %vm376_vm2, %v3042_v0 }
0x143a   :  { %4172 = vmatpush3.xpose.msk.msra.mxu1 %vm376_vm2, %v3122_v41  ;;  %4173 = vmatprep.mubr.msk.f32.mxu1 %vm4566_vm1, %v4565_v14 }
0x143b   :  { %4181 = vmatprep.subr.mxu1 %v4565_v14  ;;  %4178 = vmatprep.mubr.msk.f32.mxu0 %vm4566_vm1, %v4565_v14 }
0x143d   :  { %4174 = vmatmul.mubr.msk.f32.vlgmr.msra.gmra.mrb[36].mxu1 %vm376_vm2, %v3120_v43 }
0x143e   :  { %4183 = vmatprep.mubr.msk.f32.mxu1 %vm4566_vm1, %v4565_v14 }
0x1508   :  { %v2961_v44 = vpop.f32.mrb[28].mxu0 }
0x1509   :  { %v4160_v45 = vpop.f32.mrb[29].mxu0 }
0x150c   :  { %v3037_v46 = vpop.f32.mrb[34].mxu1  ;;  %v3115_v47 = vpop.f32.mrb[30].mxu0 }
0x150d   :  { %v3197_v22 = vmul.f32 0.35355338, %v3115_v47  ;;  %v4165_v48 = vpop.f32.mrb[35].mxu1  ;;  %v4170_v49 = vpop.f32.mrb[31].mxu0 }
0x150f   :  { %v3199_v50 = vsel %vm376_vm2, %v3197_v22, -inf }
0x1510   :  { %3200 = vmax.xlane.f32.xlu0 %v3199_v50  ;;  %v3193_v51 = vpop.f32.mrb[36].mxu1 }
0x1511   :  { %v3198_v53 = vmul.f32 0.35355338, %v3193_v51  ;;  %v4175_v55 = vpop.f32.mrb[37].mxu1  ;;  %v187_v51 = vld [vmem:[%s5353_s19 + $0x8] sm:$0xff] }
0x1512   :  { %v188_v55 = vld [vmem:[%s5353_s19 + $0x10] sm:$0xff] }
0x1513   :  { %v3202_v56 = vsel %vm376_vm2, %v3198_v53, -inf }
0x1514   :  { %3203 = vmax.xlane.f32.xlu1 %v3202_v56  ;;  %v189_v56 = vld [vmem:[%s5353_s19 + $0x18] sm:$0xff] }
0x1525   :  { %3297 = vrot.lane.b32.xlu1 %v5093_v57, %s4573_s4 }
0x1529   :  { %3375 = vrot.lane.b32.xlu1 %v5190_v58, %s4574_s18 }
0x152d   :  { %3377 = vrot.lane.b32.xlu1 %v5192_v24, %s4574_s18 }
0x1531   :  { %3385 = vrot.lane.b32.xlu1 %v3037_v46, %s4575_s23 }
0x159d   :  { %v3201_v14 = vpop.xlane.xlu0 %3200 }
0x159e   :  { %v3205_v59 = vsub.f32 %v3197_v22, %v3201_v14  ;;  %v4279_v14 = vpack.c.bf16 %v189_v56, %v188_v55  ;;  %v3853_v55 = vld [vmem:[#allocation10] ss:$0 sm:$0xff] }
0x15a0   :  { %v3207_v62 = vmul.f32 1.442695, %v3205_v59  ;;  %v191_v59 = vld [vmem:[%s5355_s21] sm:$0xff] }
0x15a1   :  { %v3204_v63 = vpop.xlane.xlu1 %3203 }
0x15a2   :  { %4379 = vpow2.f32 %v3207_v62  ;;  %v3206_v23 = vsub.f32 %v3198_v53, %v3204_v63  ;;  %v192_v62 = vld [vmem:[%s5355_s21 + $0x8] sm:$0xff]  ;;  %v193_v63 = vld [vmem:[%s5355_s21 + $0x10] sm:$0xff] }
0x15a4   :  { %v3209_v2 = vmul.f32 1.442695, %v3206_v23  ;;  %v4283_v23 = vpack.c.bf16 %v192_v62, %v191_v59  ;;  %v3854_v62 = vld [vmem:[#allocation11] ss:$0 sm:$0xff] }
0x15a5   :  { %v3298_v3 = vpop.permute.xlu1 %3297 }
0x15a6   :  { %4381 = vpow2.f32 %v3209_v2  ;;  %4182 = vmatpush3.msra.mxu1 %v3298_v3  ;;  %v194_v2 = vld [vmem:[%s5355_s21 + $0x18] sm:$0xff] }
0x15a7   :  { %v4287_v3 = vpack.c.bf16 %v194_v2, %v193_v63 }
0x15a9   :  { %v3376_v28 = vpop.permute.xlu1 %3375 }
0x15aa   :  { %v3397_v29 = vsel %vm376_vm2, %v5152_v34, %v3376_v28  ;;  %v3842_v34 = vld [vmem:[%s5350_s16] ss:$0 sm:$0xff] }
0x15ac   :  { %v4380_v4 = vpop.eup %4379 }
0x15ad   :  { %v3211_v57 = vsel %vm376_vm2, %v4380_v4, 0.0  ;;  %v3378_v12 = vpop.permute.xlu1 %3377 }
0x15ae   :  { %3212 = vadd.xlane.f32.xlu0 %v3211_v57  ;;  %v3398_v1 = vsel %vm376_vm2, %v5154_v36, %v3378_v12  ;;  %v196_v57 = vld [vmem:[%s5355_s21 + $0x28] sm:$0xff]  ;;  %v3847_v12 = vld [vmem:[#allocation7] ss:$0 sm:$0xff] }
0x15b0   :  { %v4382_v6 = vpop.eup %4381 }
0x15b1   :  { %v3214_v60 = vsel %vm376_vm2, %v4382_v6, 0.0  ;;  %v3386_v30 = vpop.permute.xlu1 %3385 }
0x15b2   :  { %3215 = vadd.xlane.f32.xlu0 %v3214_v60  ;;  %v3400_v33 = vsel %vm1737_vm4, %v3398_v1, %v3386_v30  ;;  %v3850_v1 = vld [vmem:[#allocation8] ss:$0 sm:$0xff] }
0x15c8   :  { %3221 = vrot.lane.b32.xlu0 %v5095_v61, %s4573_s4  ;;  %v179_v61 = vld [vmem:[%s5349_s15] sm:$0xff] }
0x15c9   :  { %v4267_v15 = vpack.c.bf16 %v180_v13, %v179_v61  ;;  %v3846_v13 = vld [vmem:[#allocation5] ss:$0 sm:$0xff] }
0x15cc   :  { %3383 = vrot.lane.b32.xlu0 %v2961_v44, %s4575_s23 }
0x163b   :  { %v3213_v7 = vpop.xlane.xlu0 %3212 }
0x163c   :  { %4383 = vrcp.f32 %v3213_v7 }
0x163f   :  { %v3216_v8 = vpop.xlane.xlu0 %3215 }
0x1640   :  { %4385 = vrcp.f32 %v3216_v8 }
0x1643   :  { %v3222_v58 = vpop.permute.xlu0 %3221 }
0x1644   :  { %4177 = vmatpush3.msra.mxu0 %v3222_v58 }
0x1645   :  { %4268 = vmatprep.subr.bf16.mxu0 %v4267_v15 }
0x1646   :  { %v4384_v9 = vpop.eup %4383 }
0x1647   :  { %v3219_v24 = vmul.f32 %v4384_v9, %v4380_v4  ;;  %v3384_v5 = vpop.permute.xlu0 %3383  ;;  %v195_v4 = vld [vmem:[%s5355_s21 + $0x20] sm:$0xff] }
0x1648   :  { %v3399_v31 = vsel %vm1737_vm4, %v3397_v29, %v3384_v5 }
0x1649   :  { %4179 = vmatmul.mubr.msk.f32.vlgmr.msra.gmra.mrb[32].mxu0 %vm376_vm2, %v3219_v24 }
0x164a   :  { %v4386_v10 = vpop.eup %4385  ;;  %4270 = vmatpush3.bf16.msra.mxu0 %v4267_v15 }
0x164b   :  { %v3220_v11 = vmul.f32 %v4386_v10, %v4382_v6  ;;  %4272 = vmatprep.subr.bf16.mxu0 %v4271_v18  ;;  %v4291_v6 = vpack.c.bf16 %v196_v57, %v195_v4 }
0x164d   :  { %4184 = vmatmul.mubr.msk.f32.vlgmr.msra.gmra.mrb[38].mxu1 %vm376_vm2, %v3220_v11  ;;  %v3845_v11 = vld [vmem:[#allocation2] ss:$0 sm:$0xff] }
0x164e   :  { %4274 = vmatpush3.bf16.msra.mxu0 %v4271_v18 }
0x164f   :  { %4284 = vmatprep.subr.bf16.mxu0 %v4283_v23 }
0x171c   :  { %v3293_v19 = vpop.f32.mrb[32].mxu0 }
0x171d   :  { %3391 = vrot.lane.b32.xlu0 %v3293_v19, %s4576_s3  ;;  %v4180_v21 = vpop.f32.mrb[33].mxu0 }
0x1720   :  { %v3369_v25 = vpop.f32.mrb[38].mxu1 }
0x1721   :  { %3393 = vrot.lane.b32.xlu1 %v3369_v25, %s4576_s3  ;;  %v4185_v27 = vpop.f32.mrb[39].mxu1  ;;  %v197_v25 = vld [vmem:[%s5355_s21 + $0x30] sm:$0xff] }
0x1722   :  { %v198_v27 = vld [vmem:[%s5355_s21 + $0x38] sm:$0xff]  ;;  %s4577_s21 = smov [#allocation13]  }
0x1723   :  { %v4295_v28 = vpack.c.bf16 %v198_v27, %v197_v25  ;;  %s3762_s22 = sshll.u32 %s4577_s21, 4  ;;  %s3763_s22 = int_to_ptr.vmem [resolvable:$true] %s3762_s22 }
0x1724   :  { %s4527_s27 = scalar_lea.vmem %s3763_s22, 256  ;;  %p4532_p7 = scmp.lt.s32.totalorder %s3763_s22, %s3763_s22 }
0x1725   :  { %p4528_p6 = scmp.ne.s32.totalorder %s3763_s22, %s4527_s27  ;;  %p4533_p8 = scmp.lt.s32.totalorder %s4527_s27, %s4527_s27 }
0x1727   :  { %p4534_p9 = por %p4533_p8, %p4532_p7 }
0x1729   :  { %p4535_p10 = pnand %p4534_p9, %p4528_p6 }
0x178f   :  { %v3392_v32 = vpop.permute.xlu0 %3391 }
0x1790   :  { %v3401_v26 = vsel %vm1740_vm5, %v3399_v31, %v3392_v32 }
0x1791   :  { %4194 = vmatprep.mubr.msk.f32.mxu0 %vm212_vm0, %v3401_v26 }
0x1793   :  { %v3394_v35 = vpop.permute.xlu1 %3393 }
0x1794   :  { %v3402_v37 = vsel %vm1740_vm5, %v3400_v33, %v3394_v35 }
0x1795   :  { %4195 = vmatmul.mubr.msk.f32.vlgmr.msra.gmra.mrb[34].mxu0 %vm212_vm0, %v3402_v37 }
0x1796   :  { %4286 = vmatpush3.bf16.msra.mxu0 %v4283_v23 }
0x1797   :  { %4288 = vmatprep.subr.bf16.mxu0 %v4287_v3 }
0x179a   :  { %4290 = vmatpush3.bf16.msra.mxu0 %v4287_v3 }
0x179b   :  { %4292 = vmatprep.subr.bf16.mxu0 %v4291_v6 }
0x179e   :  { %4294 = vmatpush3.bf16.msra.mxu0 %v4291_v6 }
0x179f   :  { %4296 = vmatprep.subr.bf16.mxu0 %v4295_v28 }
0x17a2   :  { %4298 = vmatpush3.bf16.msra.mxu0 %v4295_v28 }
0x1868   :  { %v4196_v20 = vpop.f32.mrb[34].mxu0 }
0x1869   :  { %v3487_v39 = vadd.f32 %v4196_v20, %v3842_v34  ;;  %v3481_v40 = vpop.f32.mrb[35].mxu0 }
0x186a   :  { %v3482_v38 = vadd.f32 %v3842_v34, %v3481_v40 }
0x186b   :  { %v3491_v41 = vadd.f32 %v3487_v39, %v5084_v54 }
0x186c   :  { %v3490_v42 = vadd.f32 %v3482_v38, %v5080_v52  ;;  %v186_v52 = vld [vmem:[%s5353_s19] sm:$0xff] }
0x186d   :  { %v3495_v36 = vsel %vm212_vm0, %v3491_v41, 0.0  ;;  %v4275_v53 = vpack.c.bf16 %v187_v51, %v186_v52 }
0x186e   :  { %3496 = vadd.xlane.f32.xlu1 %v3495_v36  ;;  %v3492_v0 = vsel %vm212_vm0, %v3490_v42, 0.0 }
0x186f   :  { %3493 = vadd.xlane.f32.xlu0 %v3492_v0  ;;  %4276 = vmatprep.subr.bf16.mxu1 %v4275_v53 }
0x1870   :  { %4278 = vmatpush3.bf16.msra.mxu1 %v4275_v53 }
0x1871   :  { %4280 = vmatprep.subr.bf16.mxu1 %v4279_v14 }
0x1874   :  { %4282 = vmatpush3.bf16.msra.mxu1 %v4279_v14 }
0x18fb   :  { %v3497_v43 = vpop.xlane.xlu1 %3496 }
0x18fc   :  { %v3499_v44 = vmul.f32 0.03125, %v3497_v43  ;;  %v3494_v45 = vpop.xlane.xlu0 %3493 }
0x18fd   :  { %v3498_v46 = vmul.f32 0.03125, %v3494_v45 }
0x18fe   :  { %v3501_v47 = vsub.f32 %v3491_v41, %v3499_v44 }
0x18ff   :  { %v3500_v22 = vsub.f32 %v3490_v42, %v3498_v46 }
0x1900   :  { %v3503_v50 = vmul.f32 %v3501_v47, %v3501_v47 }
0x1901   :  { %v3502_v48 = vmul.f32 %v3500_v22, %v3500_v22 }
0x1902   :  { %v3507_v54 = vsel %vm212_vm0, %v3503_v50, 0.0 }
0x1903   :  { %v3504_v49 = vsel %vm212_vm0, %v3502_v48, 0.0 }
0x1904   :  { %3505 = vadd.xlane.f32.xlu0 %v3504_v49 }
0x1908   :  { %3508 = vadd.xlane.f32.xlu0 %v3507_v54 }
0x1991   :  { %v3506_v60 = vpop.xlane.xlu0 %3505 }
0x1992   :  { %v3510_v7 = vmul.f32 0.03125, %v3506_v60 }
0x1994   :  { %v3512_v8 = vadd.f32 1e-05, %v3510_v7 }
0x1995   :  { %v3509_v58 = vpop.xlane.xlu0 %3508 }
0x1996   :  { %4387 = vrsqrt.f32 %v3512_v8  ;;  %v3511_v9 = vmul.f32 0.03125, %v3509_v58 }
0x1998   :  { %v3513_v24 = vadd.f32 1e-05, %v3511_v9 }
0x199a   :  { %4389 = vrsqrt.f32 %v3513_v24 }
0x19a0   :  { %v4388_v10 = vpop.eup %4387 }
0x19a1   :  { %v3516_v61 = vmul.f32 %v4388_v10, %v3500_v22 }
0x19a3   :  { %v3524_v15 = vmul.f32 %v3845_v11, %v3516_v61 }
0x19a4   :  { %v4390_v16 = vpop.eup %4389 }
0x19a5   :  { %v3517_v17 = vmul.f32 %v4390_v16, %v3501_v47  ;;  %v3532_v18 = vadd.f32 %v3846_v13, %v3524_v15 }
0x19a7   :  { %v3525_v19 = vmul.f32 %v3845_v11, %v3517_v17  ;;  %4205 = vmatprep.mubr.msk.f32.mxu1 %vm212_vm0, %v3532_v18 }
0x19a9   :  { %v3533_v21 = vadd.f32 %v3846_v13, %v3525_v19 }
0x19ab   :  { %4206 = vmatmul.mubr.msk.f32.vlgmr.msra.gmra.mrb[40].mxu1 %vm212_vm0, %v3533_v21 }
0x1a7e   :  { %v4207_v5 = vpop.f32.mrb[40].mxu1 }
0x1a7f   :  { %v3618_v29 = vadd.f32 %v4207_v5, %v3847_v12  ;;  %v3612_v30 = vpop.f32.mrb[41].mxu1 }
0x1a80   :  { %v3613_v31 = vadd.f32 %v3847_v12, %v3612_v30 }
0x1a81   :  { %v3622_v26 = vmax.f32 %v3618_v29, 0.0 }
0x1a82   :  { %v3621_v32 = vmax.f32 %v3613_v31, 0.0 }
0x1a84   :  { %4224 = vmatprep.mubr.msk.f32.mxu0 %vm3629_vm6, %v3621_v32 }
0x1a85   :  { %4225 = vmatmul.mubr.msk.f32.vlgmr.msra.gmra.mrb[36].mxu0 %vm3629_vm6, %v3622_v26 }
0x1b58   :  { %v4226_v33 = vpop.f32.mrb[36].mxu0 }
0x1b59   :  { %v3708_v35 = vadd.f32 %v4226_v33, %v3850_v1  ;;  %v3702_v37 = vpop.f32.mrb[37].mxu0 }
0x1b5a   :  { %v3703_v34 = vadd.f32 %v3850_v1, %v3702_v37 }
0x1b5b   :  { %v3712_v20 = vadd.f32 %v3708_v35, %v3533_v21 }
0x1b5c   :  { %v3711_v39 = vadd.f32 %v3703_v34, %v3532_v18 }
0x1b5d   :  { %v3716_v40 = vsel %vm212_vm0, %v3712_v20, 0.0 }
0x1b5e   :  { %3717 = vadd.xlane.f32.xlu1 %v3716_v40  ;;  %v3713_v38 = vsel %vm212_vm0, %v3711_v39, 0.0 }
0x1b5f   :  { %3714 = vadd.xlane.f32.xlu0 %v3713_v38 }
0x1beb   :  { %v3718_v41 = vpop.xlane.xlu1 %3717 }
0x1bec   :  { %v3720_v42 = vmul.f32 0.03125, %v3718_v41  ;;  %v3715_v36 = vpop.xlane.xlu0 %3714 }
0x1bed   :  { %v3719_v0 = vmul.f32 0.03125, %v3715_v36 }
0x1bee   :  { %v3722_v43 = vsub.f32 %v3712_v20, %v3720_v42 }
0x1bef   :  { %v3721_v44 = vsub.f32 %v3711_v39, %v3719_v0 }
0x1bf0   :  { %v3724_v45 = vmul.f32 %v3722_v43, %v3722_v43 }
0x1bf1   :  { %v3723_v46 = vmul.f32 %v3721_v44, %v3721_v44 }
0x1bf2   :  { %v3728_v47 = vsel %vm212_vm0, %v3724_v45, 0.0 }
0x1bf3   :  { %3729 = vadd.xlane.f32.xlu1 %v3728_v47  ;;  %v3725_v22 = vsel %vm212_vm0, %v3723_v46, 0.0 }
0x1bf4   :  { %3726 = vadd.xlane.f32.xlu0 %v3725_v22 }
0x1c80   :  { %v3730_v48 = vpop.xlane.xlu1 %3729 }
0x1c81   :  { %v3732_v49 = vmul.f32 0.03125, %v3730_v48  ;;  %v3727_v50 = vpop.xlane.xlu0 %3726 }
0x1c82   :  { %v3731_v54 = vmul.f32 0.03125, %v3727_v50 }
0x1c83   :  { %v3734_v52 = vadd.f32 1e-05, %v3732_v49 }
0x1c84   :  { %v3733_v51 = vadd.f32 1e-05, %v3731_v54 }
0x1c85   :  { %4391 = vrsqrt.f32 %v3734_v52 }
0x1c86   :  { %4393 = vrsqrt.f32 %v3733_v51 }
0x1c8f   :  { %v4392_v53 = vpop.eup %4391 }
0x1c90   :  { %v4394_v56 = vpop.eup %4393  ;;  %v3738_v14 = vmul.f32 %v4392_v53, %v3722_v43 }
0x1c91   :  { %v3737_v59 = vmul.f32 %v4394_v56, %v3721_v44 }
0x1c92   :  { %v3746_v63 = vmul.f32 %v3853_v55, %v3738_v14 }
0x1c93   :  { %v3745_v23 = vmul.f32 %v3853_v55, %v3737_v59 }
0x1c94   :  { %v3754_v2 = vadd.f32 %v3854_v62, %v3746_v63 }
0x1c95   :  { %v3753_v3 = vadd.f32 %v3854_v62, %v3745_v23 }
0x1c96   :  { %3756 = vst.msk [vmem:[#allocation13 + $0x8] sm:$0xff] %vm212_vm0, %v3754_v2 }
0x1c97   :  { %3755 = vst.msk [vmem:[#allocation13] sm:$0xff] %vm212_vm0, %v3753_v3 }
0x1c98   :  { %4538 = shalt.err (!%p4535_p10)
}
0x1c99   :  { %s4539_s16 = scalar_lea.hbm %s5359_s25, 256 }
0x1c9a   :  { %p4540_p11 = scmp.ne.s32.totalorder %s5359_s25, %s4539_s16  ;;  %p4543_p12 = scmp.lt.u32.totalorder %s4539_s16, %s5359_s25 }
0x1c9c   :  { %p4545_p13 = pnand %p4543_p12, %p4540_p11 }
0x1c9e   :  { %4548 = shalt.err (!%p4545_p13)
}
0x1c9f   :  { %s4578_s6 = smov 128  }
0x1ca0   :  { %3768 = dma.vmem_to_hbm [thread:$0]  %s3763_s22, 256, %s5359_s25, [#allocation4], %s4578_s6, %s4578_s6, %s4574_s18  }
0x1ca1   :  { %4557 = dma.done.wait [#allocation4], 256  }
0x1ca2   :  { %4558 = vsyncadd [#allocation4], 4294967040 }
0x1ca3   :  { %3772 = vsyncpa [#allocation3], 1 }
0x1ca4   :  { %3773 = vsyncpa [#allocation6], 1 }
0x1ca5   :  { %3774 = vsyncpa [#allocation9], 1 }
0x1ca6   :  { %3775 = vsyncpa [#allocation12], 1 }
0x1ca7   :  { %3776 = vsyncpa [#allocation4], 1 }

// kernel: decoder_forward.2
= control target key start
LH: loop header
LB: loop body
LE: loop exit
PB: predicated region body
PF: predicated region fallthrough
CT: control target
= control target key end

     0   :  { %vm141_vm0 = vcmask 261120   ;;  %v4300_v14 = vmov 0.0   ;;  %vm4301_vm1 = vmmov 0   ;;  %vm305_vm2 = vcmask 64512   ;;  %s4303_s29 = smov 120   ;;  %s5048_s26 = smov 80   ;;  %s5006_s3 = inlined_call_operand.vmem [shape: f32[32,32], index: 3, kind: input, shape index: {}]   ;;  %s5007_s0 = inlined_call_operand.vmem [shape: f32[2,8,32], index: 0, kind: input, shape index: {}]   ;;  %s5008_s5 = inlined_call_operand.vmem [shape: f32[32,64], index: 5, kind: input, shape index: {}]   ;;  %s5009_s6 = inlined_call_operand.vmem [shape: f32[1,64], index: 6, kind: input, shape index: {}]   ;;  %s5010_s4 = inlined_call_operand.vmem [shape: f32[1,32], index: 4, kind: input, shape index: {}]   ;;  %s5011_s2 = inlined_call_operand.vmem [shape: f32[8,8], index: 2, kind: input, shape index: {}]   ;;  %s5012_s7 = inlined_call_operand.vmem [shape: f32[32,32], index: 7, kind: input, shape index: {}]   ;;  %s5013_s8 = inlined_call_operand.vmem [shape: f32[1,32], index: 8, kind: input, shape index: {}]   ;;  %s5014_s13 = inlined_call_operand.vmem [shape: f32[32,64], index: 13, kind: input, shape index: {}]   ;;  %s5015_s11 = inlined_call_operand.vmem [shape: f32[32,32], index: 11, kind: input, shape index: {}]   ;;  %s5016_s1 = inlined_call_operand.vmem [shape: f32[2,8,32], index: 1, kind: input, shape index: {}]   ;;  %s5017_s9 = inlined_call_operand.vmem [shape: f32[1,32], index: 9, kind: input, shape index: {}]   ;;  %s5018_s10 = inlined_call_operand.vmem [shape: f32[1,32], index: 10, kind: input, shape index: {}]   ;;  %s5019_s14 = inlined_call_operand.vmem [shape: f32[1,64], index: 14, kind: input, shape index: {}]   ;;  %s5020_s12 = inlined_call_operand.vmem [shape: f32[1,32], index: 12, kind: input, shape index: {}]   ;;  %s5021_s15 = inlined_call_operand.vmem [shape: f32[32,32], index: 15, kind: input, shape index: {}]   ;;  %s5022_s16 = inlined_call_operand.vmem [shape: f32[1,32], index: 16, kind: input, shape index: {}]   ;;  %s5023_s19 = inlined_call_operand.vmem [shape: f32[32,64], index: 19, kind: input, shape index: {}]   ;;  %s5024_s21 = inlined_call_operand.vmem [shape: f32[64,32], index: 21, kind: input, shape index: {}]   ;;  %s5025_s17 = inlined_call_operand.vmem [shape: f32[1,32], index: 17, kind: input, shape index: {}]   ;;  %s5026_s18 = inlined_call_operand.vmem [shape: f32[1,32], index: 18, kind: input, shape index: {}]   ;;  %s5027_s20 = inlined_call_operand.vmem [shape: f32[1,64], index: 20, kind: input, shape index: {}]   ;;  %s5028_s22 = inlined_call_operand.vmem [shape: f32[1,32], index: 22, kind: input, shape index: {}]   ;;  %s5029_s23 = inlined_call_operand.vmem [shape: f32[1,32], index: 23, kind: input, shape index: {}]   ;;  %s5030_s24 = inlined_call_operand.vmem [shape: f32[1,32], index: 24, kind: input, shape index: {}]   ;;  %s5031_s25 = inlined_call_operand.vmem [shape: f32[2,8,32], index: 25, kind: output, shape index: {}]  }
   0x1   :  { %5052 = sst [smem:[#allocation2_spill]] %s5006_s3  ;;  %3906 = vmatprep.subr.mxu0 %v4300_v14  ;;  %3908 = vmatprep.mubr.msk.f32.mxu0 %vm4301_vm1, %v4300_v14  ;;  %s5040_s27 = smov 8   ;;  %vm1666_vm4 = vcmask 130048   ;;  %vm1669_vm5 = vcmask 195584   ;;  %vm3558_vm6 = vcmask 523264  }
   0x2   :  { %5053 = sst [smem:[#allocation3_spill]] %s5007_s0  ;;  %s5046_s0 = smov 104  }
   0x3   :  { %5054 = sst [smem:[#allocation4_spill]] %s5008_s5  ;;  %s5063_s28 = sld [smem:[#allocation3_spill]] }
   0x4   :  { %5055 = sst [smem:[#allocation5_spill]] %s5009_s6  ;;  %s5064_s3 = sld [smem:[#allocation4_spill]] }
   0x5   :  { %5056 = sst [smem:[#allocation6_spill]] %s5010_s4  ;;  %s5065_s4 = sld [smem:[#allocation5_spill]] }
   0x6   :  { %5057 = sst [smem:[#allocation7_spill]] %s5011_s2  ;;  %s5066_s2 = sld [smem:[#allocation6_spill]] }
   0x7   :  { %5058 = sst [smem:[#allocation8_spill]] %s5012_s7  ;;  %s5062_s7 = sld [smem:[#allocation2_spill]] }
   0x8   :  { %5059 = sst [smem:[#allocation9_spill]] %s5013_s8  ;;  %s5067_s30 = sld [smem:[#allocation7_spill]] }
   0x9   :  { %5060 = sst [smem:[#allocation10_spill]] %s5014_s13  ;;  %v4457_v5 = vld [vmem:[%s5063_s28] sm:$0xff]  ;;  %v4476_v12 = vld [vmem:[%s5063_s28 + $0x8] sm:$0xff]  ;;  %s4304_s8 = smov 88  }
   0xa   :  { %5061 = sst [smem:[#allocation11_spill]] %s5015_s11  ;;  %3892 = vmatprep.mubr.msk.f32.mxu1 %vm141_vm0, %v4457_v5  ;;  %v86_v7 = vld [vmem:[%s5064_s3] sm:$0xff]  ;;  %v87_v8 = vld [vmem:[%s5064_s3 + $0x8] sm:$0xff]  ;;  %v88_v10 = vld [vmem:[%s5064_s3 + $0x10] sm:$0xff]  ;;  %s5050_s6 = smov 112  }
   0xb   :  { %v4148_v9 = vpack.c.bf16 %v87_v8, %v86_v7  ;;  %v89_v11 = vld [vmem:[%s5064_s3 + $0x18] sm:$0xff]  ;;  %v3693_v17 = vld [vmem:[%s5065_s4] ss:$0 sm:$0xff]  ;;  %s4302_s3 = smov 96   ;;  %s5042_s13 = smov 72  }
   0xc   :  { %v4152_v13 = vpack.c.bf16 %v89_v11, %v88_v10  ;;  %v3690_v19 = vld [vmem:[%s5066_s2] ss:$0 sm:$0xff]  ;;  %s5038_s4 = smov 16   ;;  %s5068_s2 = sld [smem:[#allocation8_spill]] }
   0xd   :  { %v81_v0 = vld [vmem:[%s5062_s7] sm:$0xff]  ;;  %v82_v1 = vld [vmem:[%s5062_s7 + $0x8] sm:$0xff]  ;;  %v83_v2 = vld [vmem:[%s5062_s7 + $0x10] sm:$0xff]  ;;  %s5044_s28 = smov 24   ;;  %s5070_s5 = sld [smem:[#allocation10_spill]] }
   0xe   :  { %v4140_v3 = vpack.c.bf16 %v82_v1, %v81_v0  ;;  %v84_v4 = vld [vmem:[%s5062_s7 + $0x18] sm:$0xff]  ;;  %v4528_v26 = vld [vmem:[%s5067_s30] sm:$0xff]  ;;  %s5077_s30 = smov 16  }
   0xf   :  { %v4144_v6 = vpack.c.bf16 %v84_v4, %v83_v2  ;;  %vm304_vm3 = vcmp.gt.f32.partialorder %v4528_v26, 0.0 }
  0x10   :  { %4141 = vmatprep.subr.bf16.mxu1 %v4140_v3 }
  0x11   :  { %4143 = vmatpush3.bf16.msra.mxu1 %v4140_v3 }
  0x12   :  { %4145 = vmatprep.subr.bf16.mxu1 %v4144_v6 }
  0x15   :  { %4147 = vmatpush3.bf16.msra.mxu1 %v4144_v6 }
  0x16   :  { %4149 = vmatprep.subr.bf16.mxu1 %v4148_v9 }
  0x18   :  { %3893 = vmatmul.mubr.msk.f32.vlgmr.msra.gmra.mrb[0].mxu1 %vm141_vm0, %v4476_v12 }
  0x19   :  { %4151 = vmatpush3.bf16.msra.mxu1 %v4148_v9  ;;  %3903 = vmatprep.mubr.msk.f32.mxu1 %vm141_vm0, %v4457_v5 }
  0x1a   :  { %4153 = vmatprep.subr.bf16.mxu1 %v4152_v13 }
  0x1d   :  { %4155 = vmatpush3.bf16.msra.mxu1 %v4152_v13 }
  0x1e   :  { %3911 = vmatprep.subr.mxu1 %v4300_v14 }
  0x20   :  { %3904 = vmatmul.mubr.msk.f32.vlgmr.msra.gmra.mrb[2].mxu1 %vm141_vm0, %v4476_v12 }
  0x21   :  { %3913 = vmatprep.mubr.msk.f32.mxu1 %vm4301_vm1, %v4300_v14 }
  0xeb   :  { %v3894_v15 = vpop.f32.mrb[0].mxu1 }
  0xec   :  { %v214_v16 = vpop.f32.mrb[1].mxu1  ;;  %v4504_v23 = vadd.f32 %v3894_v15, %v3690_v19 }
  0xed   :  { %v4509_v24 = vadd.f32 %v3690_v19, %v214_v16 }
  0xf3   :  { %v3905_v18 = vpop.f32.mrb[2].mxu1 }
  0xf4   :  { %v4496_v20 = vadd.f32 %v3905_v18, %v3693_v17  ;;  %v295_v21 = vpop.f32.mrb[3].mxu1 }
  0xf5   :  { %v4498_v22 = vadd.f32 %v3693_v17, %v295_v21 }
  0xf6   :  { %562 = vrot.lane.b32.xlu1 %v4496_v20, %s4302_s3  ;;  %3912 = vmatpush3.xpose.msk.msra.mxu1 %vm305_vm2, %v4496_v20 }
  0xf7   :  { %3907 = vmatpush3.xpose.msk.msra.mxu0 %vm305_vm2, %v4498_v22  ;;  %3921 = vmatprep.subr.mxu1 %v4300_v14 }
  0xf8   :  { %3916 = vmatprep.subr.mxu0 %v4300_v14 }
  0xf9   :  { %3914 = vmatmul.mubr.msk.f32.vlgmr.msra.gmra.mrb[4].mxu1 %vm305_vm2, %v4504_v23 }
  0xfa   :  { %640 = vrot.lane.b32.xlu1 %v4498_v22, %s4303_s29  ;;  %3909 = vmatmul.mubr.msk.f32.vlgmr.msra.gmra.mrb[0].mxu0 %vm305_vm2, %v4509_v24 }
  0xfb   :  { %3923 = vmatprep.mubr.msk.f32.mxu1 %vm4301_vm1, %v4300_v14  ;;  %3918 = vmatprep.mubr.msk.f32.mxu0 %vm4301_vm1, %v4300_v14 }
  0xfe   :  { %718 = vrot.lane.b32.xlu1 %v4496_v20, %s4303_s29 }
 0x168   :  { %v563_v25 = vpop.permute.xlu1 %562 }
 0x169   :  { %3922 = vmatpush3.msra.mxu1 %v563_v25 }
 0x16a   :  { %3931 = vmatprep.subr.mxu1 %v4300_v14 }
 0x16c   :  { %v641_v48 = vpop.permute.xlu1 %640 }
 0x170   :  { %v719_v49 = vpop.permute.xlu1 %718 }
 0x1cc   :  { %v454_v27 = vpop.f32.mrb[4].mxu1 }
 0x1cd   :  { %v378_v28 = vpop.f32.mrb[0].mxu0  ;;  %v3915_v29 = vpop.f32.mrb[5].mxu1  ;;  %v459_v30 = vmul.f32 0.35355338, %v454_v27 }
 0x1ce   :  { %v458_v31 = vmul.f32 0.35355338, %v378_v28  ;;  %v3910_v32 = vpop.f32.mrb[1].mxu0 }
 0x1cf   :  { %v463_v35 = vsel %vm304_vm3, -10000.0, %v459_v30 }
 0x1d0   :  { %v462_v33 = vsel %vm304_vm3, -10000.0, %v458_v31  ;;  %v467_v36 = vsel %vm305_vm2, %v463_v35, -inf }
 0x1d1   :  { %v464_v34 = vsel %vm305_vm2, %v462_v33, -inf }
 0x1d2   :  { %465 = vmax.xlane.f32.xlu0 %v464_v34 }
 0x1d6   :  { %468 = vmax.xlane.f32.xlu0 %v467_v36 }
 0x1ec   :  { %486 = vrot.lane.b32.xlu0 %v4498_v22, %s4302_s3 }
 0x1f0   :  { %638 = vrot.lane.b32.xlu0 %v4509_v24, %s4303_s29 }
 0x25f   :  { %v466_v37 = vpop.xlane.xlu0 %465 }
 0x260   :  { %v470_v38 = vsub.f32 %v462_v33, %v466_v37 }
 0x262   :  { %v472_v41 = vmul.f32 1.442695, %v470_v38 }
 0x263   :  { %v469_v39 = vpop.xlane.xlu0 %468 }
 0x264   :  { %v471_v40 = vsub.f32 %v463_v35, %v469_v39 }
 0x266   :  { %v474_v42 = vmul.f32 1.442695, %v471_v40 }
 0x267   :  { %v487_v43 = vpop.permute.xlu0 %486 }
 0x268   :  { %4224 = vpow2.f32 %v474_v42  ;;  %3917 = vmatpush3.msra.mxu0 %v487_v43 }
 0x269   :  { %3926 = vmatprep.subr.mxu0 %v4300_v14  ;;  %4226 = vpow2.f32 %v472_v41 }
 0x26b   :  { %v639_v57 = vpop.permute.xlu0 %638 }
 0x272   :  { %v4225_v44 = vpop.eup %4224 }
 0x273   :  { %v479_v45 = vsel %vm305_vm2, %v4225_v44, 0.0  ;;  %v4227_v46 = vpop.eup %4226 }
 0x274   :  { %480 = vadd.xlane.f32.xlu1 %v479_v45  ;;  %v476_v47 = vsel %vm305_vm2, %v4227_v46, 0.0 }
 0x278   :  { %477 = vadd.xlane.f32.xlu1 %v476_v47 }
 0x289   :  { %716 = vrot.lane.b32.xlu1 %v4504_v23, %s4303_s29 }
 0x301   :  { %v481_v50 = vpop.xlane.xlu1 %480 }
 0x302   :  { %4228 = vrcp.f32 %v481_v50 }
 0x305   :  { %v478_v51 = vpop.xlane.xlu1 %477 }
 0x306   :  { %4230 = vrcp.f32 %v478_v51 }
 0x309   :  { %v717_v56 = vpop.permute.xlu1 %716 }
 0x30c   :  { %v4229_v52 = vpop.eup %4228 }
 0x30d   :  { %v485_v53 = vmul.f32 %v4229_v52, %v4225_v44 }
 0x30f   :  { %3924 = vmatmul.mubr.msk.f32.vlgmr.msra.gmra.mrb[6].mxu1 %vm305_vm2, %v485_v53 }
 0x310   :  { %v4231_v54 = vpop.eup %4230  ;;  %3932 = vmatpush3.xpose.msk.msra.mxu1 %vm305_vm2, %v719_v49  ;;  %3933 = vmatprep.mubr.msk.f32.mxu1 %vm4301_vm1, %v4300_v14 }
 0x311   :  { %v484_v55 = vmul.f32 %v4231_v54, %v4227_v46  ;;  %3941 = vmatprep.subr.mxu1 %v4300_v14 }
 0x313   :  { %3919 = vmatmul.mubr.msk.f32.vlgmr.msra.gmra.mrb[2].mxu0 %vm305_vm2, %v484_v55  ;;  %3934 = vmatmul.mubr.msk.f32.vlgmr.msra.gmra.mrb[8].mxu1 %vm305_vm2, %v717_v56 }
 0x314   :  { %3927 = vmatpush3.xpose.msk.msra.mxu0 %vm305_vm2, %v641_v48  ;;  %3928 = vmatprep.mubr.msk.f32.mxu0 %vm4301_vm1, %v4300_v14 }
 0x315   :  { %3936 = vmatprep.subr.mxu0 %v4300_v14  ;;  %3943 = vmatprep.mubr.msk.f32.mxu1 %vm4301_vm1, %v4300_v14 }
 0x317   :  { %3929 = vmatmul.mubr.msk.f32.vlgmr.msra.gmra.mrb[4].mxu0 %vm305_vm2, %v639_v57 }
 0x318   :  { %3938 = vmatprep.mubr.msk.f32.mxu0 %vm4301_vm1, %v4300_v14 }
 0x3e2   :  { %v4562_v58 = vpop.f32.mrb[6].mxu1 }
 0x3e3   :  { %v3925_v59 = vpop.f32.mrb[7].mxu1 }
 0x3e6   :  { %v4564_v60 = vpop.f32.mrb[2].mxu0  ;;  %v790_v61 = vpop.f32.mrb[8].mxu1 }
 0x3e7   :  { %v795_v62 = vmul.f32 0.35355338, %v790_v61  ;;  %v3920_v63 = vpop.f32.mrb[3].mxu0  ;;  %v3935_v0 = vpop.f32.mrb[9].mxu1 }
 0x3e9   :  { %v797_v1 = vsel %vm304_vm3, -10000.0, %v795_v62 }
 0x3ea   :  { %v712_v2 = vpop.f32.mrb[4].mxu0  ;;  %v801_v3 = vsel %vm305_vm2, %v797_v1, -inf }
 0x3eb   :  { %v794_v4 = vmul.f32 0.35355338, %v712_v2  ;;  %802 = vmax.xlane.f32.xlu1 %v801_v3  ;;  %v3930_v6 = vpop.f32.mrb[5].mxu0 }
 0x3ed   :  { %v796_v7 = vsel %vm304_vm3, -10000.0, %v794_v4 }
 0x3ee   :  { %v798_v8 = vsel %vm305_vm2, %v796_v7, -inf }
 0x3ef   :  { %799 = vmax.xlane.f32.xlu0 %v798_v8 }
 0x3fc   :  { %896 = vrot.lane.b32.xlu1 %v4496_v20, %s4304_s8 }
 0x400   :  { %974 = vrot.lane.b32.xlu1 %v4498_v22, %s5050_s6 }
 0x404   :  { %1052 = vrot.lane.b32.xlu1 %v4496_v20, %s5050_s6 }
 0x405   :  { %820 = vrot.lane.b32.xlu0 %v4498_v22, %s4304_s8 }
 0x408   :  { %1050 = vrot.lane.b32.xlu1 %v4504_v23, %s5050_s6 }
 0x478   :  { %v803_v9 = vpop.xlane.xlu1 %802 }
 0x479   :  { %v805_v10 = vsub.f32 %v797_v1, %v803_v9 }
 0x47b   :  { %v808_v11 = vmul.f32 1.442695, %v805_v10 }
 0x47c   :  { %v897_v13 = vpop.permute.xlu1 %896  ;;  %v800_v15 = vpop.xlane.xlu0 %799 }
 0x47d   :  { %4232 = vpow2.f32 %v808_v11  ;;  %v804_v16 = vsub.f32 %v796_v7, %v800_v15  ;;  %3942 = vmatpush3.msra.mxu1 %v897_v13 }
 0x47e   :  { %3951 = vmatprep.subr.mxu1 %v4300_v14 }
 0x47f   :  { %v806_v17 = vmul.f32 1.442695, %v804_v16 }
 0x480   :  { %v821_v18 = vpop.permute.xlu0 %820  ;;  %v975_v30 = vpop.permute.xlu1 %974 }
 0x481   :  { %4234 = vpow2.f32 %v806_v17  ;;  %3937 = vmatpush3.msra.mxu0 %v821_v18 }
 0x482   :  { %3946 = vmatprep.subr.mxu0 %v4300_v14 }
 0x484   :  { %v1053_v32 = vpop.permute.xlu1 %1052 }
 0x487   :  { %v4233_v19 = vpop.eup %4232 }
 0x488   :  { %v813_v21 = vsel %vm305_vm2, %v4233_v19, 0.0  ;;  %v1051_v36 = vpop.permute.xlu1 %1050 }
 0x489   :  { %814 = vadd.xlane.f32.xlu0 %v813_v21 }
 0x48b   :  { %v4235_v25 = vpop.eup %4234 }
 0x48c   :  { %v810_v27 = vsel %vm305_vm2, %v4235_v25, 0.0 }
 0x48d   :  { %811 = vadd.xlane.f32.xlu0 %v810_v27 }
 0x4a3   :  { %972 = vrot.lane.b32.xlu0 %v4509_v24, %s5050_s6  ;;  %s5071_s6 = sld [smem:[#allocation11_spill]] }
 0x516   :  { %v815_v28 = vpop.xlane.xlu0 %814 }
 0x517   :  { %4236 = vrcp.f32 %v815_v28 }
 0x51a   :  { %v812_v29 = vpop.xlane.xlu0 %811 }
 0x51b   :  { %4238 = vrcp.f32 %v812_v29 }
 0x51e   :  { %v973_v37 = vpop.permute.xlu0 %972 }
 0x521   :  { %v4237_v31 = vpop.eup %4236 }
 0x522   :  { %v819_v33 = vmul.f32 %v4237_v31, %v4233_v19 }
 0x524   :  { %3944 = vmatmul.mubr.msk.f32.vlgmr.msra.gmra.mrb[10].mxu1 %vm305_vm2, %v819_v33 }
 0x525   :  { %v4239_v34 = vpop.eup %4238  ;;  %3952 = vmatpush3.xpose.msk.msra.mxu1 %vm305_vm2, %v1053_v32  ;;  %3953 = vmatprep.mubr.msk.f32.mxu1 %vm4301_vm1, %v4300_v14 }
 0x526   :  { %v818_v35 = vmul.f32 %v4239_v34, %v4235_v25  ;;  %3961 = vmatprep.subr.mxu1 %v4300_v14 }
 0x528   :  { %3939 = vmatmul.mubr.msk.f32.vlgmr.msra.gmra.mrb[6].mxu0 %vm305_vm2, %v818_v35  ;;  %3954 = vmatmul.mubr.msk.f32.vlgmr.msra.gmra.mrb[12].mxu1 %vm305_vm2, %v1051_v36 }
 0x529   :  { %3947 = vmatpush3.xpose.msk.msra.mxu0 %vm305_vm2, %v975_v30  ;;  %3948 = vmatprep.mubr.msk.f32.mxu0 %vm4301_vm1, %v4300_v14 }
 0x52a   :  { %3956 = vmatprep.subr.mxu0 %v4300_v14  ;;  %3963 = vmatprep.mubr.msk.f32.mxu1 %vm4301_vm1, %v4300_v14 }
 0x52c   :  { %3949 = vmatmul.mubr.msk.f32.vlgmr.msra.gmra.mrb[8].mxu0 %vm305_vm2, %v973_v37 }
 0x52d   :  { %3958 = vmatprep.mubr.msk.f32.mxu0 %vm4301_vm1, %v4300_v14 }
 0x5f7   :  { %v4604_v38 = vpop.f32.mrb[10].mxu1 }
 0x5f8   :  { %v3945_v39 = vpop.f32.mrb[11].mxu1 }
 0x5fb   :  { %v4606_v40 = vpop.f32.mrb[6].mxu0  ;;  %v1124_v41 = vpop.f32.mrb[12].mxu1 }
 0x5fc   :  { %v1129_v42 = vmul.f32 0.35355338, %v1124_v41  ;;  %v3940_v43 = vpop.f32.mrb[7].mxu0  ;;  %v3955_v44 = vpop.f32.mrb[13].mxu1 }
 0x5fe   :  { %v1131_v45 = vsel %vm304_vm3, -10000.0, %v1129_v42 }
 0x5ff   :  { %v1046_v46 = vpop.f32.mrb[8].mxu0  ;;  %v1135_v47 = vsel %vm305_vm2, %v1131_v45, -inf }
 0x600   :  { %v1128_v48 = vmul.f32 0.35355338, %v1046_v46  ;;  %1136 = vmax.xlane.f32.xlu1 %v1135_v47  ;;  %v3950_v49 = vpop.f32.mrb[9].mxu0 }
 0x602   :  { %v1130_v50 = vsel %vm304_vm3, -10000.0, %v1128_v48  ;;  %v92_v48 = vld [vmem:[%s5068_s2 + $0x8] sm:$0xff] }
 0x603   :  { %v1132_v51 = vsel %vm305_vm2, %v1130_v50, -inf }
 0x604   :  { %1133 = vmax.xlane.f32.xlu0 %v1132_v51  ;;  %v94_v51 = vld [vmem:[%s5068_s2 + $0x18] sm:$0xff] }
 0x611   :  { %1230 = vrot.lane.b32.xlu1 %v4496_v20, %s5048_s26 }
 0x615   :  { %1308 = vrot.lane.b32.xlu1 %v4498_v22, %s5046_s0 }
 0x619   :  { %1386 = vrot.lane.b32.xlu1 %v4496_v20, %s5046_s0 }
 0x61a   :  { %1154 = vrot.lane.b32.xlu0 %v4498_v22, %s5048_s26 }
 0x61d   :  { %1384 = vrot.lane.b32.xlu1 %v4504_v23, %s5046_s0 }
 0x68d   :  { %v1137_v52 = vpop.xlane.xlu1 %1136 }
 0x68e   :  { %v1139_v53 = vsub.f32 %v1131_v45, %v1137_v52 }
 0x690   :  { %v1142_v54 = vmul.f32 1.442695, %v1139_v53 }
 0x691   :  { %v1231_v55 = vpop.permute.xlu1 %1230  ;;  %v1134_v56 = vpop.xlane.xlu0 %1133 }
 0x692   :  { %4240 = vpow2.f32 %v1142_v54  ;;  %v1138_v57 = vsub.f32 %v1130_v50, %v1134_v56  ;;  %3962 = vmatpush3.msra.mxu1 %v1231_v55  ;;  %v93_v50 = vld [vmem:[%s5068_s2 + $0x10] sm:$0xff] }
 0x693   :  { %3971 = vmatprep.subr.mxu1 %v4300_v14  ;;  %v4160_v52 = vpack.c.bf16 %v94_v51, %v93_v50 }
 0x694   :  { %v1140_v59 = vmul.f32 1.442695, %v1138_v57 }
 0x695   :  { %v1155_v61 = vpop.permute.xlu0 %1154  ;;  %v1309_v3 = vpop.permute.xlu1 %1308 }
 0x696   :  { %4242 = vpow2.f32 %v1140_v59  ;;  %3957 = vmatpush3.msra.mxu0 %v1155_v61 }
 0x697   :  { %3966 = vmatprep.subr.mxu0 %v4300_v14 }
 0x699   :  { %v1387_v6 = vpop.permute.xlu1 %1386 }
 0x69c   :  { %v4241_v62 = vpop.eup %4240 }
 0x69d   :  { %v1147_v63 = vsel %vm305_vm2, %v4241_v62, 0.0 }
 0x69e   :  { %1148 = vadd.xlane.f32.xlu0 %v1147_v63 }
 0x6a0   :  { %v4243_v23 = vpop.eup %4242 }
 0x6a1   :  { %v1144_v0 = vsel %vm305_vm2, %v4243_v23, 0.0 }
 0x6a2   :  { %1145 = vadd.xlane.f32.xlu0 %v1144_v0 }
 0x6b8   :  { %1306 = vrot.lane.b32.xlu0 %v4509_v24, %s5046_s0  ;;  %v1385_v24 = vpop.permute.xlu1 %1384 }
 0x72b   :  { %v1149_v1 = vpop.xlane.xlu0 %1148 }
 0x72c   :  { %4244 = vrcp.f32 %v1149_v1 }
 0x72f   :  { %v1146_v2 = vpop.xlane.xlu0 %1145 }
 0x730   :  { %4246 = vrcp.f32 %v1146_v2 }
 0x733   :  { %v1307_v10 = vpop.permute.xlu0 %1306 }
 0x736   :  { %v4245_v4 = vpop.eup %4244 }
 0x737   :  { %v1153_v7 = vmul.f32 %v4245_v4, %v4241_v62 }
 0x739   :  { %3964 = vmatmul.mubr.msk.f32.vlgmr.msra.gmra.mrb[14].mxu1 %vm305_vm2, %v1153_v7 }
 0x73a   :  { %v4247_v8 = vpop.eup %4246  ;;  %3972 = vmatpush3.xpose.msk.msra.mxu1 %vm305_vm2, %v1387_v6  ;;  %3973 = vmatprep.mubr.msk.f32.mxu1 %vm4301_vm1, %v4300_v14 }
 0x73b   :  { %v1152_v9 = vmul.f32 %v4247_v8, %v4243_v23  ;;  %3981 = vmatprep.subr.mxu1 %v4300_v14 }
 0x73d   :  { %3959 = vmatmul.mubr.msk.f32.vlgmr.msra.gmra.mrb[10].mxu0 %vm305_vm2, %v1152_v9  ;;  %3974 = vmatmul.mubr.msk.f32.vlgmr.msra.gmra.mrb[16].mxu1 %vm305_vm2, %v1385_v24 }
 0x73e   :  { %3967 = vmatpush3.xpose.msk.msra.mxu0 %vm305_vm2, %v1309_v3  ;;  %3968 = vmatprep.mubr.msk.f32.mxu0 %vm4301_vm1, %v4300_v14 }
 0x73f   :  { %3976 = vmatprep.subr.mxu0 %v4300_v14  ;;  %3983 = vmatprep.mubr.msk.f32.mxu1 %vm4301_vm1, %v4300_v14 }
 0x741   :  { %3969 = vmatmul.mubr.msk.f32.vlgmr.msra.gmra.mrb[12].mxu0 %vm305_vm2, %v1307_v10 }
 0x742   :  { %3978 = vmatprep.mubr.msk.f32.mxu0 %vm4301_vm1, %v4300_v14 }
 0x80c   :  { %v1302_v11 = vpop.f32.mrb[14].mxu1 }
 0x80d   :  { %v3965_v13 = vpop.f32.mrb[15].mxu1 }
 0x810   :  { %v1226_v15 = vpop.f32.mrb[10].mxu0  ;;  %v1458_v16 = vpop.f32.mrb[16].mxu1 }
 0x811   :  { %v1463_v17 = vmul.f32 0.35355338, %v1458_v16  ;;  %v3960_v18 = vpop.f32.mrb[11].mxu0  ;;  %v3975_v19 = vpop.f32.mrb[17].mxu1 }
 0x813   :  { %v1465_v21 = vsel %vm304_vm3, -10000.0, %v1463_v17 }
 0x814   :  { %v1380_v25 = vpop.f32.mrb[12].mxu0  ;;  %v1469_v27 = vsel %vm305_vm2, %v1465_v21, -inf }
 0x815   :  { %v1462_v28 = vmul.f32 0.35355338, %v1380_v25  ;;  %1470 = vmax.xlane.f32.xlu1 %v1469_v27  ;;  %v3970_v29 = vpop.f32.mrb[13].mxu0 }
 0x816   :  { %v104_v29 = vld [vmem:[%s5070_s5 + $0x8] sm:$0xff] }
 0x817   :  { %v1464_v30 = vsel %vm304_vm3, -10000.0, %v1462_v28 }
 0x818   :  { %v1466_v31 = vsel %vm305_vm2, %v1464_v30, -inf }
 0x819   :  { %1467 = vmax.xlane.f32.xlu0 %v1466_v31  ;;  %v105_v31 = vld [vmem:[%s5070_s5 + $0x10] sm:$0xff] }
 0x826   :  { %1564 = vrot.lane.b32.xlu1 %v4496_v20, %s5042_s13 }
 0x82a   :  { %1642 = vrot.lane.b32.xlu1 %v4606_v40, %s5040_s27 }
 0x82e   :  { %1644 = vrot.lane.b32.xlu1 %v4604_v38, %s5040_s27 }
 0x832   :  { %1652 = vrot.lane.b32.xlu1 %v1302_v11, %s5038_s4 }
 0x8a2   :  { %v1471_v32 = vpop.xlane.xlu1 %1470 }
 0x8a3   :  { %v1473_v26 = vsub.f32 %v1465_v21, %v1471_v32  ;;  %v106_v32 = vld [vmem:[%s5070_s5 + $0x18] sm:$0xff] }
 0x8a5   :  { %v1476_v33 = vmul.f32 1.442695, %v1473_v26  ;;  %v98_v26 = vld [vmem:[%s5071_s6] sm:$0xff] }
 0x8a6   :  { %v1565_v34 = vpop.permute.xlu1 %1564  ;;  %v1468_v35 = vpop.xlane.xlu0 %1467 }
 0x8a7   :  { %4248 = vpow2.f32 %v1476_v33  ;;  %v1472_v36 = vsub.f32 %v1464_v30, %v1468_v35  ;;  %3982 = vmatpush3.msra.mxu1 %v1565_v34  ;;  %v4176_v33 = vpack.c.bf16 %v106_v32, %v105_v31  ;;  %v99_v34 = vld [vmem:[%s5071_s6 + $0x8] sm:$0xff] }
 0x8a8   :  { %v4164_v35 = vpack.c.bf16 %v99_v34, %v98_v26 }
 0x8a9   :  { %v1474_v37 = vmul.f32 1.442695, %v1472_v36  ;;  %v100_v36 = vld [vmem:[%s5071_s6 + $0x10] sm:$0xff] }
 0x8aa   :  { %v1643_v57 = vpop.permute.xlu1 %1642  ;;  %4165 = vmatprep.subr.bf16.mxu1 %v4164_v35 }
 0x8ab   :  { %4250 = vpow2.f32 %v1474_v37  ;;  %v1664_v63 = vsel %vm305_vm2, %v4564_v60, %v1643_v57  ;;  %v101_v37 = vld [vmem:[%s5071_s6 + $0x18] sm:$0xff] }
 0x8ae   :  { %v1645_v59 = vpop.permute.xlu1 %1644 }
 0x8af   :  { %v1665_v0 = vsel %vm305_vm2, %v4562_v58, %v1645_v59 }
 0x8b1   :  { %v4249_v20 = vpop.eup %4248 }
 0x8b2   :  { %v1481_v39 = vsel %vm305_vm2, %v4249_v20, 0.0  ;;  %v1653_v61 = vpop.permute.xlu1 %1652 }
 0x8b3   :  { %1482 = vadd.xlane.f32.xlu0 %v1481_v39  ;;  %v1668_v3 = vsel %vm1666_vm4, %v1665_v0, %v1653_v61  ;;  %v134_v39 = vld [vmem:[%s5016_s1 + $0x8] sm:$0xff] }
 0x8b5   :  { %v4251_v40 = vpop.eup %4250 }
 0x8b6   :  { %v1478_v38 = vsel %vm305_vm2, %v4251_v40, 0.0 }
 0x8b7   :  { %1479 = vadd.xlane.f32.xlu0 %v1478_v38 }
 0x8cd   :  { %1488 = vrot.lane.b32.xlu0 %v4498_v22, %s5042_s13  ;;  %v91_v22 = vld [vmem:[%s5068_s2] sm:$0xff] }
 0x8ce   :  { %v4156_v49 = vpack.c.bf16 %v92_v48, %v91_v22  ;;  %v3724_v48 = vld [vmem:[%s5018_s10] ss:$0 sm:$0xff] }
 0x8d1   :  { %1650 = vrot.lane.b32.xlu0 %v1226_v15, %s5038_s4  ;;  %s5069_s4 = sld [smem:[#allocation9_spill]] }
 0x8d7   :  { %v3720_v60 = vld [vmem:[%s5069_s4] ss:$0 sm:$0xff]  ;;  %s5078_s4 = smov 24  }
 0x940   :  { %v1483_v41 = vpop.xlane.xlu0 %1482 }
 0x941   :  { %4252 = vrcp.f32 %v1483_v41 }
 0x944   :  { %v1480_v42 = vpop.xlane.xlu0 %1479 }
 0x945   :  { %4254 = vrcp.f32 %v1480_v42 }
 0x948   :  { %v1489_v43 = vpop.permute.xlu0 %1488 }
 0x949   :  { %3977 = vmatpush3.msra.mxu0 %v1489_v43 }
 0x94a   :  { %4157 = vmatprep.subr.bf16.mxu0 %v4156_v49 }
 0x94b   :  { %v4253_v44 = vpop.eup %4252 }
 0x94c   :  { %v1487_v45 = vmul.f32 %v4253_v44, %v4249_v20  ;;  %v1651_v62 = vpop.permute.xlu0 %1650  ;;  %v133_v20 = vld [vmem:[%s5016_s1] sm:$0xff] }
 0x94d   :  { %v1667_v1 = vsel %vm1666_vm4, %v1664_v63, %v1651_v62  ;;  %v3725_v62 = vld [vmem:[%s5020_s12] ss:$0 sm:$0xff]  ;;  %s5072_s12 = smov 112  }
 0x94e   :  { %3984 = vmatmul.mubr.msk.f32.vlgmr.msra.gmra.mrb[18].mxu1 %vm305_vm2, %v1487_v45 }
 0x94f   :  { %v4255_v46 = vpop.eup %4254  ;;  %4167 = vmatpush3.bf16.msra.mxu1 %v4164_v35 }
 0x950   :  { %v1486_v47 = vmul.f32 %v4255_v46, %v4251_v40  ;;  %v4168_v40 = vpack.c.bf16 %v101_v37, %v100_v36 }
 0x952   :  { %3979 = vmatmul.mubr.msk.f32.vlgmr.msra.gmra.mrb[14].mxu0 %vm305_vm2, %v1486_v47  ;;  %4169 = vmatprep.subr.bf16.mxu1 %v4168_v40  ;;  %v3723_v47 = vld [vmem:[%s5017_s9] ss:$0 sm:$0xff] }
 0x953   :  { %4159 = vmatpush3.bf16.msra.mxu0 %v4156_v49  ;;  %4171 = vmatpush3.bf16.msra.mxu1 %v4168_v40 }
 0x954   :  { %4161 = vmatprep.subr.bf16.mxu0 %v4160_v52  ;;  %4019 = vmatprep.subr.mxu1 %v4300_v14 }
 0x957   :  { %4163 = vmatpush3.bf16.msra.mxu0 %v4160_v52 }
 0xa21   :  { %v1636_v53 = vpop.f32.mrb[18].mxu1 }
 0xa22   :  { %1660 = vrot.lane.b32.xlu1 %v1636_v53, %s5044_s28  ;;  %v3985_v54 = vpop.f32.mrb[19].mxu1 }
 0xa25   :  { %v1560_v55 = vpop.f32.mrb[14].mxu0 }
 0xa26   :  { %1658 = vrot.lane.b32.xlu0 %v1560_v55, %s5044_s28  ;;  %v3980_v56 = vpop.f32.mrb[15].mxu0  ;;  %v3728_v55 = vld [vmem:[%s5019_s14] ss:$0 sm:$0xff]  ;;  %s5073_s14 = smov 80  }
 0xa94   :  { %v1661_v23 = vpop.permute.xlu1 %1660 }
 0xa95   :  { %v1671_v6 = vsel %vm1669_vm5, %v1668_v3, %v1661_v23 }
 0xa98   :  { %v1659_v2 = vpop.permute.xlu0 %1658 }
 0xa99   :  { %v1670_v4 = vsel %vm1669_vm5, %v1667_v1, %v1659_v2 }
 0xa9a   :  { %3994 = vmatprep.mubr.msk.f32.mxu0 %vm141_vm0, %v1670_v4 }
 0xa9b   :  { %3995 = vmatmul.mubr.msk.f32.vlgmr.msra.gmra.mrb[16].mxu0 %vm141_vm0, %v1671_v6 }
 0xa9c   :  { %4016 = vmatprep.mubr.msk.f32.mxu0 %vm141_vm0, %v133_v20 }
 0xb6e   :  { %v3996_v7 = vpop.f32.mrb[16].mxu0 }
 0xb6f   :  { %v1756_v8 = vadd.f32 %v3996_v7, %v3720_v60  ;;  %v1750_v58 = vpop.f32.mrb[17].mxu0 }
 0xb70   :  { %v1751_v9 = vadd.f32 %v3720_v60, %v1750_v58 }
 0xb71   :  { %v1760_v24 = vadd.f32 %v1756_v8, %v4476_v12 }
 0xb72   :  { %v1759_v10 = vadd.f32 %v1751_v9, %v4457_v5  ;;  %v103_v5 = vld [vmem:[%s5070_s5] sm:$0xff] }
 0xb73   :  { %v1764_v11 = vsel %vm141_vm0, %v1760_v24, 0.0  ;;  %v4172_v30 = vpack.c.bf16 %v104_v29, %v103_v5 }
 0xb74   :  { %1765 = vadd.xlane.f32.xlu1 %v1764_v11  ;;  %v1761_v13 = vsel %vm141_vm0, %v1759_v10, 0.0 }
 0xb75   :  { %1762 = vadd.xlane.f32.xlu0 %v1761_v13  ;;  %4173 = vmatprep.subr.bf16.mxu0 %v4172_v30 }
 0xb76   :  { %4175 = vmatpush3.bf16.msra.mxu0 %v4172_v30 }
 0xb77   :  { %4177 = vmatprep.subr.bf16.mxu0 %v4176_v33 }
 0xb7a   :  { %4179 = vmatpush3.bf16.msra.mxu0 %v4176_v33 }
 0xb7b   :  { %4029 = vmatprep.subr.mxu0 %v4300_v14 }
 0xb7d   :  { %4017 = vmatmul.mubr.msk.f32.vlgmr.msra.gmra.mrb[18].mxu0 %vm141_vm0, %v134_v39 }
 0xb7e   :  { %4031 = vmatprep.mubr.msk.f32.mxu0 %vm4301_vm1, %v4300_v14 }
 0xc01   :  { %v1766_v15 = vpop.xlane.xlu1 %1765 }
 0xc02   :  { %v1769_v16 = vmul.f32 0.03125, %v1766_v15  ;;  %v1763_v17 = vpop.xlane.xlu0 %1762 }
 0xc03   :  { %v1768_v18 = vmul.f32 0.03125, %v1763_v17 }
 0xc04   :  { %v1771_v19 = vsub.f32 %v1760_v24, %v1769_v16 }
 0xc05   :  { %v1770_v21 = vsub.f32 %v1759_v10, %v1768_v18 }
 0xc06   :  { %v1773_v28 = vmul.f32 %v1771_v19, %v1771_v19 }
 0xc07   :  { %v1772_v25 = vmul.f32 %v1770_v21, %v1770_v21 }
 0xc08   :  { %v1777_v12 = vsel %vm141_vm0, %v1773_v28, 0.0 }
 0xc09   :  { %v1774_v27 = vsel %vm141_vm0, %v1772_v25, 0.0 }
 0xc0a   :  { %1775 = vadd.xlane.f32.xlu0 %v1774_v27 }
 0xc0e   :  { %1778 = vadd.xlane.f32.xlu0 %v1777_v12 }
 0xc50   :  { %v4018_v56 = vpop.f32.mrb[18].mxu0 }
 0xc51   :  { %v4754_v57 = vadd.f32 %v4018_v56, %v3728_v55  ;;  %v1969_v59 = vpop.f32.mrb[19].mxu0 }
 0xc52   :  { %v4756_v61 = vadd.f32 %v3728_v55, %v1969_v59 }
 0xc97   :  { %v1776_v38 = vpop.xlane.xlu0 %1775 }
 0xc98   :  { %v1780_v41 = vmul.f32 0.03125, %v1776_v38 }
 0xc9a   :  { %v1782_v42 = vadd.f32 1e-05, %v1780_v41 }
 0xc9b   :  { %v1779_v43 = vpop.xlane.xlu0 %1778 }
 0xc9c   :  { %4256 = vrsqrt.f32 %v1782_v42  ;;  %v1781_v44 = vmul.f32 0.03125, %v1779_v43 }
 0xc9e   :  { %v1783_v45 = vadd.f32 1e-05, %v1781_v44 }
 0xca0   :  { %4258 = vrsqrt.f32 %v1783_v45 }
 0xca6   :  { %v4257_v46 = vpop.eup %4256 }
 0xca7   :  { %v1786_v22 = vmul.f32 %v4257_v46, %v1770_v21 }
 0xca9   :  { %v1794_v49 = vmul.f32 %v3723_v47, %v1786_v22 }
 0xcaa   :  { %v4259_v50 = vpop.eup %4258 }
 0xcab   :  { %v1787_v51 = vmul.f32 %v4259_v50, %v1771_v19  ;;  %v4741_v52 = vadd.f32 %v3724_v48, %v1794_v49 }
 0xcad   :  { %v1795_v53 = vmul.f32 %v3723_v47, %v1787_v51  ;;  %4005 = vmatprep.mubr.msk.f32.mxu1 %vm141_vm0, %v4741_v52 }
 0xcaf   :  { %v4745_v54 = vadd.f32 %v3724_v48, %v1795_v53 }
 0xcb1   :  { %4006 = vmatmul.mubr.msk.f32.vlgmr.msra.gmra.mrb[20].mxu1 %vm141_vm0, %v4745_v54 }
 0xcb2   :  { %4021 = vmatprep.mubr.msk.f32.mxu1 %vm4301_vm1, %v4300_v14  ;;  %4020 = vmatpush3.xpose.msk.msra.mxu1 %vm305_vm2, %v4756_v61 }
 0xcb3   :  { %4024 = vmatprep.subr.mxu1 %v4300_v14 }
 0xd84   :  { %v4007_v63 = vpop.f32.mrb[20].mxu1 }
 0xd85   :  { %v1882_v23 = vpop.f32.mrb[21].mxu1  ;;  %v4772_v1 = vadd.f32 %v4007_v63, %v3725_v62 }
 0xd86   :  { %v4764_v0 = vadd.f32 %v3725_v62, %v1882_v23 }
 0xd88   :  { %4022 = vmatmul.mubr.msk.f32.vlgmr.msra.gmra.mrb[22].mxu1 %vm305_vm2, %v4764_v0 }
 0xd89   :  { %4025 = vmatpush3.xpose.msk.msra.mxu1 %vm305_vm2, %v4754_v57  ;;  %4026 = vmatprep.mubr.msk.f32.mxu1 %vm4301_vm1, %v4300_v14 }
 0xd8a   :  { %4034 = vmatprep.subr.mxu1 %v4300_v14 }
 0xd8c   :  { %4027 = vmatmul.mubr.msk.f32.vlgmr.msra.gmra.mrb[24].mxu1 %vm305_vm2, %v4772_v1 }
 0xd8d   :  { %4036 = vmatprep.mubr.msk.f32.mxu1 %vm4301_vm1, %v4300_v14 }
 0xe5b   :  { %v2050_v2 = vpop.f32.mrb[22].mxu1 }
 0xe5c   :  { %v2130_v3 = vmul.f32 0.35355338, %v2050_v2  ;;  %v4023_v4 = vpop.f32.mrb[23].mxu1 }
 0xe5e   :  { %v2132_v6 = vsel %vm305_vm2, %v2130_v3, -inf }
 0xe5f   :  { %2133 = vmax.xlane.f32.xlu0 %v2132_v6  ;;  %v2126_v60 = vpop.f32.mrb[24].mxu1 }
 0xe60   :  { %v2131_v7 = vmul.f32 0.35355338, %v2126_v60  ;;  %v4028_v8 = vpop.f32.mrb[25].mxu1 }
 0xe62   :  { %v2135_v58 = vsel %vm305_vm2, %v2131_v7, -inf }
 0xe63   :  { %2136 = vmax.xlane.f32.xlu1 %v2135_v58 }
 0xe74   :  { %2230 = vrot.lane.b32.xlu1 %v4754_v57, %s4302_s3 }
 0xe75   :  { %2154 = vrot.lane.b32.xlu0 %v4756_v61, %s4302_s3  ;;  %s5074_s3 = smov 104  }
 0xe78   :  { %2308 = vrot.lane.b32.xlu1 %v4756_v61, %s4303_s29 }
 0xe7c   :  { %2386 = vrot.lane.b32.xlu1 %v4754_v57, %s4303_s29 }
 0xeec   :  { %v2134_v9 = vpop.xlane.xlu0 %2133 }
 0xeed   :  { %v2138_v24 = vsub.f32 %v2130_v3, %v2134_v9 }
 0xeef   :  { %v2140_v10 = vmul.f32 1.442695, %v2138_v24 }
 0xef0   :  { %v2155_v11 = vpop.permute.xlu0 %2154  ;;  %v2137_v13 = vpop.xlane.xlu1 %2136 }
 0xef1   :  { %4260 = vpow2.f32 %v2140_v10  ;;  %v2139_v15 = vsub.f32 %v2131_v7, %v2137_v13  ;;  %4030 = vmatpush3.msra.mxu0 %v2155_v11 }
 0xef2   :  { %4039 = vmatprep.subr.mxu0 %v4300_v14 }
 0xef3   :  { %v2142_v16 = vmul.f32 1.442695, %v2139_v15 }
 0xef4   :  { %v2231_v17 = vpop.permute.xlu1 %2230 }
 0xef5   :  { %4262 = vpow2.f32 %v2142_v16  ;;  %4035 = vmatpush3.msra.mxu1 %v2231_v17 }
 0xef6   :  { %4044 = vmatprep.subr.mxu1 %v4300_v14 }
 0xef8   :  { %v2309_v27 = vpop.permute.xlu1 %2308 }
 0xefb   :  { %v4261_v18 = vpop.eup %4260 }
 0xefc   :  { %v2144_v19 = vsel %vm305_vm2, %v4261_v18, 0.0  ;;  %v2387_v28 = vpop.permute.xlu1 %2386 }
 0xefd   :  { %2145 = vadd.xlane.f32.xlu0 %v2144_v19 }
 0xeff   :  { %v4263_v21 = vpop.eup %4262 }
 0xf00   :  { %v2147_v25 = vsel %vm305_vm2, %v4263_v21, 0.0 }
 0xf01   :  { %2148 = vadd.xlane.f32.xlu1 %v2147_v25 }
 0xf12   :  { %2384 = vrot.lane.b32.xlu1 %v4772_v1, %s4303_s29 }
 0xf13   :  { %2306 = vrot.lane.b32.xlu0 %v4764_v0, %s4303_s29  ;;  %s5075_s29 = smov 72  }
 0xf8a   :  { %v2146_v12 = vpop.xlane.xlu0 %2145 }
 0xf8b   :  { %4264 = vrcp.f32 %v2146_v12 }
 0xf8e   :  { %v2149_v5 = vpop.xlane.xlu1 %2148  ;;  %v2307_v26 = vpop.permute.xlu0 %2306 }
 0xf8f   :  { %4266 = vrcp.f32 %v2149_v5 }
 0xf92   :  { %v2385_v33 = vpop.permute.xlu1 %2384 }
 0xf95   :  { %v4265_v29 = vpop.eup %4264 }
 0xf96   :  { %v2152_v30 = vmul.f32 %v4265_v29, %v4261_v18 }
 0xf98   :  { %4032 = vmatmul.mubr.msk.f32.vlgmr.msra.gmra.mrb[20].mxu0 %vm305_vm2, %v2152_v30 }
 0xf99   :  { %v4267_v31 = vpop.eup %4266  ;;  %4040 = vmatpush3.xpose.msk.msra.mxu0 %vm305_vm2, %v2309_v27  ;;  %4041 = vmatprep.mubr.msk.f32.mxu0 %vm4301_vm1, %v4300_v14 }
 0xf9a   :  { %v2153_v32 = vmul.f32 %v4267_v31, %v4263_v21  ;;  %4049 = vmatprep.subr.mxu0 %v4300_v14 }
 0xf9c   :  { %4037 = vmatmul.mubr.msk.f32.vlgmr.msra.gmra.mrb[26].mxu1 %vm305_vm2, %v2153_v32  ;;  %4042 = vmatmul.mubr.msk.f32.vlgmr.msra.gmra.mrb[22].mxu0 %vm305_vm2, %v2307_v26 }
 0xf9d   :  { %4045 = vmatpush3.xpose.msk.msra.mxu1 %vm305_vm2, %v2387_v28  ;;  %4046 = vmatprep.mubr.msk.f32.mxu1 %vm4301_vm1, %v4300_v14 }
 0xf9e   :  { %4054 = vmatprep.subr.mxu1 %v4300_v14  ;;  %4051 = vmatprep.mubr.msk.f32.mxu0 %vm4301_vm1, %v4300_v14 }
 0xfa0   :  { %4047 = vmatmul.mubr.msk.f32.vlgmr.msra.gmra.mrb[28].mxu1 %vm305_vm2, %v2385_v33 }
 0xfa1   :  { %4056 = vmatprep.mubr.msk.f32.mxu1 %vm4301_vm1, %v4300_v14 }
0x106b   :  { %v4813_v34 = vpop.f32.mrb[20].mxu0 }
0x106c   :  { %v4033_v35 = vpop.f32.mrb[21].mxu0 }
0x106f   :  { %v4815_v36 = vpop.f32.mrb[26].mxu1  ;;  %v2380_v37 = vpop.f32.mrb[22].mxu0 }
0x1070   :  { %v2462_v20 = vmul.f32 0.35355338, %v2380_v37  ;;  %v4038_v39 = vpop.f32.mrb[27].mxu1  ;;  %v4043_v40 = vpop.f32.mrb[23].mxu0 }
0x1072   :  { %v2464_v38 = vsel %vm305_vm2, %v2462_v20, -inf }
0x1073   :  { %2465 = vmax.xlane.f32.xlu0 %v2464_v38  ;;  %v2458_v41 = vpop.f32.mrb[28].mxu1 }
0x1074   :  { %v2463_v42 = vmul.f32 0.35355338, %v2458_v41  ;;  %v4048_v43 = vpop.f32.mrb[29].mxu1 }
0x1076   :  { %v2467_v44 = vsel %vm305_vm2, %v2463_v42, -inf }
0x1077   :  { %2468 = vmax.xlane.f32.xlu1 %v2467_v44 }
0x1088   :  { %2562 = vrot.lane.b32.xlu1 %v4754_v57, %s4304_s8 }
0x1089   :  { %2486 = vrot.lane.b32.xlu0 %v4756_v61, %s4304_s8  ;;  %s5076_s8 = smov 8  }
0x108c   :  { %2640 = vrot.lane.b32.xlu1 %v4756_v61, %s5072_s12 }
0x1090   :  { %2718 = vrot.lane.b32.xlu1 %v4754_v57, %s5072_s12 }
0x1094   :  { %2716 = vrot.lane.b32.xlu1 %v4772_v1, %s5072_s12 }
0x1100   :  { %v2466_v45 = vpop.xlane.xlu0 %2465 }
0x1101   :  { %v2470_v46 = vsub.f32 %v2462_v20, %v2466_v45 }
0x1103   :  { %v2472_v47 = vmul.f32 1.442695, %v2470_v46 }
0x1104   :  { %v2487_v22 = vpop.permute.xlu0 %2486  ;;  %v2469_v48 = vpop.xlane.xlu1 %2468 }
0x1105   :  { %4268 = vpow2.f32 %v2472_v47  ;;  %v2471_v49 = vsub.f32 %v2463_v42, %v2469_v48  ;;  %4050 = vmatpush3.msra.mxu0 %v2487_v22 }
0x1106   :  { %4059 = vmatprep.subr.mxu0 %v4300_v14 }
0x1107   :  { %v2474_v50 = vmul.f32 1.442695, %v2471_v49 }
0x1108   :  { %v2563_v51 = vpop.permute.xlu1 %2562 }
0x1109   :  { %4270 = vpow2.f32 %v2474_v50  ;;  %4055 = vmatpush3.msra.mxu1 %v2563_v51 }
0x110a   :  { %4064 = vmatprep.subr.mxu1 %v4300_v14 }
0x110c   :  { %v2641_v23 = vpop.permute.xlu1 %2640 }
0x110f   :  { %v4269_v53 = vpop.eup %4268 }
0x1110   :  { %v2476_v55 = vsel %vm305_vm2, %v4269_v53, 0.0  ;;  %v2719_v6 = vpop.permute.xlu1 %2718 }
0x1111   :  { %2477 = vadd.xlane.f32.xlu0 %v2476_v55 }
0x1113   :  { %v4271_v56 = vpop.eup %4270 }
0x1114   :  { %v2479_v59 = vsel %vm305_vm2, %v4271_v56, 0.0  ;;  %v2717_v8 = vpop.permute.xlu1 %2716 }
0x1115   :  { %2480 = vadd.xlane.f32.xlu0 %v2479_v59 }
0x112b   :  { %2638 = vrot.lane.b32.xlu0 %v4764_v0, %s5072_s12 }
0x119e   :  { %v2478_v62 = vpop.xlane.xlu0 %2477 }
0x119f   :  { %4272 = vrcp.f32 %v2478_v62 }
0x11a2   :  { %v2481_v63 = vpop.xlane.xlu0 %2480 }
0x11a3   :  { %4274 = vrcp.f32 %v2481_v63 }
0x11a6   :  { %v2639_v7 = vpop.permute.xlu0 %2638 }
0x11a9   :  { %v4273_v2 = vpop.eup %4272 }
0x11aa   :  { %v2484_v3 = vmul.f32 %v4273_v2, %v4269_v53 }
0x11ac   :  { %4052 = vmatmul.mubr.msk.f32.vlgmr.msra.gmra.mrb[24].mxu0 %vm305_vm2, %v2484_v3 }
0x11ad   :  { %v4275_v4 = vpop.eup %4274  ;;  %4060 = vmatpush3.xpose.msk.msra.mxu0 %vm305_vm2, %v2641_v23  ;;  %4061 = vmatprep.mubr.msk.f32.mxu0 %vm4301_vm1, %v4300_v14 }
0x11ae   :  { %v2485_v60 = vmul.f32 %v4275_v4, %v4271_v56  ;;  %4069 = vmatprep.subr.mxu0 %v4300_v14 }
0x11b0   :  { %4057 = vmatmul.mubr.msk.f32.vlgmr.msra.gmra.mrb[30].mxu1 %vm305_vm2, %v2485_v60  ;;  %4062 = vmatmul.mubr.msk.f32.vlgmr.msra.gmra.mrb[26].mxu0 %vm305_vm2, %v2639_v7 }
0x11b1   :  { %4065 = vmatpush3.xpose.msk.msra.mxu1 %vm305_vm2, %v2719_v6  ;;  %4066 = vmatprep.mubr.msk.f32.mxu1 %vm4301_vm1, %v4300_v14 }
0x11b2   :  { %4074 = vmatprep.subr.mxu1 %v4300_v14  ;;  %4071 = vmatprep.mubr.msk.f32.mxu0 %vm4301_vm1, %v4300_v14 }
0x11b4   :  { %4067 = vmatmul.mubr.msk.f32.vlgmr.msra.gmra.mrb[32].mxu1 %vm305_vm2, %v2717_v8 }
0x11b5   :  { %4076 = vmatprep.mubr.msk.f32.mxu1 %vm4301_vm1, %v4300_v14 }
0x127f   :  { %v4851_v58 = vpop.f32.mrb[24].mxu0 }
0x1280   :  { %v4053_v9 = vpop.f32.mrb[25].mxu0 }
0x1283   :  { %v4853_v24 = vpop.f32.mrb[30].mxu1  ;;  %v2712_v10 = vpop.f32.mrb[26].mxu0 }
0x1284   :  { %v2794_v11 = vmul.f32 0.35355338, %v2712_v10  ;;  %v4058_v13 = vpop.f32.mrb[31].mxu1  ;;  %v4063_v15 = vpop.f32.mrb[27].mxu0 }
0x1285   :  { %v109_v13 = vld [vmem:[%s5021_s15 + $0x8] sm:$0xff] }
0x1286   :  { %v2796_v16 = vsel %vm305_vm2, %v2794_v11, -inf }
0x1287   :  { %2797 = vmax.xlane.f32.xlu0 %v2796_v16  ;;  %v2790_v17 = vpop.f32.mrb[32].mxu1  ;;  %v110_v16 = vld [vmem:[%s5021_s15 + $0x10] sm:$0xff] }
0x1288   :  { %v2795_v18 = vmul.f32 0.35355338, %v2790_v17  ;;  %v4068_v19 = vpop.f32.mrb[33].mxu1  ;;  %v111_v17 = vld [vmem:[%s5021_s15 + $0x18] sm:$0xff] }
0x128a   :  { %v2799_v21 = vsel %vm305_vm2, %v2795_v18, -inf }
0x128b   :  { %2800 = vmax.xlane.f32.xlu1 %v2799_v21 }
0x129c   :  { %2894 = vrot.lane.b32.xlu1 %v4754_v57, %s5073_s14 }
0x129d   :  { %2818 = vrot.lane.b32.xlu0 %v4756_v61, %s5073_s14 }
0x12a0   :  { %2972 = vrot.lane.b32.xlu1 %v4756_v61, %s5074_s3 }
0x12a4   :  { %3050 = vrot.lane.b32.xlu1 %v4754_v57, %s5074_s3 }
0x12a8   :  { %3048 = vrot.lane.b32.xlu1 %v4772_v1, %s5074_s3 }
0x1314   :  { %v2798_v25 = vpop.xlane.xlu0 %2797 }
0x1315   :  { %v2802_v27 = vsub.f32 %v2794_v11, %v2798_v25 }
0x1317   :  { %v2804_v28 = vmul.f32 1.442695, %v2802_v27 }
0x1318   :  { %v2819_v12 = vpop.permute.xlu0 %2818  ;;  %v2801_v5 = vpop.xlane.xlu1 %2800 }
0x1319   :  { %4276 = vpow2.f32 %v2804_v28  ;;  %v2803_v29 = vsub.f32 %v2795_v18, %v2801_v5  ;;  %4070 = vmatpush3.msra.mxu0 %v2819_v12  ;;  %v4184_v18 = vpack.c.bf16 %v111_v17, %v110_v16 }
0x131a   :  { %4079 = vmatprep.subr.mxu0 %v4300_v14 }
0x131b   :  { %v2806_v30 = vmul.f32 1.442695, %v2803_v29 }
0x131c   :  { %v2895_v31 = vpop.permute.xlu1 %2894 }
0x131d   :  { %4278 = vpow2.f32 %v2806_v30  ;;  %4075 = vmatpush3.msra.mxu1 %v2895_v31 }
0x131e   :  { %4084 = vmatprep.subr.mxu1 %v4300_v14 }
0x1320   :  { %v2973_v20 = vpop.permute.xlu1 %2972 }
0x1323   :  { %v4277_v32 = vpop.eup %4276 }
0x1324   :  { %v2808_v26 = vsel %vm305_vm2, %v4277_v32, 0.0  ;;  %v3051_v41 = vpop.permute.xlu1 %3050 }
0x1325   :  { %2809 = vadd.xlane.f32.xlu0 %v2808_v26 }
0x1327   :  { %v4279_v1 = vpop.eup %4278 }
0x1328   :  { %v2811_v33 = vsel %vm305_vm2, %v4279_v1, 0.0  ;;  %v3049_v43 = vpop.permute.xlu1 %3048 }
0x1329   :  { %2812 = vadd.xlane.f32.xlu0 %v2811_v33 }
0x133f   :  { %2970 = vrot.lane.b32.xlu0 %v4764_v0, %s5074_s3 }
0x13b2   :  { %v2810_v35 = vpop.xlane.xlu0 %2809 }
0x13b3   :  { %4280 = vrcp.f32 %v2810_v35 }
0x13b6   :  { %v2813_v37 = vpop.xlane.xlu0 %2812 }
0x13b7   :  { %4282 = vrcp.f32 %v2813_v37 }
0x13ba   :  { %v2971_v0 = vpop.permute.xlu0 %2970 }
0x13bd   :  { %v4281_v39 = vpop.eup %4280 }
0x13be   :  { %v2816_v40 = vmul.f32 %v4281_v39, %v4277_v32 }
0x13c0   :  { %4072 = vmatmul.mubr.msk.f32.vlgmr.msra.gmra.mrb[28].mxu0 %vm305_vm2, %v2816_v40 }
0x13c1   :  { %v4283_v38 = vpop.eup %4282  ;;  %4080 = vmatpush3.xpose.msk.msra.mxu0 %vm305_vm2, %v2973_v20  ;;  %4081 = vmatprep.mubr.msk.f32.mxu0 %vm4301_vm1, %v4300_v14 }
0x13c2   :  { %v2817_v42 = vmul.f32 %v4283_v38, %v4279_v1  ;;  %4089 = vmatprep.subr.mxu0 %v4300_v14 }
0x13c4   :  { %4077 = vmatmul.mubr.msk.f32.vlgmr.msra.gmra.mrb[34].mxu1 %vm305_vm2, %v2817_v42  ;;  %4082 = vmatmul.mubr.msk.f32.vlgmr.msra.gmra.mrb[30].mxu0 %vm305_vm2, %v2971_v0 }
0x13c5   :  { %4085 = vmatpush3.xpose.msk.msra.mxu1 %vm305_vm2, %v3051_v41  ;;  %4086 = vmatprep.mubr.msk.f32.mxu1 %vm4301_vm1, %v4300_v14 }
0x13c6   :  { %4094 = vmatprep.subr.mxu1 %v4300_v14  ;;  %4091 = vmatprep.mubr.msk.f32.mxu0 %vm4301_vm1, %v4300_v14 }
0x13c8   :  { %4087 = vmatmul.mubr.msk.f32.vlgmr.msra.gmra.mrb[36].mxu1 %vm305_vm2, %v3049_v43 }
0x13c9   :  { %4096 = vmatprep.mubr.msk.f32.mxu1 %vm4301_vm1, %v4300_v14 }
0x1493   :  { %v2890_v44 = vpop.f32.mrb[28].mxu0 }
0x1494   :  { %v4073_v45 = vpop.f32.mrb[29].mxu0 }
0x1497   :  { %v2966_v46 = vpop.f32.mrb[34].mxu1  ;;  %v3044_v47 = vpop.f32.mrb[30].mxu0 }
0x1498   :  { %v3126_v22 = vmul.f32 0.35355338, %v3044_v47  ;;  %v4078_v48 = vpop.f32.mrb[35].mxu1  ;;  %v4083_v49 = vpop.f32.mrb[31].mxu0 }
0x149a   :  { %v3128_v50 = vsel %vm305_vm2, %v3126_v22, -inf }
0x149b   :  { %3129 = vmax.xlane.f32.xlu0 %v3128_v50  ;;  %v3122_v51 = vpop.f32.mrb[36].mxu1 }
0x149c   :  { %v3127_v53 = vmul.f32 0.35355338, %v3122_v51  ;;  %v4088_v55 = vpop.f32.mrb[37].mxu1  ;;  %v116_v51 = vld [vmem:[%s5023_s19 + $0x8] sm:$0xff] }
0x149d   :  { %v117_v55 = vld [vmem:[%s5023_s19 + $0x10] sm:$0xff] }
0x149e   :  { %v3131_v56 = vsel %vm305_vm2, %v3127_v53, -inf }
0x149f   :  { %3132 = vmax.xlane.f32.xlu1 %v3131_v56  ;;  %v118_v56 = vld [vmem:[%s5023_s19 + $0x18] sm:$0xff] }
0x14b0   :  { %3226 = vrot.lane.b32.xlu1 %v4754_v57, %s5075_s29 }
0x14b4   :  { %3304 = vrot.lane.b32.xlu1 %v4851_v58, %s5076_s8 }
0x14b8   :  { %3306 = vrot.lane.b32.xlu1 %v4853_v24, %s5076_s8 }
0x14bc   :  { %3314 = vrot.lane.b32.xlu1 %v2966_v46, %s5077_s30 }
0x1528   :  { %v3130_v14 = vpop.xlane.xlu0 %3129 }
0x1529   :  { %v3134_v59 = vsub.f32 %v3126_v22, %v3130_v14  ;;  %v4192_v14 = vpack.c.bf16 %v118_v56, %v117_v55  ;;  %v3766_v55 = vld [vmem:[%s5029_s23] ss:$0 sm:$0xff] }
0x152b   :  { %v3136_v62 = vmul.f32 1.442695, %v3134_v59  ;;  %v120_v59 = vld [vmem:[%s5024_s21] sm:$0xff] }
0x152c   :  { %v3133_v63 = vpop.xlane.xlu1 %3132 }
0x152d   :  { %4284 = vpow2.f32 %v3136_v62  ;;  %v3135_v23 = vsub.f32 %v3127_v53, %v3133_v63  ;;  %v121_v62 = vld [vmem:[%s5024_s21 + $0x8] sm:$0xff]  ;;  %v122_v63 = vld [vmem:[%s5024_s21 + $0x10] sm:$0xff] }
0x152f   :  { %v3138_v2 = vmul.f32 1.442695, %v3135_v23  ;;  %v4196_v23 = vpack.c.bf16 %v121_v62, %v120_v59  ;;  %v3767_v59 = vld [vmem:[%s5030_s24] ss:$0 sm:$0xff] }
0x1530   :  { %v3227_v3 = vpop.permute.xlu1 %3226 }
0x1531   :  { %4286 = vpow2.f32 %v3138_v2  ;;  %4095 = vmatpush3.msra.mxu1 %v3227_v3  ;;  %v123_v2 = vld [vmem:[%s5024_s21 + $0x18] sm:$0xff] }
0x1532   :  { %v4200_v3 = vpack.c.bf16 %v123_v2, %v122_v63 }
0x1534   :  { %v3305_v28 = vpop.permute.xlu1 %3304 }
0x1535   :  { %v3326_v29 = vsel %vm305_vm2, %v4813_v34, %v3305_v28  ;;  %v3755_v34 = vld [vmem:[%s5022_s16] ss:$0 sm:$0xff] }
0x1537   :  { %v4285_v4 = vpop.eup %4284 }
0x1538   :  { %v3140_v57 = vsel %vm305_vm2, %v4285_v4, 0.0  ;;  %v3307_v12 = vpop.permute.xlu1 %3306 }
0x1539   :  { %3141 = vadd.xlane.f32.xlu0 %v3140_v57  ;;  %v3327_v1 = vsel %vm305_vm2, %v4815_v36, %v3307_v12  ;;  %v125_v57 = vld [vmem:[%s5024_s21 + $0x28] sm:$0xff]  ;;  %v3760_v12 = vld [vmem:[%s5027_s20] ss:$0 sm:$0xff] }
0x153b   :  { %v4287_v6 = vpop.eup %4286 }
0x153c   :  { %v3143_v60 = vsel %vm305_vm2, %v4287_v6, 0.0  ;;  %v3315_v30 = vpop.permute.xlu1 %3314 }
0x153d   :  { %3144 = vadd.xlane.f32.xlu0 %v3143_v60  ;;  %v3329_v33 = vsel %vm1666_vm4, %v3327_v1, %v3315_v30  ;;  %v3763_v1 = vld [vmem:[%s5028_s22] ss:$0 sm:$0xff] }
0x1553   :  { %3150 = vrot.lane.b32.xlu0 %v4756_v61, %s5075_s29  ;;  %v108_v61 = vld [vmem:[%s5021_s15] sm:$0xff] }
0x1554   :  { %v4180_v15 = vpack.c.bf16 %v109_v13, %v108_v61  ;;  %v3759_v13 = vld [vmem:[%s5026_s18] ss:$0 sm:$0xff] }
0x1557   :  { %3312 = vrot.lane.b32.xlu0 %v2890_v44, %s5077_s30 }
0x15c6   :  { %v3142_v7 = vpop.xlane.xlu0 %3141 }
0x15c7   :  { %4288 = vrcp.f32 %v3142_v7 }
0x15ca   :  { %v3145_v8 = vpop.xlane.xlu0 %3144 }
0x15cb   :  { %4290 = vrcp.f32 %v3145_v8 }
0x15ce   :  { %v3151_v58 = vpop.permute.xlu0 %3150 }
0x15cf   :  { %4090 = vmatpush3.msra.mxu0 %v3151_v58 }
0x15d0   :  { %4181 = vmatprep.subr.bf16.mxu0 %v4180_v15 }
0x15d1   :  { %v4289_v9 = vpop.eup %4288 }
0x15d2   :  { %v3148_v24 = vmul.f32 %v4289_v9, %v4285_v4  ;;  %v3313_v5 = vpop.permute.xlu0 %3312  ;;  %v124_v4 = vld [vmem:[%s5024_s21 + $0x20] sm:$0xff] }
0x15d3   :  { %v3328_v31 = vsel %vm1666_vm4, %v3326_v29, %v3313_v5 }
0x15d4   :  { %4092 = vmatmul.mubr.msk.f32.vlgmr.msra.gmra.mrb[32].mxu0 %vm305_vm2, %v3148_v24 }
0x15d5   :  { %v4291_v10 = vpop.eup %4290  ;;  %4183 = vmatpush3.bf16.msra.mxu0 %v4180_v15 }
0x15d6   :  { %v3149_v11 = vmul.f32 %v4291_v10, %v4287_v6  ;;  %4185 = vmatprep.subr.bf16.mxu0 %v4184_v18  ;;  %v4204_v6 = vpack.c.bf16 %v125_v57, %v124_v4 }
0x15d8   :  { %4097 = vmatmul.mubr.msk.f32.vlgmr.msra.gmra.mrb[38].mxu1 %vm305_vm2, %v3149_v11  ;;  %v3758_v11 = vld [vmem:[%s5025_s17] ss:$0 sm:$0xff] }
0x15d9   :  { %4187 = vmatpush3.bf16.msra.mxu0 %v4184_v18 }
0x15da   :  { %4197 = vmatprep.subr.bf16.mxu0 %v4196_v23 }
0x16a7   :  { %v3222_v19 = vpop.f32.mrb[32].mxu0 }
0x16a8   :  { %3320 = vrot.lane.b32.xlu0 %v3222_v19, %s5078_s4  ;;  %v4093_v21 = vpop.f32.mrb[33].mxu0 }
0x16ab   :  { %v3298_v25 = vpop.f32.mrb[38].mxu1 }
0x16ac   :  { %3322 = vrot.lane.b32.xlu1 %v3298_v25, %s5078_s4  ;;  %v4098_v27 = vpop.f32.mrb[39].mxu1  ;;  %v126_v25 = vld [vmem:[%s5024_s21 + $0x30] sm:$0xff] }
0x16ad   :  { %v127_v27 = vld [vmem:[%s5024_s21 + $0x38] sm:$0xff] }
0x16ae   :  { %v4208_v28 = vpack.c.bf16 %v127_v27, %v126_v25 }
0x171a   :  { %v3321_v32 = vpop.permute.xlu0 %3320 }
0x171b   :  { %v3330_v26 = vsel %vm1669_vm5, %v3328_v31, %v3321_v32 }
0x171c   :  { %4107 = vmatprep.mubr.msk.f32.mxu0 %vm141_vm0, %v3330_v26 }
0x171e   :  { %v3323_v35 = vpop.permute.xlu1 %3322 }
0x171f   :  { %v3331_v37 = vsel %vm1669_vm5, %v3329_v33, %v3323_v35 }
0x1720   :  { %4108 = vmatmul.mubr.msk.f32.vlgmr.msra.gmra.mrb[34].mxu0 %vm141_vm0, %v3331_v37 }
0x1721   :  { %4199 = vmatpush3.bf16.msra.mxu0 %v4196_v23 }
0x1722   :  { %4201 = vmatprep.subr.bf16.mxu0 %v4200_v3 }
0x1725   :  { %4203 = vmatpush3.bf16.msra.mxu0 %v4200_v3 }
0x1726   :  { %4205 = vmatprep.subr.bf16.mxu0 %v4204_v6 }
0x1729   :  { %4207 = vmatpush3.bf16.msra.mxu0 %v4204_v6 }
0x172a   :  { %4209 = vmatprep.subr.bf16.mxu0 %v4208_v28 }
0x172d   :  { %4211 = vmatpush3.bf16.msra.mxu0 %v4208_v28 }
0x17f3   :  { %v4109_v20 = vpop.f32.mrb[34].mxu0 }
0x17f4   :  { %v3416_v39 = vadd.f32 %v4109_v20, %v3755_v34  ;;  %v3410_v40 = vpop.f32.mrb[35].mxu0 }
0x17f5   :  { %v3411_v38 = vadd.f32 %v3755_v34, %v3410_v40 }
0x17f6   :  { %v3420_v41 = vadd.f32 %v3416_v39, %v4745_v54 }
0x17f7   :  { %v3419_v42 = vadd.f32 %v3411_v38, %v4741_v52  ;;  %v115_v52 = vld [vmem:[%s5023_s19] sm:$0xff] }
0x17f8   :  { %v3424_v36 = vsel %vm141_vm0, %v3420_v41, 0.0  ;;  %v4188_v53 = vpack.c.bf16 %v116_v51, %v115_v52 }
0x17f9   :  { %3425 = vadd.xlane.f32.xlu1 %v3424_v36  ;;  %v3421_v0 = vsel %vm141_vm0, %v3419_v42, 0.0 }
0x17fa   :  { %3422 = vadd.xlane.f32.xlu0 %v3421_v0  ;;  %4189 = vmatprep.subr.bf16.mxu1 %v4188_v53 }
0x17fb   :  { %4191 = vmatpush3.bf16.msra.mxu1 %v4188_v53 }
0x17fc   :  { %4193 = vmatprep.subr.bf16.mxu1 %v4192_v14 }
0x17ff   :  { %4195 = vmatpush3.bf16.msra.mxu1 %v4192_v14 }
0x1886   :  { %v3426_v43 = vpop.xlane.xlu1 %3425 }
0x1887   :  { %v3428_v44 = vmul.f32 0.03125, %v3426_v43  ;;  %v3423_v45 = vpop.xlane.xlu0 %3422 }
0x1888   :  { %v3427_v46 = vmul.f32 0.03125, %v3423_v45 }
0x1889   :  { %v3430_v47 = vsub.f32 %v3420_v41, %v3428_v44 }
0x188a   :  { %v3429_v22 = vsub.f32 %v3419_v42, %v3427_v46 }
0x188b   :  { %v3432_v50 = vmul.f32 %v3430_v47, %v3430_v47 }
0x188c   :  { %v3431_v48 = vmul.f32 %v3429_v22, %v3429_v22 }
0x188d   :  { %v3436_v54 = vsel %vm141_vm0, %v3432_v50, 0.0 }
0x188e   :  { %v3433_v49 = vsel %vm141_vm0, %v3431_v48, 0.0 }
0x188f   :  { %3434 = vadd.xlane.f32.xlu0 %v3433_v49 }
0x1893   :  { %3437 = vadd.xlane.f32.xlu0 %v3436_v54 }
0x191c   :  { %v3435_v60 = vpop.xlane.xlu0 %3434 }
0x191d   :  { %v3439_v7 = vmul.f32 0.03125, %v3435_v60 }
0x191f   :  { %v3441_v8 = vadd.f32 1e-05, %v3439_v7 }
0x1920   :  { %v3438_v58 = vpop.xlane.xlu0 %3437 }
0x1921   :  { %4292 = vrsqrt.f32 %v3441_v8  ;;  %v3440_v9 = vmul.f32 0.03125, %v3438_v58 }
0x1923   :  { %v3442_v24 = vadd.f32 1e-05, %v3440_v9 }
0x1925   :  { %4294 = vrsqrt.f32 %v3442_v24 }
0x192b   :  { %v4293_v10 = vpop.eup %4292 }
0x192c   :  { %v3445_v61 = vmul.f32 %v4293_v10, %v3429_v22 }
0x192e   :  { %v3453_v15 = vmul.f32 %v3758_v11, %v3445_v61 }
0x192f   :  { %v4295_v16 = vpop.eup %4294 }
0x1930   :  { %v3446_v17 = vmul.f32 %v4295_v16, %v3430_v47  ;;  %v3461_v18 = vadd.f32 %v3759_v13, %v3453_v15 }
0x1932   :  { %v3454_v19 = vmul.f32 %v3758_v11, %v3446_v17  ;;  %4118 = vmatprep.mubr.msk.f32.mxu1 %vm141_vm0, %v3461_v18 }
0x1934   :  { %v3462_v21 = vadd.f32 %v3759_v13, %v3454_v19 }
0x1936   :  { %4119 = vmatmul.mubr.msk.f32.vlgmr.msra.gmra.mrb[40].mxu1 %vm141_vm0, %v3462_v21 }
0x1a09   :  { %v4120_v5 = vpop.f32.mrb[40].mxu1 }
0x1a0a   :  { %v3547_v29 = vadd.f32 %v4120_v5, %v3760_v12  ;;  %v3541_v30 = vpop.f32.mrb[41].mxu1 }
0x1a0b   :  { %v3542_v31 = vadd.f32 %v3760_v12, %v3541_v30 }
0x1a0c   :  { %v3551_v26 = vmax.f32 %v3547_v29, 0.0 }
0x1a0d   :  { %v3550_v32 = vmax.f32 %v3542_v31, 0.0 }
0x1a0f   :  { %4137 = vmatprep.mubr.msk.f32.mxu0 %vm3558_vm6, %v3550_v32 }
0x1a10   :  { %4138 = vmatmul.mubr.msk.f32.vlgmr.msra.gmra.mrb[36].mxu0 %vm3558_vm6, %v3551_v26 }
0x1ae3   :  { %v4139_v33 = vpop.f32.mrb[36].mxu0 }
0x1ae4   :  { %v3637_v35 = vadd.f32 %v4139_v33, %v3763_v1  ;;  %v3631_v37 = vpop.f32.mrb[37].mxu0 }
0x1ae5   :  { %v3632_v34 = vadd.f32 %v3763_v1, %v3631_v37 }
0x1ae6   :  { %v3641_v20 = vadd.f32 %v3637_v35, %v3462_v21 }
0x1ae7   :  { %v3640_v39 = vadd.f32 %v3632_v34, %v3461_v18 }
0x1ae8   :  { %v3645_v40 = vsel %vm141_vm0, %v3641_v20, 0.0 }
0x1ae9   :  { %3646 = vadd.xlane.f32.xlu1 %v3645_v40  ;;  %v3642_v38 = vsel %vm141_vm0, %v3640_v39, 0.0 }
0x1aea   :  { %3643 = vadd.xlane.f32.xlu0 %v3642_v38 }
0x1b76   :  { %v3647_v41 = vpop.xlane.xlu1 %3646 }
0x1b77   :  { %v3649_v42 = vmul.f32 0.03125, %v3647_v41  ;;  %v3644_v36 = vpop.xlane.xlu0 %3643 }
0x1b78   :  { %v3648_v0 = vmul.f32 0.03125, %v3644_v36 }
0x1b79   :  { %v3651_v43 = vsub.f32 %v3641_v20, %v3649_v42 }
0x1b7a   :  { %v3650_v44 = vsub.f32 %v3640_v39, %v3648_v0 }
0x1b7b   :  { %v3653_v45 = vmul.f32 %v3651_v43, %v3651_v43 }
0x1b7c   :  { %v3652_v46 = vmul.f32 %v3650_v44, %v3650_v44 }
0x1b7d   :  { %v3657_v47 = vsel %vm141_vm0, %v3653_v45, 0.0 }
0x1b7e   :  { %3658 = vadd.xlane.f32.xlu1 %v3657_v47  ;;  %v3654_v22 = vsel %vm141_vm0, %v3652_v46, 0.0 }
0x1b7f   :  { %3655 = vadd.xlane.f32.xlu0 %v3654_v22 }
0x1c0b   :  { %v3659_v48 = vpop.xlane.xlu1 %3658 }
0x1c0c   :  { %v3661_v49 = vmul.f32 0.03125, %v3659_v48  ;;  %v3656_v50 = vpop.xlane.xlu0 %3655 }
0x1c0d   :  { %v3660_v54 = vmul.f32 0.03125, %v3656_v50 }
0x1c0e   :  { %v3663_v52 = vadd.f32 1e-05, %v3661_v49 }
0x1c0f   :  { %v3662_v51 = vadd.f32 1e-05, %v3660_v54 }
0x1c10   :  { %4296 = vrsqrt.f32 %v3663_v52 }
0x1c11   :  { %4298 = vrsqrt.f32 %v3662_v51 }
0x1c1a   :  { %v4297_v53 = vpop.eup %4296 }
0x1c1b   :  { %v4299_v56 = vpop.eup %4298  ;;  %v3667_v14 = vmul.f32 %v4297_v53, %v3651_v43 }
0x1c1c   :  { %v3666_v62 = vmul.f32 %v4299_v56, %v3650_v44 }
0x1c1d   :  { %v3675_v63 = vmul.f32 %v3766_v55, %v3667_v14 }
0x1c1e   :  { %v3674_v23 = vmul.f32 %v3766_v55, %v3666_v62 }
0x1c1f   :  { %v3683_v2 = vadd.f32 %v3767_v59, %v3675_v63 }
0x1c20   :  { %v3682_v3 = vadd.f32 %v3767_v59, %v3674_v23 }
0x1c21   :  { %3685 = vst.msk [vmem:[%s5031_s25 + $0x8] sm:$0xff] %vm141_vm0, %v3683_v2 }
0x1c22   :  { %3684 = vst.msk [vmem:[%s5031_s25] sm:$0xff] %vm141_vm0, %v3682_v3 }

</bundles_post_ra>
